<compile_context>
chip_gen: v5e
topology: v5e:2x2
jax: 0.10.0
libtpu: 0.0.40
codegen_flags: <defaults>
</compile_context>

<pallas_src>
import numpy as np
import jax
import jax.numpy as jnp
from jax import lax
from jax.experimental import pallas as pl
from jax.experimental.pallas import tpu as pltpu


# ---------------------------------------------------------------------------
# geometry helpers
# ---------------------------------------------------------------------------
def _pool_out(n):
    # avg_pool2d(kernel=5, stride=3, padding=2, ceil_mode=False)
    return (n + 2 * 2 - 5) // 3 + 1


def _geometry(H, W):
    """Padded-flat layout constants for one conv stage."""
    Wp, Hp = W + 2, H + 2
    L = Hp * Wp                 # padded flat length (conv input)
    Lo = H * Wp - 2             # conv-output flat length (r = h*Wp + w, h<H)
    shifts = tuple(dy * Wp + dx for dy in range(3) for dx in range(3))
    return Wp, Hp, L, Lo, shifts


def _pool_repad_matrix(H, W, repad):
    """(Lo, L_next) {0,1} projection: the 5x5 / stride-3 / pad-2 pooling TAPS of the
    padded-flat conv output, written into the (zero-padded) flat input layout of the next
    layer (or the plain pooled grid if repad=False).  Entries are exact 0/1 (bf16-safe);
    the 1/25 average is folded into the downstream weights host-side.  Wrap-around
    "garbage" columns of the conv output (w in {W, W+1}) get all-zero rows."""
    Wp = W + 2
    Lo = H * Wp - 2
    Ho, Wo = _pool_out(H), _pool_out(W)
    if repad:
        Hpn, Wpn = Ho + 2, Wo + 2
        Ln = Hpn * Wpn
    else:
        Wpn = None
        Ln = Ho * Wo
    Q = np.zeros((Lo, Ln), np.float32)
    for ho in range(Ho):
        for wo in range(Wo):
            j = (ho + 1) * Wpn + (wo + 1) if repad else ho * Wo + wo
            for ky in range(5):
                for kx in range(5):
                    h = 3 * ho - 2 + ky
                    w = 3 * wo - 2 + kx
                    if 0 <= h < H and 0 <= w < W:
                        Q[h * Wp + w, j] = 1.0
    return jnp.asarray(Q)


# ---------------------------------------------------------------------------
# fused kernel: conv1/relu/pool1 -> conv2/relu/pool2 -> conv3/relu/pool3 -> fc
# ---------------------------------------------------------------------------
def _make_fused_kernel(Cp, geom1, geom2, geom3, C, O):
    _, _, _L1, L1o, shifts1 = geom1
    _, _, _L2, L2o, shifts2 = geom2
    _, _, _L3, L3o, shifts3 = geom3

    def kernel(x1_ref, wt1_ref, b1_ref, q1_ref,
               wt2_ref, b2_ref, q2_ref,
               wt3_ref, b3_ref, g_ref, bfc_ref,
               out_ref,
               k1_scr, x2_scr, k2_scr, x3_scr, k3_scr):
        f32 = jnp.float32
        bf16 = jnp.bfloat16

        # ---- layer 1: in-kernel im2col (9 lane-shifted slices of the padded frame) ----
        x1 = x1_ref[0]                                               # (Cp, L1) bf16
        for t, s in enumerate(shifts1):
            k1_scr[t * Cp:(t + 1) * Cp, :] = x1[:, s:s + L1o]
        y1 = jnp.dot(wt1_ref[...], k1_scr[...], preferred_element_type=f32)
        a1 = jnp.maximum(y1 + b1_ref[...], 0.0).astype(bf16)        # bias + ReLU
        # pool1 (sum taps) + re-pad for layer 2: ONE bf16 {0,1} MXU matmul
        # (the 1/25 is folded into wt2, so x2 holds 25x the reference pooled activation)
        x2_scr[...] = jnp.dot(a1, q1_ref[...], preferred_element_type=f32).astype(bf16)

        # ---- layer 2: in-VMEM im2col (9*C, L2o) from 9 lane-offset slices ----
        for t, s in enumerate(shifts2):
            k2_scr[t * C:(t + 1) * C, :] = x2_scr[:, s:s + L2o]
        y2 = jnp.dot(wt2_ref[...], k2_scr[...], preferred_element_type=f32)
        a2 = jnp.maximum(y2 + b2_ref[...], 0.0).astype(bf16)
        x3_scr[...] = jnp.dot(a2, q2_ref[...], preferred_element_type=f32).astype(bf16)

        # ---- layer 3 ----
        for t, s in enumerate(shifts3):
            k3_scr[t * C:(t + 1) * C, :] = x3_scr[:, s:s + L3o]
        y3 = jnp.dot(wt3_ref[...], k3_scr[...], preferred_element_type=f32)
        a3 = jnp.maximum(y3 + b3_ref[...], 0.0)                      # (C, L3o) f32

        # ---- fused pool3 + flatten(c,h,w) + fc:  out[o] = sum_{c,r} a3[c,r]*G[o,c,r] ----
        prod = a3[None, :, :] * g_ref[...]                           # (O, C, L3o) f32
        row = jnp.sum(jnp.sum(prod, axis=2), axis=1)                 # (O,)
        out_ref[...] = row.reshape(1, 1, O) + bfc_ref[...]

    return kernel


# ---------------------------------------------------------------------------
# wrapper
# ---------------------------------------------------------------------------
def ddpg_forward(x_nchw, params):
    x = x_nchw.astype(jnp.float32)
    B, Cin, H, W = x.shape
    Cout = params["conv1_w"].shape[-1]
    O = params["fc_w"].shape[-1]
    Cp = ((Cin + 7) // 8) * 8          # pad channels -> aligned 8-sublane im2col writes

    H1, W1 = H, W
    H2, W2 = _pool_out(H1), _pool_out(W1)
    H3, W3 = _pool_out(H2), _pool_out(W2)
    Hf, Wf = _pool_out(H3), _pool_out(W3)
    P3 = Hf * Wf

    g1 = _geometry(H1, W1)
    g2 = _geometry(H2, W2)
    g3 = _geometry(H3, W3)
    _, _, L1, L1o, _ = g1
    _, _, L2, L2o, _ = g2
    _, _, L3, L3o, _ = g3

    # ---- padded input: channels(->Cp) on sublanes, zero-padded flat spatial on lanes ----
    xp = jnp.pad(x, ((0, 0), (0, Cp - Cin), (1, 1), (1, 1))).reshape(B, Cp, L1)
    xp = xp.astype(jnp.bfloat16)                                      # (B, Cp, L1)

    # ---- conv1 weights -> (Cout, 9*Cp), zero columns for the padding channels ----
    w1 = params["conv1_w"].reshape(9, Cin, Cout).astype(jnp.float32)
    w1p = jnp.zeros((9, Cp, Cout), jnp.float32).at[:, :Cin, :].set(w1)
    wt1 = jnp.transpose(w1p.reshape(9 * Cp, Cout)).astype(jnp.bfloat16)

    # ---- conv2/conv3 weights -> (Cout, 9*Cout); fold the upstream pool's 1/25 in ----
    def flat_w(w):
        return jnp.transpose(w.reshape(-1, w.shape[-1]))

    wt2 = (flat_w(params["conv2_w"]) * (1.0 / 25.0)).astype(jnp.bfloat16)
    wt3 = (flat_w(params["conv3_w"]) * (1.0 / 25.0)).astype(jnp.bfloat16)
    b1 = params["conv1_b"].reshape(Cout, 1).astype(jnp.float32)
    b2 = params["conv2_b"].reshape(Cout, 1).astype(jnp.float32)
    b3 = params["conv3_b"].reshape(Cout, 1).astype(jnp.float32)

    # ---- {0,1} pooling(+re-pad) projections, exact in bf16 ----
    q1 = _pool_repad_matrix(H1, W1, repad=True).astype(jnp.bfloat16)  # (L1o, L2)
    q2 = _pool_repad_matrix(H2, W2, repad=True).astype(jnp.bfloat16)  # (L2o, L3)

    # ---- fused pool3 + flatten(c,h,w) + fc:  G[o,c,r] = (1/25) sum_j q3[r,j] fcw[c,j,o] ----
    q3 = _pool_repad_matrix(H3, W3, repad=False)                      # (L3o, P3) f32
    fcw = params["fc_w"].reshape(Cout, P3, O).astype(jnp.float32)
    G = (1.0 / 25.0) * jnp.einsum("rp,cpo->ocr", q3, fcw,
                                  precision=lax.Precision.HIGHEST)    # (O, Cout, L3o) f32
    bfc = params["fc_b"].reshape(1, 1, O).astype(jnp.float32)

    c2 = lambda b: (0, 0)
    c3 = lambda b: (0, 0, 0)
    in_specs = [
        pl.BlockSpec((1, Cp, L1), lambda b: (b, 0, 0)),
        pl.BlockSpec(wt1.shape, c2), pl.BlockSpec(b1.shape, c2), pl.BlockSpec(q1.shape, c2),
        pl.BlockSpec(wt2.shape, c2), pl.BlockSpec(b2.shape, c2), pl.BlockSpec(q2.shape, c2),
        pl.BlockSpec(wt3.shape, c2), pl.BlockSpec(b3.shape, c2),
        pl.BlockSpec(G.shape, c3), pl.BlockSpec(bfc.shape, c3),
    ]
    out_specs = pl.BlockSpec((1, 1, O), lambda b: (b, 0, 0))          # lane-dense row

    kernel = _make_fused_kernel(Cp, g1, g2, g3, Cout, O)

    out = pl.pallas_call(
        kernel,
        out_shape=jax.ShapeDtypeStruct((B, 1, O), jnp.float32),
        grid=(B,),
        in_specs=in_specs,
        out_specs=out_specs,
        scratch_shapes=[
            pltpu.VMEM((9 * Cp, L1o), jnp.bfloat16),     # layer-1 im2col
            pltpu.VMEM((Cout, L2), jnp.bfloat16),        # pooled1 (padded flat, 25x scale)
            pltpu.VMEM((9 * Cout, L2o), jnp.bfloat16),   # layer-2 im2col
            pltpu.VMEM((Cout, L3), jnp.bfloat16),        # pooled2 (padded flat, 25x scale)
            pltpu.VMEM((9 * Cout, L3o), jnp.bfloat16),   # layer-3 im2col
        ],
        compiler_params=pltpu.CompilerParams(dimension_semantics=("parallel",)),
    )(xp, wt1, b1, q1, wt2, b2, q2, wt3, b3, G, bfc)

    return out[:, 0, :]


# ---------------------------------------------------------------------------
# deterministic synthetic params + pure-JAX reference
# ---------------------------------------------------------------------------
def init_params(key, cin, cout, fc_in, out_dim):
    ks = jax.random.split(key, 8)

    def conv_w(k, ci, co):
        return jax.random.normal(k, (3, 3, ci, co), jnp.float32) / np.sqrt(9 * ci)

    return {
        "conv1_w": conv_w(ks[0], cin, cout),
        "conv1_b": 0.01 * jax.random.normal(ks[1], (cout,), jnp.float32),
        "conv2_w": conv_w(ks[2], cout, cout),
        "conv2_b": 0.01 * jax.random.normal(ks[3], (cout,), jnp.float32),
        "conv3_w": conv_w(ks[4], cout, cout),
        "conv3_b": 0.01 * jax.random.normal(ks[5], (cout,), jnp.float32),
        "fc_w": jax.random.normal(ks[6], (fc_in, out_dim), jnp.float32) / np.sqrt(fc_in),
        "fc_b": 0.01 * jax.random.normal(ks[7], (out_dim,), jnp.float32),
    }


def reference_forward(x_nchw, params):
    x = jnp.transpose(x_nchw, (0, 2, 3, 1)).astype(jnp.float32)
    for i in range(3):
        w, b = params[f"conv{i + 1}_w"], params[f"conv{i + 1}_b"]
        y = lax.conv_general_dilated(
            x, w, (1, 1), "SAME",
            dimension_numbers=("NHWC", "HWIO", "NHWC"),
            precision=lax.Precision.HIGHEST)
        y = jnp.maximum(y + b, 0.0)
        s = lax.reduce_window(y, jnp.float32(0.0), lax.add,
                              (1, 5, 5, 1), (1, 3, 3, 1),
                              ((0, 0), (2, 2), (2, 2), (0, 0)))
        x = s / 25.0
    xf = jnp.transpose(x, (0, 3, 1, 2)).reshape(x.shape[0], -1)
    return jnp.dot(xf, params["fc_w"], precision=lax.Precision.HIGHEST) + params["fc_b"]


# ---------------------------------------------------------------------------
if __name__ == "__main__":
    key = jax.random.PRNGKey(0)
    kx, kp = jax.random.split(key)

    # small stand-in for the module's [b, 3, 600, 400] input
    B, C, H, W = 2, 3, 27, 36
    x = jax.random.normal(kx, (B, C, H, W), jnp.float32)

    Hf = _pool_out(_pool_out(_pool_out(H)))
    Wf = _pool_out(_pool_out(_pool_out(W)))
    fc_in = 64 * Hf * Wf      # 128 here; would be 22080 at the full 600x400 resolution
    params = init_params(kp, C, 64, fc_in, 2)

    fwd = jax.jit(ddpg_forward)
    out = jax.block_until_ready(fwd(x, params))

    ref = reference_forward(x, params)
    np.testing.assert_allclose(np.asarray(out), np.asarray(ref), rtol=4e-2, atol=4e-2)

    print("KERNEL_OK")
</pallas_src>

<mosaic_0001>
module attributes {stable_mosaic.version = 11 : i64} {
  func.func @kernel(%arg0: i32, %arg1: memref<1x8x1102xbf16, #tpu.memory_space<vmem>>, %arg2: memref<64x72xbf16, #tpu.memory_space<vmem>>, %arg3: memref<64x1xf32, #tpu.memory_space<vmem>>, %arg4: memref<1024x154xbf16, #tpu.memory_space<vmem>>, %arg5: memref<64x576xbf16, #tpu.memory_space<vmem>>, %arg6: memref<64x1xf32, #tpu.memory_space<vmem>>, %arg7: memref<124x30xbf16, #tpu.memory_space<vmem>>, %arg8: memref<64x576xbf16, #tpu.memory_space<vmem>>, %arg9: memref<64x1xf32, #tpu.memory_space<vmem>>, %arg10: memref<2x64x16xf32, #tpu.memory_space<vmem>>, %arg11: memref<1x1x2xf32, #tpu.memory_space<vmem>>, %arg12: memref<1x1x2xf32, #tpu.memory_space<vmem>>, %arg13: memref<72x1024xbf16, #tpu.memory_space<vmem>>, %arg14: memref<64x154xbf16, #tpu.memory_space<vmem>>, %arg15: memref<576x124xbf16, #tpu.memory_space<vmem>>, %arg16: memref<64x30xbf16, #tpu.memory_space<vmem>>, %arg17: memref<576x16xbf16, #tpu.memory_space<vmem>>) attributes {dimension_semantics = [#tpu.dimension_semantics<parallel>], iteration_bounds = array<i64: 2>, scalar_prefetch = 0 : i64, scratch_operands = 5 : i64, tpu.core_type = #tpu.core_type<tc>, window_params = [{transform_indices = @transform_0, window_bounds = array<i64: 1, 8, 1102>}, {pipeline_mode = #tpu.pipeline_mode<synchronous>, transform_indices = @transform_1, window_bounds = array<i64: 64, 72>}, {pipeline_mode = #tpu.pipeline_mode<synchronous>, transform_indices = @transform_2, window_bounds = array<i64: 64, 1>}, {pipeline_mode = #tpu.pipeline_mode<synchronous>, transform_indices = @transform_3, window_bounds = array<i64: 1024, 154>}, {pipeline_mode = #tpu.pipeline_mode<synchronous>, transform_indices = @transform_4, window_bounds = array<i64: 64, 576>}, {pipeline_mode = #tpu.pipeline_mode<synchronous>, transform_indices = @transform_5, window_bounds = array<i64: 64, 1>}, {pipeline_mode = #tpu.pipeline_mode<synchronous>, transform_indices = @transform_6, window_bounds = array<i64: 124, 30>}, {pipeline_mode = #tpu.pipeline_mode<synchronous>, transform_indices = @transform_7, window_bounds = array<i64: 64, 576>}, {pipeline_mode = #tpu.pipeline_mode<synchronous>, transform_indices = @transform_8, window_bounds = array<i64: 64, 1>}, {pipeline_mode = #tpu.pipeline_mode<synchronous>, transform_indices = @transform_9, window_bounds = array<i64: 2, 64, 16>}, {pipeline_mode = #tpu.pipeline_mode<synchronous>, transform_indices = @transform_10, window_bounds = array<i64: 1, 1, 2>}, {transform_indices = @transform_11, window_bounds = array<i64: 1, 1, 2>}]} {
    %c0 = arith.constant 0 : index
    %c0_0 = arith.constant 0 : index
    %c0_1 = arith.constant 0 : index
    %0 = vector.load %arg1[%c0, %c0_0, %c0_1] : memref<1x8x1102xbf16, #tpu.memory_space<vmem>>, vector<1x8x1102xbf16>
    %1 = vector.shape_cast %0 : vector<1x8x1102xbf16> to vector<8x1102xbf16>
    %2 = vector.extract_strided_slice %1 {offsets = [0, 0], sizes = [8, 1024], strides = [1, 1]} : vector<8x1102xbf16> to vector<8x1024xbf16>
    %c0_2 = arith.constant 0 : index
    %c0_3 = arith.constant 0 : index
    %3 = vector.load %arg13[%c0_2, %c0_3] : memref<72x1024xbf16, #tpu.memory_space<vmem>>, vector<8x1024xbf16>
    tpu.vector_store %arg13[%c0_2, %c0_3], %2 {strides = array<i32>} : memref<72x1024xbf16, #tpu.memory_space<vmem>>, vector<8x1024xbf16>,
    %4 = vector.extract_strided_slice %1 {offsets = [0, 1], sizes = [8, 1024], strides = [1, 1]} : vector<8x1102xbf16> to vector<8x1024xbf16>
    %c8 = arith.constant 8 : index
    %c0_4 = arith.constant 0 : index
    %5 = vector.load %arg13[%c8, %c0_4] : memref<72x1024xbf16, #tpu.memory_space<vmem>>, vector<8x1024xbf16>
    tpu.vector_store %arg13[%c8, %c0_4], %4 {strides = array<i32>} : memref<72x1024xbf16, #tpu.memory_space<vmem>>, vector<8x1024xbf16>,
    %6 = vector.extract_strided_slice %1 {offsets = [0, 2], sizes = [8, 1024], strides = [1, 1]} : vector<8x1102xbf16> to vector<8x1024xbf16>
    %c16 = arith.constant 16 : index
    %c0_5 = arith.constant 0 : index
    %7 = vector.load %arg13[%c16, %c0_5] : memref<72x1024xbf16, #tpu.memory_space<vmem>>, vector<8x1024xbf16>
    tpu.vector_store %arg13[%c16, %c0_5], %6 {strides = array<i32>} : memref<72x1024xbf16, #tpu.memory_space<vmem>>, vector<8x1024xbf16>,
    %8 = vector.extract_strided_slice %1 {offsets = [0, 38], sizes = [8, 1024], strides = [1, 1]} : vector<8x1102xbf16> to vector<8x1024xbf16>
    %c24 = arith.constant 24 : index
    %c0_6 = arith.constant 0 : index
    %9 = vector.load %arg13[%c24, %c0_6] : memref<72x1024xbf16, #tpu.memory_space<vmem>>, vector<8x1024xbf16>
    tpu.vector_store %arg13[%c24, %c0_6], %8 {strides = array<i32>} : memref<72x1024xbf16, #tpu.memory_space<vmem>>, vector<8x1024xbf16>,
    %10 = vector.extract_strided_slice %1 {offsets = [0, 39], sizes = [8, 1024], strides = [1, 1]} : vector<8x1102xbf16> to vector<8x1024xbf16>
    %c32 = arith.constant 32 : index
    %c0_7 = arith.constant 0 : index
    %11 = vector.load %arg13[%c32, %c0_7] : memref<72x1024xbf16, #tpu.memory_space<vmem>>, vector<8x1024xbf16>
    tpu.vector_store %arg13[%c32, %c0_7], %10 {strides = array<i32>} : memref<72x1024xbf16, #tpu.memory_space<vmem>>, vector<8x1024xbf16>,
    %12 = vector.extract_strided_slice %1 {offsets = [0, 40], sizes = [8, 1024], strides = [1, 1]} : vector<8x1102xbf16> to vector<8x1024xbf16>
    %c40 = arith.constant 40 : index
    %c0_8 = arith.constant 0 : index
    %13 = vector.load %arg13[%c40, %c0_8] : memref<72x1024xbf16, #tpu.memory_space<vmem>>, vector<8x1024xbf16>
    tpu.vector_store %arg13[%c40, %c0_8], %12 {strides = array<i32>} : memref<72x1024xbf16, #tpu.memory_space<vmem>>, vector<8x1024xbf16>,
    %14 = vector.extract_strided_slice %1 {offsets = [0, 76], sizes = [8, 1024], strides = [1, 1]} : vector<8x1102xbf16> to vector<8x1024xbf16>
    %c48 = arith.constant 48 : index
    %c0_9 = arith.constant 0 : index
    %15 = vector.load %arg13[%c48, %c0_9] : memref<72x1024xbf16, #tpu.memory_space<vmem>>, vector<8x1024xbf16>
    tpu.vector_store %arg13[%c48, %c0_9], %14 {strides = array<i32>} : memref<72x1024xbf16, #tpu.memory_space<vmem>>, vector<8x1024xbf16>,
    %16 = vector.extract_strided_slice %1 {offsets = [0, 77], sizes = [8, 1024], strides = [1, 1]} : vector<8x1102xbf16> to vector<8x1024xbf16>
    %c56 = arith.constant 56 : index
    %c0_10 = arith.constant 0 : index
    %17 = vector.load %arg13[%c56, %c0_10] : memref<72x1024xbf16, #tpu.memory_space<vmem>>, vector<8x1024xbf16>
    tpu.vector_store %arg13[%c56, %c0_10], %16 {strides = array<i32>} : memref<72x1024xbf16, #tpu.memory_space<vmem>>, vector<8x1024xbf16>,
    %18 = vector.extract_strided_slice %1 {offsets = [0, 78], sizes = [8, 1024], strides = [1, 1]} : vector<8x1102xbf16> to vector<8x1024xbf16>
    %c64 = arith.constant 64 : index
    %c0_11 = arith.constant 0 : index
    %19 = vector.load %arg13[%c64, %c0_11] : memref<72x1024xbf16, #tpu.memory_space<vmem>>, vector<8x1024xbf16>
    tpu.vector_store %arg13[%c64, %c0_11], %18 {strides = array<i32>} : memref<72x1024xbf16, #tpu.memory_space<vmem>>, vector<8x1024xbf16>,
    %c0_12 = arith.constant 0 : index
    %c0_13 = arith.constant 0 : index
    %20 = vector.load %arg2[%c0_12, %c0_13] : memref<64x72xbf16, #tpu.memory_space<vmem>>, vector<64x72xbf16>
    %c0_14 = arith.constant 0 : index
    %c0_15 = arith.constant 0 : index
    %21 = vector.load %arg13[%c0_14, %c0_15] : memref<72x1024xbf16, #tpu.memory_space<vmem>>, vector<72x1024xbf16>
    %cst = arith.constant dense<0.000000e+00> : vector<64x1024xf32>
    %22 = tpu.matmul %20, %21, %cst {dimension_numbers = #tpu.dot_dimension_numbers<[1], [0], [0], [1], [0, 0, 1, 1], [], []>} : vector<64x72xbf16>, vector<72x1024xbf16>, vector<64x1024xf32> -> vector<64x1024xf32>
    %c0_16 = arith.constant 0 : index
    %c0_17 = arith.constant 0 : index
    %23 = vector.load %arg3[%c0_16, %c0_17] : memref<64x1xf32, #tpu.memory_space<vmem>>, vector<64x1xf32>
    %24 = vector.broadcast %23 : vector<64x1xf32> to vector<64x1024xf32>
    %25 = arith.addf %22, %24 : vector<64x1024xf32>
    %cst_18 = arith.constant 0.000000e+00 : f32
    %26 = vector.broadcast %cst_18 : f32 to vector<64x1024xf32>
    %27 = arith.maximumf %25, %26 : vector<64x1024xf32>
    %28 = arith.truncf %27 : vector<64x1024xf32> to vector<64x1024xbf16>
    %c0_19 = arith.constant 0 : index
    %c0_20 = arith.constant 0 : index
    %29 = vector.load %arg4[%c0_19, %c0_20] : memref<1024x154xbf16, #tpu.memory_space<vmem>>, vector<1024x154xbf16>
    %cst_21 = arith.constant dense<0.000000e+00> : vector<64x154xf32>
    %30 = tpu.matmul %28, %29, %cst_21 {dimension_numbers = #tpu.dot_dimension_numbers<[1], [0], [0], [1], [0, 0, 1, 1], [], []>} : vector<64x1024xbf16>, vector<1024x154xbf16>, vector<64x154xf32> -> vector<64x154xf32>
    %31 = arith.truncf %30 : vector<64x154xf32> to vector<64x154xbf16>
    %c0_22 = arith.constant 0 : index
    %c0_23 = arith.constant 0 : index
    %32 = vector.load %arg14[%c0_22, %c0_23] : memref<64x154xbf16, #tpu.memory_space<vmem>>, vector<64x154xbf16>
    tpu.vector_store %arg14[%c0_22, %c0_23], %31 {strides = array<i32>} : memref<64x154xbf16, #tpu.memory_space<vmem>>, vector<64x154xbf16>,
    %c0_24 = arith.constant 0 : index
    %c0_25 = arith.constant 0 : index
    %33 = vector.load %arg14[%c0_24, %c0_25] : memref<64x154xbf16, #tpu.memory_space<vmem>>, vector<64x124xbf16>
    %c0_26 = arith.constant 0 : index
    %c0_27 = arith.constant 0 : index
    %34 = vector.load %arg15[%c0_26, %c0_27] : memref<576x124xbf16, #tpu.memory_space<vmem>>, vector<64x124xbf16>
    tpu.vector_store %arg15[%c0_26, %c0_27], %33 {strides = array<i32>} : memref<576x124xbf16, #tpu.memory_space<vmem>>, vector<64x124xbf16>,
    %c0_28 = arith.constant 0 : index
    %c1 = arith.constant 1 : index
    %35 = vector.load %arg14[%c0_28, %c1] : memref<64x154xbf16, #tpu.memory_space<vmem>>, vector<64x124xbf16>
    %c64_29 = arith.constant 64 : index
    %c0_30 = arith.constant 0 : index
    %36 = vector.load %arg15[%c64_29, %c0_30] : memref<576x124xbf16, #tpu.memory_space<vmem>>, vector<64x124xbf16>
    tpu.vector_store %arg15[%c64_29, %c0_30], %35 {strides = array<i32>} : memref<576x124xbf16, #tpu.memory_space<vmem>>, vector<64x124xbf16>,
    %c0_31 = arith.constant 0 : index
    %c2 = arith.constant 2 : index
    %37 = vector.load %arg14[%c0_31, %c2] : memref<64x154xbf16, #tpu.memory_space<vmem>>, vector<64x124xbf16>
    %c128 = arith.constant 128 : index
    %c0_32 = arith.constant 0 : index
    %38 = vector.load %arg15[%c128, %c0_32] : memref<576x124xbf16, #tpu.memory_space<vmem>>, vector<64x124xbf16>
    tpu.vector_store %arg15[%c128, %c0_32], %37 {strides = array<i32>} : memref<576x124xbf16, #tpu.memory_space<vmem>>, vector<64x124xbf16>,
    %c0_33 = arith.constant 0 : index
    %c14 = arith.constant 14 : index
    %39 = vector.load %arg14[%c0_33, %c14] : memref<64x154xbf16, #tpu.memory_space<vmem>>, vector<64x124xbf16>
    %c192 = arith.constant 192 : index
    %c0_34 = arith.constant 0 : index
    %40 = vector.load %arg15[%c192, %c0_34] : memref<576x124xbf16, #tpu.memory_space<vmem>>, vector<64x124xbf16>
    tpu.vector_store %arg15[%c192, %c0_34], %39 {strides = array<i32>} : memref<576x124xbf16, #tpu.memory_space<vmem>>, vector<64x124xbf16>,
    %c0_35 = arith.constant 0 : index
    %c15 = arith.constant 15 : index
    %41 = vector.load %arg14[%c0_35, %c15] : memref<64x154xbf16, #tpu.memory_space<vmem>>, vector<64x124xbf16>
    %c256 = arith.constant 256 : index
    %c0_36 = arith.constant 0 : index
    %42 = vector.load %arg15[%c256, %c0_36] : memref<576x124xbf16, #tpu.memory_space<vmem>>, vector<64x124xbf16>
    tpu.vector_store %arg15[%c256, %c0_36], %41 {strides = array<i32>} : memref<576x124xbf16, #tpu.memory_space<vmem>>, vector<64x124xbf16>,
    %c0_37 = arith.constant 0 : index
    %c16_38 = arith.constant 16 : index
    %43 = vector.load %arg14[%c0_37, %c16_38] : memref<64x154xbf16, #tpu.memory_space<vmem>>, vector<64x124xbf16>
    %c320 = arith.constant 320 : index
    %c0_39 = arith.constant 0 : index
    %44 = vector.load %arg15[%c320, %c0_39] : memref<576x124xbf16, #tpu.memory_space<vmem>>, vector<64x124xbf16>
    tpu.vector_store %arg15[%c320, %c0_39], %43 {strides = array<i32>} : memref<576x124xbf16, #tpu.memory_space<vmem>>, vector<64x124xbf16>,
    %c0_40 = arith.constant 0 : index
    %c28 = arith.constant 28 : index
    %45 = vector.load %arg14[%c0_40, %c28] : memref<64x154xbf16, #tpu.memory_space<vmem>>, vector<64x124xbf16>
    %c384 = arith.constant 384 : index
    %c0_41 = arith.constant 0 : index
    %46 = vector.load %arg15[%c384, %c0_41] : memref<576x124xbf16, #tpu.memory_space<vmem>>, vector<64x124xbf16>
    tpu.vector_store %arg15[%c384, %c0_41], %45 {strides = array<i32>} : memref<576x124xbf16, #tpu.memory_space<vmem>>, vector<64x124xbf16>,
    %c0_42 = arith.constant 0 : index
    %c29 = arith.constant 29 : index
    %47 = vector.load %arg14[%c0_42, %c29] : memref<64x154xbf16, #tpu.memory_space<vmem>>, vector<64x124xbf16>
    %c448 = arith.constant 448 : index
    %c0_43 = arith.constant 0 : index
    %48 = vector.load %arg15[%c448, %c0_43] : memref<576x124xbf16, #tpu.memory_space<vmem>>, vector<64x124xbf16>
    tpu.vector_store %arg15[%c448, %c0_43], %47 {strides = array<i32>} : memref<576x124xbf16, #tpu.memory_space<vmem>>, vector<64x124xbf16>,
    %c0_44 = arith.constant 0 : index
    %c30 = arith.constant 30 : index
    %49 = vector.load %arg14[%c0_44, %c30] : memref<64x154xbf16, #tpu.memory_space<vmem>>, vector<64x124xbf16>
    %c512 = arith.constant 512 : index
    %c0_45 = arith.constant 0 : index
    %50 = vector.load %arg15[%c512, %c0_45] : memref<576x124xbf16, #tpu.memory_space<vmem>>, vector<64x124xbf16>
    tpu.vector_store %arg15[%c512, %c0_45], %49 {strides = array<i32>} : memref<576x124xbf16, #tpu.memory_space<vmem>>, vector<64x124xbf16>,
    %c0_46 = arith.constant 0 : index
    %c0_47 = arith.constant 0 : index
    %51 = vector.load %arg5[%c0_46, %c0_47] : memref<64x576xbf16, #tpu.memory_space<vmem>>, vector<64x576xbf16>
    %c0_48 = arith.constant 0 : index
    %c0_49 = arith.constant 0 : index
    %52 = vector.load %arg15[%c0_48, %c0_49] : memref<576x124xbf16, #tpu.memory_space<vmem>>, vector<576x124xbf16>
    %cst_50 = arith.constant dense<0.000000e+00> : vector<64x124xf32>
    %53 = tpu.matmul %51, %52, %cst_50 {dimension_numbers = #tpu.dot_dimension_numbers<[1], [0], [0], [1], [0, 0, 1, 1], [], []>} : vector<64x576xbf16>, vector<576x124xbf16>, vector<64x124xf32> -> vector<64x124xf32>
    %c0_51 = arith.constant 0 : index
    %c0_52 = arith.constant 0 : index
    %54 = vector.load %arg6[%c0_51, %c0_52] : memref<64x1xf32, #tpu.memory_space<vmem>>, vector<64x1xf32>
    %55 = vector.broadcast %54 : vector<64x1xf32> to vector<64x124xf32>
    %56 = arith.addf %53, %55 : vector<64x124xf32>
    %cst_53 = arith.constant 0.000000e+00 : f32
    %57 = vector.broadcast %cst_53 : f32 to vector<64x124xf32>
    %58 = arith.maximumf %56, %57 : vector<64x124xf32>
    %59 = arith.truncf %58 : vector<64x124xf32> to vector<64x124xbf16>
    %c0_54 = arith.constant 0 : index
    %c0_55 = arith.constant 0 : index
    %60 = vector.load %arg7[%c0_54, %c0_55] : memref<124x30xbf16, #tpu.memory_space<vmem>>, vector<124x30xbf16>
    %cst_56 = arith.constant dense<0.000000e+00> : vector<64x30xf32>
    %61 = tpu.matmul %59, %60, %cst_56 {dimension_numbers = #tpu.dot_dimension_numbers<[1], [0], [0], [1], [0, 0, 1, 1], [], []>} : vector<64x124xbf16>, vector<124x30xbf16>, vector<64x30xf32> -> vector<64x30xf32>
    %62 = arith.truncf %61 : vector<64x30xf32> to vector<64x30xbf16>
    %c0_57 = arith.constant 0 : index
    %c0_58 = arith.constant 0 : index
    %63 = vector.load %arg16[%c0_57, %c0_58] : memref<64x30xbf16, #tpu.memory_space<vmem>>, vector<64x30xbf16>
    tpu.vector_store %arg16[%c0_57, %c0_58], %62 {strides = array<i32>} : memref<64x30xbf16, #tpu.memory_space<vmem>>, vector<64x30xbf16>,
    %c0_59 = arith.constant 0 : index
    %c0_60 = arith.constant 0 : index
    %64 = vector.load %arg16[%c0_59, %c0_60] : memref<64x30xbf16, #tpu.memory_space<vmem>>, vector<64x16xbf16>
    %c0_61 = arith.constant 0 : index
    %c0_62 = arith.constant 0 : index
    %65 = vector.load %arg17[%c0_61, %c0_62] : memref<576x16xbf16, #tpu.memory_space<vmem>>, vector<64x16xbf16>
    tpu.vector_store %arg17[%c0_61, %c0_62], %64 {strides = array<i32>} : memref<576x16xbf16, #tpu.memory_space<vmem>>, vector<64x16xbf16>,
    %c0_63 = arith.constant 0 : index
    %c1_64 = arith.constant 1 : index
    %66 = vector.load %arg16[%c0_63, %c1_64] : memref<64x30xbf16, #tpu.memory_space<vmem>>, vector<64x16xbf16>
    %c64_65 = arith.constant 64 : index
    %c0_66 = arith.constant 0 : index
    %67 = vector.load %arg17[%c64_65, %c0_66] : memref<576x16xbf16, #tpu.memory_space<vmem>>, vector<64x16xbf16>
    tpu.vector_store %arg17[%c64_65, %c0_66], %66 {strides = array<i32>} : memref<576x16xbf16, #tpu.memory_space<vmem>>, vector<64x16xbf16>,
    %c0_67 = arith.constant 0 : index
    %c2_68 = arith.constant 2 : index
    %68 = vector.load %arg16[%c0_67, %c2_68] : memref<64x30xbf16, #tpu.memory_space<vmem>>, vector<64x16xbf16>
    %c128_69 = arith.constant 128 : index
    %c0_70 = arith.constant 0 : index
    %69 = vector.load %arg17[%c128_69, %c0_70] : memref<576x16xbf16, #tpu.memory_space<vmem>>, vector<64x16xbf16>
    tpu.vector_store %arg17[%c128_69, %c0_70], %68 {strides = array<i32>} : memref<576x16xbf16, #tpu.memory_space<vmem>>, vector<64x16xbf16>,
    %c0_71 = arith.constant 0 : index
    %c6 = arith.constant 6 : index
    %70 = vector.load %arg16[%c0_71, %c6] : memref<64x30xbf16, #tpu.memory_space<vmem>>, vector<64x16xbf16>
    %c192_72 = arith.constant 192 : index
    %c0_73 = arith.constant 0 : index
    %71 = vector.load %arg17[%c192_72, %c0_73] : memref<576x16xbf16, #tpu.memory_space<vmem>>, vector<64x16xbf16>
    tpu.vector_store %arg17[%c192_72, %c0_73], %70 {strides = array<i32>} : memref<576x16xbf16, #tpu.memory_space<vmem>>, vector<64x16xbf16>,
    %c0_74 = arith.constant 0 : index
    %c7 = arith.constant 7 : index
    %72 = vector.load %arg16[%c0_74, %c7] : memref<64x30xbf16, #tpu.memory_space<vmem>>, vector<64x16xbf16>
    %c256_75 = arith.constant 256 : index
    %c0_76 = arith.constant 0 : index
    %73 = vector.load %arg17[%c256_75, %c0_76] : memref<576x16xbf16, #tpu.memory_space<vmem>>, vector<64x16xbf16>
    tpu.vector_store %arg17[%c256_75, %c0_76], %72 {strides = array<i32>} : memref<576x16xbf16, #tpu.memory_space<vmem>>, vector<64x16xbf16>,
    %c0_77 = arith.constant 0 : index
    %c8_78 = arith.constant 8 : index
    %74 = vector.load %arg16[%c0_77, %c8_78] : memref<64x30xbf16, #tpu.memory_space<vmem>>, vector<64x16xbf16>
    %c320_79 = arith.constant 320 : index
    %c0_80 = arith.constant 0 : index
    %75 = vector.load %arg17[%c320_79, %c0_80] : memref<576x16xbf16, #tpu.memory_space<vmem>>, vector<64x16xbf16>
    tpu.vector_store %arg17[%c320_79, %c0_80], %74 {strides = array<i32>} : memref<576x16xbf16, #tpu.memory_space<vmem>>, vector<64x16xbf16>,
    %c0_81 = arith.constant 0 : index
    %c12 = arith.constant 12 : index
    %76 = vector.load %arg16[%c0_81, %c12] : memref<64x30xbf16, #tpu.memory_space<vmem>>, vector<64x16xbf16>
    %c384_82 = arith.constant 384 : index
    %c0_83 = arith.constant 0 : index
    %77 = vector.load %arg17[%c384_82, %c0_83] : memref<576x16xbf16, #tpu.memory_space<vmem>>, vector<64x16xbf16>
    tpu.vector_store %arg17[%c384_82, %c0_83], %76 {strides = array<i32>} : memref<576x16xbf16, #tpu.memory_space<vmem>>, vector<64x16xbf16>,
    %c0_84 = arith.constant 0 : index
    %c13 = arith.constant 13 : index
    %78 = vector.load %arg16[%c0_84, %c13] : memref<64x30xbf16, #tpu.memory_space<vmem>>, vector<64x16xbf16>
    %c448_85 = arith.constant 448 : index
    %c0_86 = arith.constant 0 : index
    %79 = vector.load %arg17[%c448_85, %c0_86] : memref<576x16xbf16, #tpu.memory_space<vmem>>, vector<64x16xbf16>
    tpu.vector_store %arg17[%c448_85, %c0_86], %78 {strides = array<i32>} : memref<576x16xbf16, #tpu.memory_space<vmem>>, vector<64x16xbf16>,
    %c0_87 = arith.constant 0 : index
    %c14_88 = arith.constant 14 : index
    %80 = vector.load %arg16[%c0_87, %c14_88] : memref<64x30xbf16, #tpu.memory_space<vmem>>, vector<64x16xbf16>
    %c512_89 = arith.constant 512 : index
    %c0_90 = arith.constant 0 : index
    %81 = vector.load %arg17[%c512_89, %c0_90] : memref<576x16xbf16, #tpu.memory_space<vmem>>, vector<64x16xbf16>
    tpu.vector_store %arg17[%c512_89, %c0_90], %80 {strides = array<i32>} : memref<576x16xbf16, #tpu.memory_space<vmem>>, vector<64x16xbf16>,
    %c0_91 = arith.constant 0 : index
    %c0_92 = arith.constant 0 : index
    %82 = vector.load %arg8[%c0_91, %c0_92] : memref<64x576xbf16, #tpu.memory_space<vmem>>, vector<64x576xbf16>
    %c0_93 = arith.constant 0 : index
    %c0_94 = arith.constant 0 : index
    %83 = vector.load %arg17[%c0_93, %c0_94] : memref<576x16xbf16, #tpu.memory_space<vmem>>, vector<576x16xbf16>
    %cst_95 = arith.constant dense<0.000000e+00> : vector<64x16xf32>
    %84 = tpu.matmul %82, %83, %cst_95 {dimension_numbers = #tpu.dot_dimension_numbers<[1], [0], [0], [1], [0, 0, 1, 1], [], []>} : vector<64x576xbf16>, vector<576x16xbf16>, vector<64x16xf32> -> vector<64x16xf32>
    %c0_96 = arith.constant 0 : index
    %c0_97 = arith.constant 0 : index
    %85 = vector.load %arg9[%c0_96, %c0_97] : memref<64x1xf32, #tpu.memory_space<vmem>>, vector<64x1xf32>
    %86 = vector.broadcast %85 : vector<64x1xf32> to vector<64x16xf32>
    %87 = arith.addf %84, %86 : vector<64x16xf32>
    %cst_98 = arith.constant 0.000000e+00 : f32
    %88 = vector.broadcast %cst_98 : f32 to vector<64x16xf32>
    %89 = arith.maximumf %87, %88 : vector<64x16xf32>
    %90 = vector.shape_cast %89 : vector<64x16xf32> to vector<1x64x16xf32>
    %c0_99 = arith.constant 0 : index
    %c0_100 = arith.constant 0 : index
    %c0_101 = arith.constant 0 : index
    %91 = vector.load %arg10[%c0_99, %c0_100, %c0_101] : memref<2x64x16xf32, #tpu.memory_space<vmem>>, vector<2x64x16xf32>
    %92 = vector.broadcast %90 : vector<1x64x16xf32> to vector<2x64x16xf32>
    %93 = arith.mulf %92, %91 : vector<2x64x16xf32>
    %cst_102 = arith.constant dense<0.000000e+00> : vector<2x64xf32>
    %94 = vector.multi_reduction <add>, %93, %cst_102 [2] : vector<2x64x16xf32> to vector<2x64xf32>
    %cst_103 = arith.constant dense<0.000000e+00> : vector<2xf32>
    %95 = vector.multi_reduction <add>, %94, %cst_103 [1] : vector<2x64xf32> to vector<2xf32>
    %96 = vector.shape_cast %95 : vector<2xf32> to vector<1x1x2xf32>
    %c0_104 = arith.constant 0 : index
    %c0_105 = arith.constant 0 : index
    %c0_106 = arith.constant 0 : index
    %97 = vector.load %arg11[%c0_104, %c0_105, %c0_106] : memref<1x1x2xf32, #tpu.memory_space<vmem>>, vector<1x1x2xf32>
    %98 = arith.addf %96, %97 : vector<1x1x2xf32>
    %c0_107 = arith.constant 0 : index
    %c0_108 = arith.constant 0 : index
    %c0_109 = arith.constant 0 : index
    %99 = vector.load %arg12[%c0_107, %c0_108, %c0_109] : memref<1x1x2xf32, #tpu.memory_space<vmem>>, vector<1x1x2xf32>
    tpu.vector_store %arg12[%c0_107, %c0_108, %c0_109], %98 {strides = array<i32>} : memref<1x1x2xf32, #tpu.memory_space<vmem>>, vector<1x1x2xf32>,
    return
  }
  func.func @transform_0(%arg0: i32) -> (i32, i32, i32) {
    %c0_i32 = arith.constant 0 : i32
    %c0_i32_0 = arith.constant 0 : i32
    %c0_i32_1 = arith.constant 0 : i32
    return %arg0, %c0_i32, %c0_i32_0 : i32, i32, i32
  }
  func.func @transform_1(%arg0: i32) -> (i32, i32) {
    %c0_i32 = arith.constant 0 : i32
    %c0_i32_0 = arith.constant 0 : i32
    %c0_i32_1 = arith.constant 0 : i32
    return %c0_i32, %c0_i32_0 : i32, i32
  }
  func.func @transform_2(%arg0: i32) -> (i32, i32) {
    %c0_i32 = arith.constant 0 : i32
    %c0_i32_0 = arith.constant 0 : i32
    %c0_i32_1 = arith.constant 0 : i32
    return %c0_i32, %c0_i32_0 : i32, i32
  }
  func.func @transform_3(%arg0: i32) -> (i32, i32) {
    %c0_i32 = arith.constant 0 : i32
    %c0_i32_0 = arith.constant 0 : i32
    %c0_i32_1 = arith.constant 0 : i32
    return %c0_i32, %c0_i32_0 : i32, i32
  }
  func.func @transform_4(%arg0: i32) -> (i32, i32) {
    %c0_i32 = arith.constant 0 : i32
    %c0_i32_0 = arith.constant 0 : i32
    %c0_i32_1 = arith.constant 0 : i32
    return %c0_i32, %c0_i32_0 : i32, i32
  }
  func.func @transform_5(%arg0: i32) -> (i32, i32) {
    %c0_i32 = arith.constant 0 : i32
    %c0_i32_0 = arith.constant 0 : i32
    %c0_i32_1 = arith.constant 0 : i32
    return %c0_i32, %c0_i32_0 : i32, i32
  }
  func.func @transform_6(%arg0: i32) -> (i32, i32) {
    %c0_i32 = arith.constant 0 : i32
    %c0_i32_0 = arith.constant 0 : i32
    %c0_i32_1 = arith.constant 0 : i32
    return %c0_i32, %c0_i32_0 : i32, i32
  }
  func.func @transform_7(%arg0: i32) -> (i32, i32) {
    %c0_i32 = arith.constant 0 : i32
    %c0_i32_0 = arith.constant 0 : i32
    %c0_i32_1 = arith.constant 0 : i32
    return %c0_i32, %c0_i32_0 : i32, i32
  }
  func.func @transform_8(%arg0: i32) -> (i32, i32) {
    %c0_i32 = arith.constant 0 : i32
    %c0_i32_0 = arith.constant 0 : i32
    %c0_i32_1 = arith.constant 0 : i32
    return %c0_i32, %c0_i32_0 : i32, i32
  }
  func.func @transform_9(%arg0: i32) -> (i32, i32, i32) {
    %c0_i32 = arith.constant 0 : i32
    %c0_i32_0 = arith.constant 0 : i32
    %c0_i32_1 = arith.constant 0 : i32
    %c0_i32_2 = arith.constant 0 : i32
    return %c0_i32, %c0_i32_0, %c0_i32_1 : i32, i32, i32
  }
  func.func @transform_10(%arg0: i32) -> (i32, i32, i32) {
    %c0_i32 = arith.constant 0 : i32
    %c0_i32_0 = arith.constant 0 : i32
    %c0_i32_1 = arith.constant 0 : i32
    %c0_i32_2 = arith.constant 0 : i32
    return %c0_i32, %c0_i32_0, %c0_i32_1 : i32, i32, i32
  }
  func.func @transform_11(%arg0: i32) -> (i32, i32, i32) {
    %c0_i32 = arith.constant 0 : i32
    %c0_i32_0 = arith.constant 0 : i32
    %c0_i32_1 = arith.constant 0 : i32
    return %arg0, %c0_i32, %c0_i32_0 : i32, i32, i32
  }
}

</mosaic_0001>

<bundles_post_ra>
// kernel: ddpg_forward.1
= control target key start
LH: loop header
LB: loop body
LE: loop exit
PB: predicated region body
PF: predicated region fallthrough
CT: control target
= control target key end

     0   :  { %s9210_s0 = inlined_call_operand.vmem [shape: bf16[2,8,1102], index: 0, kind: input, shape index: {}]   ;;  %s9211_s1 = inlined_call_operand.vmem [shape: bf16[64,72], index: 1, kind: input, shape index: {}]   ;;  %s9212_s2 = inlined_call_operand.vmem [shape: f32[64,1], index: 2, kind: input, shape index: {}]   ;;  %s9213_s3 = inlined_call_operand.vmem [shape: bf16[1024,154], index: 3, kind: input, shape index: {}]   ;;  %s9214_s4 = inlined_call_operand.vmem [shape: bf16[64,576], index: 4, kind: input, shape index: {}]   ;;  %s9215_s5 = inlined_call_operand.vmem [shape: f32[64,1], index: 5, kind: input, shape index: {}]   ;;  %s9216_s6 = inlined_call_operand.vmem [shape: bf16[124,30], index: 6, kind: input, shape index: {}]   ;;  %s9217_s7 = inlined_call_operand.vmem [shape: bf16[64,576], index: 7, kind: input, shape index: {}]   ;;  %s9218_s8 = inlined_call_operand.vmem [shape: f32[64,1], index: 8, kind: input, shape index: {}]   ;;  %s9219_s9 = inlined_call_operand.vmem [shape: f32[2,64,16], index: 9, kind: input, shape index: {}]   ;;  %s9220_s10 = inlined_call_operand.vmem [shape: f32[1,1,2], index: 10, kind: input, shape index: {}]   ;;  %s9221_s11 = inlined_call_operand.hbm [shape: f32[2,1,2], index: 11, kind: output, shape index: {}]  }
   0x1   :  { %9228 = sst [smem:[#allocation20_spill]] %s9210_s0 }
   0x2   :  { %9229 = sst [smem:[#allocation21_spill]] %s9211_s1 }
   0x3   :  { %9230 = sst [smem:[#allocation22_spill]] %s9212_s2 }
   0x4   :  { %16 = vsyncpa [#allocation8], 0 }
   0x5   :  { %18 = vsyncpa [#allocation8 + $0x1], 0  ;;  %s6783_s17 = smov 0   ;;  %s6785_s18 = smov 0  }
   0x6   :  { %s6787_s19 = smov 0   ;;  %s6789_s20 = smov 0  }
   0x7 LB: > { %s6804_s21 = sadd.s32 4294967295, %s6701_s20   ;;  %s5086_s22 = sadd.s32 4294967294, %s6701_s20   ;;  %s6701_s20 = sphi %s6789_s20, %s9264_s20   ;;  %s6697_s19 = sphi %s6787_s19, %s9263_s19   ;;  %s6693_s18 = sphi %s6785_s18, %s9262_s18   ;;  %s6689_s17 = sphi %s6783_s17, %s9261_s17  }
   0x8   : > { %s6808_s23 = sadd.s32 1, %s6701_s20   ;;  %s267_s24 = sadd.s32 1, %s6697_s19 }
   0x9   : > { %s264_s25 = ssub.s32 %s6701_s20, %s6808_s23  ;;  %p277_p0 = scmp.ne.s32.totalorder %s6697_s19, %s6693_s18 }
   0xa   : > { %p265_p1 = scmp.eq.s32.totalorder %s264_s25, 0  ;;  %p278_p2 = scmp.eq.s32.totalorder %s6804_s21, 1 }
   0xb   : > { %p283_p3 = scmp.ne.s32.totalorder %s6693_s18, %s6689_s17  ;;  %p284_p4 = scmp.eq.s32.totalorder %s5086_s22, 1 }
   0xc   : > { %s6819_s26 = scalar_select %p265_p1, %s6697_s19, %s267_s24  }
   0xd   : > { %p6821_p5 = por %p278_p2, %p277_p0  ;;  %p6825_p6 = por %p284_p4, %p283_p3 }
   0xe   : > { %p5089_p7 = scmp.ge.s32.totalorder %s6701_s20, 1  ;;  %p340_p8 = scmp.lt.s32.totalorder %s6701_s20, 3 }
  0x10   : > { %p341_p9 = pnand %p5089_p7, %p340_p8 }
  0x12   : > { %344 = sbr.rel (%p341_p9) target bundleno = 2142 (0x85e), region = 64 }
  0x17   : > { %p379_p10 = scmp.lt.s32.totalorder %s6804_s21, 1  ;;  %s9233_s0 = sld [smem:[#allocation20_spill]]  ;;  %vm414_vm0 = vcmask 1043456   ;;  %vm608_vm1 = vcmask 416768   ;;  %vm576_vm2 = vcmask 424960   ;;  %vm640_vm3 = vcmask 408576  }
  0x18   : > { %s6703_s15 = smov 51   ;;  %s6704_s16 = smov 52   ;;  %vm512_vm4 = vcmask 728064   ;;  %vm448_vm5 = vcmask 1031168   ;;  %vm544_vm6 = vcmask 719872   ;;  %vm480_vm7 = vcmask 736256  }
  0x19   : > { %s380_s29 = scalar_select %p379_p10, %s6804_s21, 1  ;;  %vm416_vm8 = vcmask 1039360   ;;  %vm948_vm9 = vcmask 588800   ;;  %vm2554_vm10 = vcmask 211972   ;;  %vm2572_vm12 = vcmask 1010688  }
  0x1a   : > { %s6705_s22 = smov 50   ;;  %s6706_s24 = smov 88   ;;  %vm8296_vm11 = vmor %vm2554_vm10, %vm414_vm0  ;;  %vm2847_vm13 = vcmask 916480   ;;  %vm2717_vm14 = vcmask 932864   ;;  %vm2977_vm15 = vcmask 809984   ;;  %vm4955_vm10 = vcmask 195712  }
  0x1b   : > { %s6574_s30 = smul.u32 36, %s380_s29  ;;  %s6707_s25 = smov 89  }
  0x1c   : > { %s9222_s29 = smov 126   ;;  %s6710_s12 = smov 90  }
  0x1d   : > { %s6836_s14 = scalar_lea.vmem %s9233_s0, %s6574_s30  ;;  %s9224_s30 = smov 127  }
  0x1e   : > { %v385_v0 = vld [vmem:[%s6836_s14] sm:$0xff]  ;;  %v386_v1 = vld [vmem:[%s6836_s14 + $0x8] sm:$0xff]  ;;  %v387_v2 = vld [vmem:[%s6836_s14 + $0x10] sm:$0xff]  ;;  %s9234_s2 = sld [smem:[#allocation22_spill]]  ;;  %s6718_s13 = smov 122  }
  0x1f   : > { %592 = vrot.lane.b32.xlu2 %v385_v0, %s6703_s15  ;;  %390 = vst [vmem:[#allocation2] sm:$0xff] %v385_v0  ;;  %560 = vrot.lane.b32.xlu1 %v385_v0, %s6704_s16  ;;  %v388_v3 = vld [vmem:[%s6836_s14 + $0x18] sm:$0xff]  ;;  %v389_v4 = vld [vmem:[%s6836_s14 + $0x20] sm:$0xf]  ;;  %s9235_s1 = sld [smem:[#allocation21_spill]]  ;;  %s6719_s14 = smov 120  }
  0x20   : > { %624 = vrot.lane.b32.xlu0 %v385_v0, %s6705_s22  ;;  %391 = vst [vmem:[#allocation2 + $0x8] sm:$0xff] %v386_v1 }
  0x21   : > { %392 = vst [vmem:[#allocation2 + $0x10] sm:$0xff] %v387_v2 }
  0x22   : > { %393 = vst [vmem:[#allocation2 + $0x18] sm:$0xff] %v388_v3 }
  0x27   : > { %594 = vrot.lane.b32.xlu2 %v386_v1, %s6703_s15  ;;  %562 = vrot.lane.b32.xlu1 %v386_v1, %s6704_s16 }
  0x28   : > { %626 = vrot.lane.b32.xlu0 %v386_v1, %s6705_s22 }
  0x2f   : > { %528 = vrot.lane.b32.xlu2 %v385_v0, %s6706_s24  ;;  %498 = vrot.lane.b32.xlu1 %v386_v1, %s6707_s25 }
  0x30   : > { %496 = vrot.lane.b32.xlu0 %v385_v0, %s6707_s25 }
  0x37   : > { %434 = vrot.lane.b32.xlu2 %v386_v1, %s9222_s29  ;;  %432 = vrot.lane.b32.xlu1 %v385_v0, %s9222_s29 }
  0x38   : > { %530 = vrot.lane.b32.xlu0 %v386_v1, %s6706_s24 }
  0x3f   : > { %399 = vrot.lane.b32.xlu2 %v385_v0, %s9224_s30  ;;  %466 = vrot.lane.b32.xlu1 %v386_v1, %s6710_s12 }
  0x40   : > { %464 = vrot.lane.b32.xlu0 %v385_v0, %s6710_s12 }
  0x47   : > { %564 = vrot.lane.b32.xlu2 %v387_v2, %s6704_s16  ;;  %628 = vrot.lane.b32.xlu1 %v387_v2, %s6705_s22 }
  0x48   : > { %401 = vrot.lane.b32.xlu0 %v386_v1, %s9224_s30 }
  0x4f   : > { %532 = vrot.lane.b32.xlu2 %v387_v2, %s6706_s24  ;;  %500 = vrot.lane.b32.xlu1 %v387_v2, %s6707_s25 }
  0x50   : > { %596 = vrot.lane.b32.xlu0 %v387_v2, %s6703_s15 }
  0x57   : > { %403 = vrot.lane.b32.xlu2 %v387_v2, %s9224_s30  ;;  %468 = vrot.lane.b32.xlu1 %v387_v2, %s6710_s12 }
  0x58   : > { %436 = vrot.lane.b32.xlu0 %v387_v2, %s9222_s29 }
  0x5f   : > { %566 = vrot.lane.b32.xlu2 %v388_v3, %s6704_s16  ;;  %632 = vrot.lane.b32.xlu1 %v389_v4, %s6705_s22 }
  0x60   : > { %630 = vrot.lane.b32.xlu0 %v388_v3, %s6705_s22  ;;  %s6713_s22 = smov 112  }
  0x67   : > { %600 = vrot.lane.b32.xlu2 %v389_v4, %s6703_s15  ;;  %598 = vrot.lane.b32.xlu1 %v388_v3, %s6703_s15  ;;  %s9226_s15 = smov 114  }
  0x68   : > { %568 = vrot.lane.b32.xlu0 %v389_v4, %s6704_s16  ;;  %s9248_s16 = smov 127  }
  0x6f   : > { %534 = vrot.lane.b32.xlu2 %v388_v3, %s6706_s24  ;;  %504 = vrot.lane.b32.xlu1 %v389_v4, %s6707_s25 }
  0x70   : > { %502 = vrot.lane.b32.xlu0 %v388_v3, %s6707_s25  ;;  %s6716_s25 = smov 100  }
  0x77   : > { %440 = vrot.lane.b32.xlu2 %v389_v4, %s9222_s29  ;;  %438 = vrot.lane.b32.xlu1 %v388_v3, %s9222_s29  ;;  %s9259_s29 = smov 126  }
  0x78   : > { %536 = vrot.lane.b32.xlu0 %v389_v4, %s6706_s24  ;;  %s6714_s24 = smov 99  }
  0x79   : > { %v593_v5 = vpop.permute.xlu2 %592 }
  0x7a   : > { %v602_v6 = vrot.slane %v593_v5, 4 }
  0x7f   : > { %405 = vrot.lane.b32.xlu2 %v388_v3, %s9224_s30  ;;  %472 = vrot.lane.b32.xlu1 %v389_v4, %s6710_s12 }
  0x80   : > { %470 = vrot.lane.b32.xlu0 %v388_v3, %s6710_s12  ;;  %s6717_s12 = smov 98  }
  0x81   : > { %v6877_v7 = vpop.permute.xlu2 %594 }
  0x82   : > { %v603_v8 = vrot.slane %v6877_v7, 4 }
  0x84   : > { %v607_v9 = vsel %vm414_vm0, %v602_v6, %v603_v8 }
  0x85   : > { %v609_v10 = vsel %vm608_vm1, %v593_v5, %v607_v9 }
  0x86   : > { %620 = vst [vmem:[#allocation2 + $0xe0] sm:$0xff] %v609_v10 }
  0x88   : > { %407 = vrot.lane.b32.xlu0 %v389_v4, %s9224_s30  ;;  %s6715_s30 = smov 113  }
  0x89   : > { %v6885_v11 = vpop.permute.xlu2 %528 }
  0x8a   : > { %v538_v49 = vrot.slane %v6885_v11, 4 }
  0x8d   : > { %v6305_v39 = vld [vmem:[#allocation2 + $0xdc] sm:$0xf0]  ;;  %v5207_v44 = vld [vmem:[#allocation2 + $0xe0] sm:$0xf0] }
  0x91   : > { %v6887_v12 = vpop.permute.xlu2 %434  ;;  %v561_v13 = vpop.permute.xlu1 %560 }
  0x92   : > { %v625_v14 = vpop.permute.xlu0 %624  ;;  %v570_v17 = vrot.slane %v561_v13, 4  ;;  %v443_v48 = vrot.slane %v6887_v12, 4 }
  0x93   : > { %v634_v20 = vrot.slane %v625_v14, 4 }
  0x99   : > { %v6889_v15 = vpop.permute.xlu2 %399  ;;  %v563_v16 = vpop.permute.xlu1 %562 }
  0x9a   : > { %v571_v18 = vrot.slane %v563_v16, 4  ;;  %v6891_v19 = vpop.permute.xlu0 %626 }
  0x9b   : > { %v635_v21 = vrot.slane %v6891_v19, 4 }
  0x9c   : > { %v575_v22 = vsel %vm414_vm0, %v570_v17, %v571_v18  ;;  %v409_v17 = vrot.slane %v6889_v15, 4 }
  0x9d   : > { %v577_v23 = vsel %vm576_vm2, %v561_v13, %v575_v22  ;;  %v639_v24 = vsel %vm414_vm0, %v634_v20, %v635_v21  ;;  %v700_v13 = vld [vmem:[%s9234_s2] sm:$0xff] }
  0x9e   : > { %588 = vst [vmem:[#allocation2 + $0xc0] sm:$0xff] %v577_v23  ;;  %v641_v25 = vsel %vm640_vm3, %v625_v14, %v639_v24 }
  0x9f   : > { %v868_v26 = vunpack.c.l.b16 %v641_v25  ;;  %v869_v27 = vunpack.c.h.b16 %v641_v25 }
  0xa1   : > { %v6900_v28 = vpop.permute.xlu2 %564  ;;  %v6902_v29 = vpop.permute.xlu1 %498  ;;  %v908_v30 = vpack.c.b16 %v868_v26, %v868_v26  ;;  %v909_v31 = vpack.c.b16 %v869_v27, %v869_v27 }
  0xa2   : > { %v572_v32 = vrot.slane %v6900_v28, 4  ;;  %v507_v33 = vrot.slane %v6902_v29, 4  ;;  %v497_v34 = vpop.permute.xlu0 %496 }
  0xa3   : > { %v506_v35 = vrot.slane %v497_v34, 4  ;;  %v963_v36 = vsel %vm414_vm0, %v908_v30, 0  ;;  %v966_v37 = vsel %vm414_vm0, %v909_v31, 0 }
  0xa4   : > { %v578_v38 = vsel %vm414_vm0, %v571_v18, %v572_v32  ;;  %989 = vmatpush.bf16.msra.mxu0 %v963_v36  ;;  %6557 = vmatpush.bf16.msra.mxu3 %v963_v36 }
  0xa5   : > { %v579_v40 = vsel %vm576_vm2, %v563_v16, %v578_v38  ;;  %v511_v41 = vsel %vm414_vm0, %v506_v35, %v507_v33  ;;  %1018 = vmatpush.bf16.msra.mxu1 %v966_v37  ;;  %v5205_v42 = vld [vmem:[#allocation2 + $0xc0] sm:$0xf]  ;;  %v6301_v43 = vld [vmem:[#allocation2 + $0xc4] sm:$0xf] }
  0xa6   : > { %589 = vst [vmem:[#allocation2 + $0xc8] sm:$0xff] %v579_v40  ;;  %v513_v45 = vsel %vm512_vm4, %v497_v34, %v511_v41  ;;  %v5206_v46 = vor.u32 %v6305_v39, %v5205_v42  ;;  %v5210_v47 = vor.u32 %v6301_v43, %v5207_v44 }
  0xa7   : > { %524 = vst [vmem:[#allocation2 + $0x80] sm:$0xff] %v513_v45 }
  0xa8   : > { %990 = vmatpush.bf16.msra.mxu0 %v5206_v46  ;;  %6558 = vmatpush.bf16.msra.mxu3 %v5206_v46 }
  0xa9   : > { %v6918_v50 = vpop.permute.xlu2 %532  ;;  %v433_v51 = vpop.permute.xlu1 %432  ;;  %1019 = vmatpush.bf16.msra.mxu1 %v5210_v47 }
  0xaa   : > { %v540_v52 = vrot.slane %v6918_v50, 4  ;;  %v442_v53 = vrot.slane %v433_v51, 4  ;;  %v531_v54 = vpop.permute.xlu0 %530 }
  0xab   : > { %v539_v55 = vrot.slane %v531_v54, 4 }
  0xac   : > { %v447_v56 = vsel %vm414_vm0, %v442_v53, %v443_v48 }
  0xad   : > { %v449_v57 = vsel %vm448_vm5, %v433_v51, %v447_v56  ;;  %v543_v58 = vsel %vm414_vm0, %v538_v49, %v539_v55  ;;  %v546_v59 = vsel %vm414_vm0, %v539_v55, %v540_v52  ;;  %v5109_v56 = vld [vmem:[#allocation2] sm:$0xf] }
  0xae   : > { %460 = vst [vmem:[#allocation2 + $0x40] sm:$0xff] %v449_v57  ;;  %v545_v60 = vsel %vm544_vm6, %v6885_v11, %v543_v58  ;;  %v547_v61 = vsel %vm544_vm6, %v531_v54, %v546_v59  ;;  %v5173_v4 = vld [vmem:[#allocation2 + $0x80] sm:$0xf]  ;;  %v6293_v5 = vld [vmem:[#allocation2 + $0x84] sm:$0xf]  ;;  %v6711_v11 = vmov 0  }
  0xaf   : > { %556 = vst [vmem:[#allocation2 + $0xa0] sm:$0xff] %v545_v60  ;;  %6634 = vset.pattern.permute.xlu1 %v6711_v11  ;;  %6636 = vset.pattern.permute.xlu0 %v6711_v11  ;;  %v6277_v57 = vld [vmem:[#allocation2 + $0x4] sm:$0xf] }
  0xb0   : > { %557 = vst [vmem:[#allocation2 + $0xa8] sm:$0xff] %v547_v61  ;;  %710 = vperm.xlu1 %6634, %v700_v13   ;;  %6635 = vset.pattern.permute.xlu2 %v6711_v11 }
  0xb1   : > { %v6932_v62 = vpop.permute.xlu2 %403  ;;  %v6934_v63 = vpop.permute.xlu1 %466 }
  0xb2   : > { %v475_v0 = vrot.slane %v6934_v63, 4  ;;  %v465_v1 = vpop.permute.xlu0 %464  ;;  %v411_v18 = vrot.slane %v6932_v62, 4 }
  0xb3   : > { %v474_v2 = vrot.slane %v465_v1, 4 }
  0xb5   : > { %v479_v3 = vsel %vm414_vm0, %v474_v2, %v475_v0  ;;  %v5141_v37 = vld [vmem:[#allocation2 + $0x40] sm:$0xf] }
  0xb6   : > { %v481_v6 = vsel %vm480_vm7, %v465_v1, %v479_v3  ;;  %v6297_v9 = vld [vmem:[#allocation2 + $0x9c] sm:$0xf0]  ;;  %v5175_v10 = vld [vmem:[#allocation2 + $0xa0] sm:$0xf0] }
  0xb7   : > { %492 = vst [vmem:[#allocation2 + $0x60] sm:$0xff] %v481_v6  ;;  %v5174_v14 = vor.u32 %v6297_v9, %v5173_v4  ;;  %v5178_v16 = vor.u32 %v6293_v5, %v5175_v10  ;;  %v7009_v3 = vld [vmem:[%s9235_s1] sm:$0xff] }
  0xb9   : > { %991 = vmatpush.bf16.msra.mxu0 %v5174_v14  ;;  %6559 = vmatpush.bf16.msra.mxu3 %v5174_v14  ;;  %v6946_v20 = vpop.permute.xlu2 %566  ;;  %v6948_v22 = vpop.permute.xlu1 %628 }
  0xba   : > { %1020 = vmatpush.bf16.msra.mxu1 %v5178_v16  ;;  %v573_v23 = vrot.slane %v6946_v20, 4  ;;  %v636_v24 = vrot.slane %v6948_v22, 4  ;;  %v402_v25 = vpop.permute.xlu0 %401 }
  0xbb   : > { %v410_v26 = vrot.slane %v402_v25, 4 }
  0xbc   : > { %v580_v27 = vsel %vm414_vm0, %v572_v32, %v573_v23  ;;  %v642_v30 = vsel %vm414_vm0, %v635_v21, %v636_v24  ;;  %v6285_v32 = vld [vmem:[#allocation2 + $0x44] sm:$0xf] }
  0xbd   : > { %v581_v31 = vsel %vm576_vm2, %v6900_v28, %v580_v27  ;;  %v643_v34 = vsel %vm640_vm3, %v6891_v19, %v642_v30  ;;  %v415_v35 = vsel %vm414_vm0, %v409_v17, %v410_v26  ;;  %v418_v36 = vsel %vm414_vm0, %v410_v26, %v411_v18  ;;  %v703_v19 = vld [vmem:[%s9234_s2 + $0x18] sm:$0xff]  ;;  %v702_v30 = vld [vmem:[%s9234_s2 + $0x10] sm:$0xff] }
  0xbe   : > { %590 = vst [vmem:[#allocation2 + $0xd0] sm:$0xff] %v581_v31  ;;  %v417_v38 = vsel %vm416_vm8, %v6889_v15, %v415_v35  ;;  %v419_v21 = vsel %vm416_vm8, %v402_v25, %v418_v36  ;;  %v6289_v39 = vld [vmem:[#allocation2 + $0x5c] sm:$0xf0]  ;;  %v5143_v40 = vld [vmem:[#allocation2 + $0x60] sm:$0xf0]  ;;  %v870_v28 = vunpack.c.l.b16 %v643_v34  ;;  %725 = vperm.xlu1 %6634, %v703_v19   ;;  %v871_v49 = vunpack.c.h.b16 %v643_v34  ;;  %720 = vperm.xlu0 %6636, %v702_v30  }
  0xbf   : > { %v5142_v41 = vor.u32 %v6289_v39, %v5141_v37  ;;  %v5146_v42 = vor.u32 %v6285_v32, %v5143_v40  ;;  %428 = vst [vmem:[#allocation2 + $0x20] sm:$0xff] %v417_v38  ;;  %v6298_v32 = vld [vmem:[#allocation2 + $0xa4] sm:$0xf0]  ;;  %v5183_v38 = vld [vmem:[#allocation2 + $0xa8] sm:$0xf0] }
  0xc0   : > { %v910_v43 = vpack.c.b16 %v870_v28, %v870_v28  ;;  %429 = vst [vmem:[#allocation2 + $0x28] sm:$0xff] %v419_v21  ;;  %v911_v59 = vpack.c.b16 %v871_v49, %v871_v49 }
  0xc1   : > { %992 = vmatpush.bf16.msra.mxu0 %v5142_v41  ;;  %6560 = vmatpush.bf16.msra.mxu3 %v5142_v41  ;;  %v6976_v44 = vpop.permute.xlu2 %600  ;;  %v6978_v15 = vpop.permute.xlu1 %500  ;;  %v5117_v41 = vld [vmem:[#allocation2 + $0x8] sm:$0xf] }
  0xc2   : > { %1021 = vmatpush.bf16.msra.mxu1 %v5146_v42  ;;  %v508_v45 = vrot.slane %v6978_v15, 4  ;;  %v6981_v46 = vpop.permute.xlu0 %596  ;;  %v969_v47 = vsel %vm414_vm0, %v910_v43, 0  ;;  %v972_v9 = vsel %vm414_vm0, %v911_v59, 0  ;;  %v6278_v43 = vld [vmem:[#allocation2 + $0xc] sm:$0xf] }
  0xc3   : > { %v604_v51 = vrot.slane %v6981_v46, 4  ;;  %1047 = vmatpush.bf16.msra.mxu2 %v969_v47 }
  0xc4   : > { %v514_v53 = vsel %vm414_vm0, %v507_v33, %v508_v45  ;;  %v705_v33 = vld [vmem:[%s9234_s2 + $0x28] sm:$0xff] }
  0xc5   : > { %v515_v54 = vsel %vm512_vm4, %v6902_v29, %v514_v53  ;;  %v610_v55 = vsel %vm414_vm0, %v603_v8, %v604_v51 }
  0xc6   : > { %525 = vst [vmem:[#allocation2 + $0x88] sm:$0xff] %v515_v54  ;;  %v611_v58 = vsel %vm608_vm1, %v6877_v7, %v610_v55  ;;  %v6281_v60 = vld [vmem:[#allocation2 + $0x1c] sm:$0xf0]  ;;  %v5111_v29 = vld [vmem:[#allocation2 + $0x20] sm:$0xf0]  ;;  %735 = vperm.xlu1 %6634, %v705_v33   ;;  %v7014_v7 = vld [vmem:[%s9235_s1 + $0x10] sm:$0xff] }
  0xc7   : > { %621 = vst [vmem:[#allocation2 + $0xe8] sm:$0xff] %v611_v58  ;;  %v5110_v61 = vor.u32 %v6281_v60, %v5109_v56  ;;  %v5114_v1 = vor.u32 %v6277_v57, %v5111_v29  ;;  %v6282_v42 = vld [vmem:[#allocation2 + $0x24] sm:$0xf0]  ;;  %v5119_v47 = vld [vmem:[#allocation2 + $0x28] sm:$0xf0]  ;;  %v704_v56 = vld [vmem:[%s9234_s2 + $0x20] sm:$0xff] }
  0xc8   : > { %v707_v33 = vld [vmem:[%s9234_s2 + $0x38] sm:$0xff] }
  0xc9   : > { %v7002_v2 = vpop.permute.xlu2 %534  ;;  %v7004_v8 = vpop.permute.xlu1 %468  ;;  %993 = vmatpush.bf16.msra.mxu0 %v5110_v61  ;;  %6561 = vmatpush.bf16.msra.mxu3 %v5110_v61 }
  0xca   : > { %v541_v4 = vrot.slane %v7002_v2, 4  ;;  %v476_v5 = vrot.slane %v7004_v8, 4  ;;  %v7018_v6 = vpop.permute.xlu0 %436  ;;  %1022 = vmatpush.bf16.msra.mxu1 %v5114_v1  ;;  %745 = vperm.xlu0 %6636, %v707_v33  }
  0xcb   : > { %v444_v10 = vrot.slane %v7018_v6, 4 }
  0xcc   : > { %v548_v11 = vsel %vm414_vm0, %v540_v52, %v541_v4  ;;  %v482_v13 = vsel %vm414_vm0, %v475_v0, %v476_v5  ;;  %5235 = vmatmul.msk.bf16.vlgmr.msra.gmra.mxu0 %vm948_vm9, %v7009_v3  ;;  %5237 = vmatmul.msk.bf16.vlgmr.msra.gmra.mxu3 %vm948_vm9, %v7014_v7  ;;  %v5213_v52 = vld [vmem:[#allocation2 + $0xc8] sm:$0xf]  ;;  %v6302_v0 = vld [vmem:[#allocation2 + $0xcc] sm:$0xf] }
  0xcd   : > { %1076 = vmatpush.bf16.msrb.mxu3 %v972_v9  ;;  %v549_v14 = vsel %vm544_vm6, %v6918_v50, %v548_v11  ;;  %v483_v16 = vsel %vm480_vm7, %v6934_v63, %v482_v13  ;;  %v450_v17 = vsel %vm414_vm0, %v443_v48, %v444_v10  ;;  %5239 = vmatmul.msk.bf16.vlgmr.msra.gmra.mxu1 %vm948_vm9, %v7009_v3  ;;  %v701_v48 = vld [vmem:[%s9234_s2 + $0x8] sm:$0xff] }
  0xce   : > { %558 = vst [vmem:[#allocation2 + $0xb0] sm:$0xff] %v549_v14  ;;  %v451_v50 = vsel %vm448_vm5, %v6887_v12, %v450_v17  ;;  %v6306_v63 = vld [vmem:[#allocation2 + $0xe4] sm:$0xf0]  ;;  %v5215_v25 = vld [vmem:[#allocation2 + $0xe8] sm:$0xf0]  ;;  %715 = vperm.xlu2 %6635, %v701_v48   ;;  %v5122_v48 = vor.u32 %v6278_v43, %v5119_v47 }
  0xcf   : > { %493 = vst [vmem:[#allocation2 + $0x68] sm:$0xff] %v483_v16  ;;  %v5214_v26 = vor.u32 %v6306_v63, %v5213_v52  ;;  %v5218_v27 = vor.u32 %v6302_v0, %v5215_v25  ;;  %v5181_v31 = vld [vmem:[#allocation2 + $0x88] sm:$0xf]  ;;  %v6294_v12 = vld [vmem:[#allocation2 + $0x8c] sm:$0xf]  ;;  %v7082_v63 = vld [vmem:[%s9235_s1 + $0x18] sm:$0xff]  ;;  %v5118_v25 = vor.u32 %v6282_v42, %v5117_v41 }
  0xd0   : > { %461 = vst [vmem:[#allocation2 + $0x48] sm:$0xff] %v451_v50  ;;  %v5182_v39 = vor.u32 %v6298_v32, %v5181_v31  ;;  %v5186_v40 = vor.u32 %v6294_v12, %v5183_v38  ;;  %v7076_v13 = vld [vmem:[%s9235_s1 + $0x8] sm:$0xff]  ;;  %v6303_v47 = vld [vmem:[#allocation2 + $0xd4] sm:$0xf] }
  0xd1   : > { %1048 = vmatpush.bf16.msra.mxu2 %v5214_v26  ;;  %1077 = vmatpush.bf16.msrb.mxu3 %v5218_v27  ;;  %v7055_v34 = vpop.permute.xlu2 %440  ;;  %v633_v35 = vpop.permute.xlu1 %632 }
  0xd2   : > { %v638_v36 = vrot.slane %v633_v35, 4  ;;  %v631_v37 = vpop.permute.xlu0 %630 }
  0xd3   : > { %v637_v21 = vrot.slane %v631_v37, 4 }
  0xd5   : > { %v644_v28 = vsel %vm414_vm0, %v636_v24, %v637_v21  ;;  %v646_v19 = vsel %vm414_vm0, %v637_v21, %v638_v36  ;;  %1049 = vmatpush.bf16.msra.mxu2 %v5182_v39  ;;  %1078 = vmatpush.bf16.msrb.mxu3 %v5186_v40 }
  0xd6   : > { %v645_v49 = vsel %vm640_vm3, %v6948_v22, %v644_v28  ;;  %v647_v53 = vsel %vm640_vm3, %v631_v37, %v646_v19  ;;  %v6290_v54 = vld [vmem:[#allocation2 + $0x64] sm:$0xf0]  ;;  %v5151_v55 = vld [vmem:[#allocation2 + $0x68] sm:$0xf0]  ;;  %730 = vperm.xlu2 %6635, %v704_v56   ;;  %v606_v22 = vrot.slane %v6976_v44, 4  ;;  %vm3527_vm3 = vcmask 523264  }
  0xd7   : > { %v5149_v24 = vld [vmem:[#allocation2 + $0x48] sm:$0xf]  ;;  %v6286_v57 = vld [vmem:[#allocation2 + $0x4c] sm:$0xf]  ;;  %v872_v58 = vunpack.c.l.b16 %v645_v49  ;;  %v873_v59 = vunpack.c.h.b16 %v645_v49  ;;  %v874_v60 = vunpack.c.l.b16 %v647_v53  ;;  %v875_v29 = vunpack.c.h.b16 %v647_v53  ;;  %v5221_v19 = vld [vmem:[#allocation2 + $0xd0] sm:$0xf] }
  0xd8   : > { %v5150_v61 = vor.u32 %v6290_v54, %v5149_v24  ;;  %v5154_v1 = vor.u32 %v6286_v57, %v5151_v55  ;;  %v446_v24 = vrot.slane %v7055_v34, 4 }
  0xd9   : > { %v7071_v9 = vpop.permute.xlu2 %405  ;;  %v599_v11 = vpop.permute.xlu1 %598  ;;  %v912_v14 = vpack.c.b16 %v872_v58, %v872_v58  ;;  %v913_v16 = vpack.c.b16 %v873_v59, %v873_v59  ;;  %v914_v17 = vpack.c.b16 %v874_v60, %v874_v60  ;;  %v915_v52 = vpack.c.b16 %v875_v29, %v875_v29 }
  0xda   : > { %1050 = vmatpush.bf16.msra.mxu2 %v5150_v61  ;;  %1079 = vmatpush.bf16.msrb.mxu3 %v5154_v1  ;;  %v412_v0 = vrot.slane %v7071_v9, 4  ;;  %v605_v44 = vrot.slane %v599_v11, 4  ;;  %v569_v50 = vpop.permute.xlu0 %568 }
  0xdb   : > { %v574_v26 = vrot.slane %v569_v50, 4  ;;  %v975_v27 = vsel %vm414_vm0, %v912_v14, 0  ;;  %v978_v30 = vsel %vm414_vm0, %v913_v16, 0  ;;  %v981_v31 = vsel %vm414_vm0, %v914_v17, 0  ;;  %v6299_v14 = vld [vmem:[#allocation2 + $0xac] sm:$0xf0] }
  0xdc   : > { %v420_v12 = vsel %vm414_vm0, %v411_v18, %v412_v0  ;;  %v612_v35 = vsel %vm414_vm0, %v604_v51, %v605_v44  ;;  %v614_v36 = vsel %vm414_vm0, %v605_v44, %v606_v22  ;;  %1105 = vmatpush.bf16.msrb.mxu0 %v975_v27  ;;  %1134 = vmatpush.bf16.msrb.mxu1 %v978_v30  ;;  %v984_v37 = vsel %vm414_vm0, %v915_v52, 0  ;;  %v5191_v16 = vld [vmem:[#allocation2 + $0xb0] sm:$0xf0] }
  0xdd   : > { %v421_v32 = vsel %vm416_vm8, %v6932_v62, %v420_v12  ;;  %v613_v38 = vsel %vm608_vm1, %v6981_v46, %v612_v35  ;;  %v615_v21 = vsel %vm608_vm1, %v599_v11, %v614_v36  ;;  %v582_v18 = vsel %vm414_vm0, %v573_v23, %v574_v26  ;;  %5236 = vmatmul.msk.bf16.gmra.mxu0 %vm948_vm9, %v7076_v13 }
  0xde   : > { %430 = vst [vmem:[#allocation2 + $0x30] sm:$0xff] %v421_v32  ;;  %v583_v51 = vsel %vm576_vm2, %v6946_v20, %v582_v18  ;;  %5238 = vmatmul.msk.bf16.gmra.mxu3 %vm948_vm9, %v7082_v63  ;;  %5240 = vmatmul.msk.bf16.gmra.mxu1 %vm948_vm9, %v7076_v13  ;;  %v706_v20 = vld [vmem:[%s9234_s2 + $0x30] sm:$0xff]  ;;  %vm2912_vm1 = vcmask 818176   ;;  %vm3042_vm2 = vcmask 801792   ;;  %s6722_s2 = smov 116  }
  0xdf   : > { %622 = vst [vmem:[#allocation2 + $0xf0] sm:$0xff] %v613_v38  ;;  %1051 = vmatpush.bf16.msra.mxu2 %v5118_v25  ;;  %1080 = vmatpush.bf16.msrb.mxu3 %v5122_v48 }
  0xe0   : > { %623 = vst [vmem:[#allocation2 + $0xf8] sm:$0xff] %v615_v21  ;;  %740 = vperm.xlu2 %6635, %v706_v20   ;;  %v5125_v20 = vld [vmem:[#allocation2 + $0x10] sm:$0xf] }
  0xe1   : > { %591 = vst [vmem:[#allocation2 + $0xd8] sm:$0xff] %v583_v51  ;;  %v505_v62 = vpop.permute.xlu1 %504 }
  0xe2   : > { %5243 = vmatmul.msk.bf16.vlgmr.msra.gmra.mxu2 %vm948_vm9, %v7009_v3  ;;  %v510_v23 = vrot.slane %v505_v62, 4  ;;  %v503_v46 = vpop.permute.xlu0 %502 }
  0xe3   : > { %1163 = vmatpush.bf16.msrb.mxu2 %v981_v31  ;;  %1192 = vmatpush.bf16.msra.mxu3 %v984_v37  ;;  %v509_v39 = vrot.slane %v503_v46, 4 }
  0xe5   : > { %v516_v40 = vsel %vm414_vm0, %v508_v45, %v509_v39  ;;  %v518_v28 = vsel %vm414_vm0, %v509_v39, %v510_v23 }
  0xe6   : > { %v517_v41 = vsel %vm512_vm4, %v6978_v15, %v516_v40  ;;  %v519_v42 = vsel %vm512_vm4, %v503_v46, %v518_v28  ;;  %v6307_v43 = vld [vmem:[#allocation2 + $0xec] sm:$0xf0]  ;;  %v5223_v49 = vld [vmem:[#allocation2 + $0xf0] sm:$0xf0]  ;;  %vm3773_vm4 = vcmask 1045504  }
  0xe7   : > { %526 = vst [vmem:[#allocation2 + $0x90] sm:$0xff] %v517_v41  ;;  %v5222_v53 = vor.u32 %v6307_v43, %v5221_v19  ;;  %v5226_v54 = vor.u32 %v6303_v47, %v5223_v49  ;;  %v6308_v55 = vld [vmem:[#allocation2 + $0xf4] sm:$0xf0]  ;;  %v5231_v56 = vld [vmem:[#allocation2 + $0xf8] sm:$0xf0] }
  0xe8   : > { %527 = vst [vmem:[#allocation2 + $0x98] sm:$0xff] %v519_v42  ;;  %v5229_v45 = vld [vmem:[#allocation2 + $0xd8] sm:$0xf]  ;;  %v6304_v57 = vld [vmem:[#allocation2 + $0xdc] sm:$0xf] }
  0xe9   : > { %1106 = vmatpush.bf16.msrb.mxu0 %v5222_v53  ;;  %1135 = vmatpush.bf16.msrb.mxu1 %v5226_v54  ;;  %v439_v58 = vpop.permute.xlu1 %438  ;;  %v5230_v59 = vor.u32 %v6308_v55, %v5229_v45  ;;  %v5234_v15 = vor.u32 %v6304_v57, %v5231_v56  ;;  %v6283_v41 = vld [vmem:[#allocation2 + $0x2c] sm:$0xf0]  ;;  %v6279_v42 = vld [vmem:[#allocation2 + $0x14] sm:$0xf]  ;;  %v6280_v55 = vld [vmem:[#allocation2 + $0x1c] sm:$0xf] }
  0xea   : > { %v445_v33 = vrot.slane %v439_v58, 4  ;;  %v537_v60 = vpop.permute.xlu0 %536  ;;  %v5127_v43 = vld [vmem:[#allocation2 + $0x30] sm:$0xf0]  ;;  %v5126_v53 = vor.u32 %v6283_v41, %v5125_v20  ;;  %v5453_v20 = vld [vmem:[%s9213_s3 + $0x170] sm:$0xf] }
  0xeb   : > { %v542_v29 = vrot.slane %v537_v60, 4  ;;  %1164 = vmatpush.bf16.msrb.mxu2 %v5230_v59  ;;  %1193 = vmatpush.bf16.msra.mxu3 %v5234_v15  ;;  %v5130_v54 = vor.u32 %v6279_v42, %v5127_v43  ;;  %v6324_v59 = vld [vmem:[%s9213_s3 + $0x74] sm:$0xf0]  ;;  %v5389_v15 = vld [vmem:[%s9213_s3 + $0xf0] sm:$0xf] }
  0xec   : > { %v452_v22 = vsel %vm414_vm0, %v444_v10, %v445_v33  ;;  %v454_v61 = vsel %vm414_vm0, %v445_v33, %v446_v24  ;;  %v6340_v60 = vld [vmem:[%s9213_s3 + $0xf4] sm:$0xf0]  ;;  %v6326_v42 = vld [vmem:[%s9213_s3 + $0x84] sm:$0xf0] }
  0xed   : > { %v453_v34 = vsel %vm448_vm5, %v7018_v6, %v452_v22  ;;  %v455_v1 = vsel %vm448_vm5, %v439_v58, %v454_v61  ;;  %v550_v11 = vsel %vm414_vm0, %v541_v4, %v542_v29  ;;  %v5325_v58 = vld [vmem:[%s9213_s3 + $0x70] sm:$0xf]  ;;  %v5390_v29 = vor.u32 %v6340_v60, %v5389_v15  ;;  %v5317_v22 = vld [vmem:[%s9213_s3 + $0x60] sm:$0xf]  ;;  %v6322_v61 = vld [vmem:[%s9213_s3 + $0x64] sm:$0xf0] }
  0xee   : > { %462 = vst [vmem:[#allocation2 + $0x50] sm:$0xff] %v453_v34  ;;  %v551_v17 = vsel %vm544_vm6, %v7002_v2, %v550_v11  ;;  %5241 = vmatmul.msk.bf16.gmra.mxu1 %vm948_vm9, %v7014_v7  ;;  %5247 = vmatmul.msk.bf16.vlgmr.msrb.gmra.mxu3 %vm948_vm9, %v7009_v3  ;;  %v5189_v10 = vld [vmem:[#allocation2 + $0x90] sm:$0xf]  ;;  %v6295_v6 = vld [vmem:[#allocation2 + $0x94] sm:$0xf]  ;;  %v5326_v33 = vor.u32 %v6324_v59, %v5325_v58  ;;  %vm3760_vm5 = vcmask 1014784  }
  0xef   : > { %463 = vst [vmem:[#allocation2 + $0x58] sm:$0xff] %v455_v1  ;;  %v5190_v52 = vor.u32 %v6299_v14, %v5189_v10  ;;  %v5194_v44 = vor.u32 %v6295_v6, %v5191_v16  ;;  %v5197_v27 = vld [vmem:[#allocation2 + $0x98] sm:$0xf]  ;;  %v6296_v30 = vld [vmem:[#allocation2 + $0x9c] sm:$0xf]  ;;  %v5318_v1 = vor.u32 %v6322_v61, %v5317_v22  ;;  %vm3814_vm6 = vcmask 240640  }
  0xf0   : > { %559 = vst [vmem:[#allocation2 + $0xb8] sm:$0xff] %v551_v17  ;;  %v5381_v34 = vld [vmem:[%s9213_s3 + $0xe0] sm:$0xf]  ;;  %v6338_v11 = vld [vmem:[%s9213_s3 + $0xe4] sm:$0xf0] }
  0xf1   : > { %1107 = vmatpush.bf16.msrb.mxu0 %v5190_v52  ;;  %1136 = vmatpush.bf16.msrb.mxu1 %v5194_v44  ;;  %v473_v4 = vpop.permute.xlu1 %472  ;;  %v5382_v14 = vor.u32 %v6338_v11, %v5381_v34  ;;  %v5309_v16 = vld [vmem:[%s9213_s3 + $0x50] sm:$0xf]  ;;  %v6320_v17 = vld [vmem:[%s9213_s3 + $0x54] sm:$0xf0]  ;;  %v5413_v61 = vld [vmem:[%s9213_s3 + $0x120] sm:$0xf] }
  0xf2   : > { %5244 = vmatmul.msk.bf16.gmra.mxu2 %vm948_vm9, %v7076_v13  ;;  %v471_v50 = vpop.permute.xlu0 %470  ;;  %v478_v2 = vrot.slane %v473_v4, 4  ;;  %v5373_v10 = vld [vmem:[%s9213_s3 + $0xd0] sm:$0xf]  ;;  %v5310_v6 = vor.u32 %v6320_v17, %v5309_v16  ;;  %v6336_v52 = vld [vmem:[%s9213_s3 + $0xd4] sm:$0xf0] }
  0xf3   : > { %v477_v25 = vrot.slane %v471_v50, 4  ;;  %v5374_v44 = vor.u32 %v6336_v52, %v5373_v10  ;;  %v5301_v4 = vld [vmem:[%s9213_s3 + $0x40] sm:$0xf]  ;;  %v6372_v58 = vld [vmem:[%s9213_s3 + $0x1f4] sm:$0xf0] }
  0xf4   : > { %v6348_v15 = vld [vmem:[%s9213_s3 + $0x134] sm:$0xf0]  ;;  %v6346_v34 = vld [vmem:[%s9213_s3 + $0x124] sm:$0xf0]  ;;  %v5405_v10 = vld [vmem:[%s9213_s3 + $0x110] sm:$0xf] }
  0xf5   : > { %v484_v48 = vsel %vm414_vm0, %v476_v5, %v477_v25  ;;  %v486_v26 = vsel %vm414_vm0, %v477_v25, %v478_v2  ;;  %v5157_v5 = vld [vmem:[#allocation2 + $0x50] sm:$0xf]  ;;  %v6287_v23 = vld [vmem:[#allocation2 + $0x54] sm:$0xf]  ;;  %v5365_v2 = vld [vmem:[%s9213_s3 + $0xc0] sm:$0xf]  ;;  %v5414_v11 = vor.u32 %v6346_v34, %v5413_v61 }
  0xf6   : > { %v485_v31 = vsel %vm480_vm7, %v7004_v8, %v484_v48  ;;  %v487_v12 = vsel %vm480_vm7, %v471_v50, %v486_v26  ;;  %v5165_v51 = vld [vmem:[#allocation2 + $0x58] sm:$0xf]  ;;  %v6288_v62 = vld [vmem:[#allocation2 + $0x5c] sm:$0xf]  ;;  %v6318_v50 = vld [vmem:[%s9213_s3 + $0x44] sm:$0xf0] }
  0xf7   : > { %494 = vst [vmem:[#allocation2 + $0x70] sm:$0xff] %v485_v31  ;;  %v6300_v35 = vld [vmem:[#allocation2 + $0xb4] sm:$0xf0]  ;;  %v5199_v36 = vld [vmem:[#allocation2 + $0xb8] sm:$0xf0]  ;;  %v5302_v25 = vor.u32 %v6318_v50, %v5301_v4  ;;  %vm3831_vm7 = vcmask 125952  }
  0xf8   : > { %495 = vst [vmem:[#allocation2 + $0x78] sm:$0xff] %v487_v12  ;;  %v5198_v37 = vor.u32 %v6300_v35, %v5197_v27  ;;  %v5202_v32 = vor.u32 %v6296_v30, %v5199_v36  ;;  %v6334_v48 = vld [vmem:[%s9213_s3 + $0xc4] sm:$0xf0]  ;;  %v5293_v27 = vld [vmem:[%s9213_s3 + $0x30] sm:$0xf] }
  0xf9   : > { %v5366_v26 = vor.u32 %v6334_v48, %v5365_v2  ;;  %v6316_v30 = vld [vmem:[%s9213_s3 + $0x34] sm:$0xf0]  ;;  %v5357_v31 = vld [vmem:[%s9213_s3 + $0xb0] sm:$0xf]  ;;  %v5493_v52 = vld [vmem:[%s9213_s3 + $0x1c0] sm:$0xf] }
  0xfa   : > { %1165 = vmatpush.bf16.msrb.mxu2 %v5198_v37  ;;  %1194 = vmatpush.bf16.msra.mxu3 %v5202_v32  ;;  %v408_v38 = vpop.permute.xlu0 %407  ;;  %v5294_v12 = vor.u32 %v6316_v30, %v5293_v27  ;;  %v6332_v35 = vld [vmem:[%s9213_s3 + $0xb4] sm:$0xf0]  ;;  %v5285_v37 = vld [vmem:[%s9213_s3 + $0x20] sm:$0xf]  ;;  %v6314_v32 = vld [vmem:[%s9213_s3 + $0x24] sm:$0xf0] }
  0xfb   : > { %v413_v21 = vrot.slane %v408_v38, 4  ;;  %v5358_v36 = vor.u32 %v6332_v35, %v5357_v31  ;;  %v5349_v38 = vld [vmem:[%s9213_s3 + $0xa0] sm:$0xf]  ;;  %v6366_v50 = vld [vmem:[%s9213_s3 + $0x1c4] sm:$0xf0] }
  0xfc   : > { %v5494_v2 = vor.u32 %v6366_v50, %v5493_v52  ;;  %v5397_v48 = vld [vmem:[%s9213_s3 + $0x100] sm:$0xf]  ;;  %v5485_v31 = vld [vmem:[%s9213_s3 + $0x1b0] sm:$0xf]  ;;  %v6384_v61 = vld [vmem:[%s9213_s3 + $0x254] sm:$0xf0] }
  0xfd   : > { %v422_v18 = vsel %vm414_vm0, %v412_v0, %v413_v21  ;;  %v5286_v21 = vor.u32 %v6314_v32, %v5285_v37  ;;  %v5557_v50 = vld [vmem:[%s9213_s3 + $0x240] sm:$0xf]  ;;  %vm2782_vm0 = vcmask 924672  }
  0xfe   : > { %5242 = vmatmul.msk.bf16.gmra.mxu1 %vm948_vm9, %v7082_v63  ;;  %5248 = vmatmul.msk.bf16.gmra.mxu3 %vm948_vm9, %v7076_v13  ;;  %v6291_v8 = vld [vmem:[#allocation2 + $0x6c] sm:$0xf0]  ;;  %v5159_v46 = vld [vmem:[#allocation2 + $0x70] sm:$0xf0]  ;;  %v423_v39 = vsel %vm416_vm8, %v7071_v9, %v422_v18  ;;  %v5133_v9 = vld [vmem:[#allocation2 + $0x18] sm:$0xf] }
  0xff   : > { %v5158_v40 = vor.u32 %v6291_v8, %v5157_v5  ;;  %v5162_v28 = vor.u32 %v6287_v23, %v5159_v46  ;;  %431 = vst [vmem:[#allocation2 + $0x38] sm:$0xff] %v423_v39  ;;  %v6292_v19 = vld [vmem:[#allocation2 + $0x74] sm:$0xf0]  ;;  %v5167_v0 = vld [vmem:[#allocation2 + $0x78] sm:$0xf0]  ;;  %vm4881_vm8 = vcmask 130048  }
 0x100   : > { %v5166_v47 = vor.u32 %v6292_v19, %v5165_v51  ;;  %v5170_v49 = vor.u32 %v6288_v62, %v5167_v0  ;;  %v6330_v5 = vld [vmem:[%s9213_s3 + $0xa4] sm:$0xf0]  ;;  %v5277_v51 = vld [vmem:[%s9213_s3 + $0x10] sm:$0xf]  ;;  %v6312_v62 = vld [vmem:[%s9213_s3 + $0x14] sm:$0xf0] }
 0x101   : > { %1108 = vmatpush.bf16.msrb.mxu0 %v5158_v40  ;;  %1137 = vmatpush.bf16.msrb.mxu1 %v5162_v28  ;;  %v5350_v18 = vor.u32 %v6330_v5, %v5349_v38  ;;  %v5341_v8 = vld [vmem:[%s9213_s3 + $0x90] sm:$0xf]  ;;  %v5278_v23 = vor.u32 %v6312_v62, %v5277_v51  ;;  %v6356_v39 = vld [vmem:[%s9213_s3 + $0x174] sm:$0xf0]  ;;  %v5269_v28 = vld [vmem:[%s9213_s3] sm:$0xf] }
 0x102   : > { %5245 = vmatmul.msk.bf16.gmra.mxu2 %vm948_vm9, %v7014_v7  ;;  %1195 = vmatpush.bf16.msra.mxu3 %v5170_v49  ;;  %v5454_v40 = vor.u32 %v6356_v39, %v5453_v20  ;;  %v6310_v19 = vld [vmem:[%s9213_s3 + $0x4] sm:$0xf0]  ;;  %v5333_v0 = vld [vmem:[%s9213_s3 + $0x80] sm:$0xf]  ;;  %v5469_v20 = vld [vmem:[%s9213_s3 + $0x190] sm:$0xf] }
 0x103   : > { %1166 = vmatpush.bf16.msrb.mxu2 %v5166_v47  ;;  %v5270_v41 = vor.u32 %v6310_v19, %v5269_v28  ;;  %v5334_v43 = vor.u32 %v6326_v42, %v5333_v0  ;;  %v5445_v47 = vld [vmem:[%s9213_s3 + $0x160] sm:$0xf]  ;;  %v6354_v49 = vld [vmem:[%s9213_s3 + $0x164] sm:$0xf0]  ;;  %v6360_v39 = vld [vmem:[%s9213_s3 + $0x194] sm:$0xf0] }
 0x104   : > { %v5477_v38 = vld [vmem:[%s9213_s3 + $0x1a0] sm:$0xf]  ;;  %v5470_v28 = vor.u32 %v6360_v39, %v5469_v20  ;;  %v6388_v42 = vld [vmem:[%s9213_s3 + $0x274] sm:$0xf0]  ;;  %v6378_v39 = vld [vmem:[%s9213_s3 + $0x224] sm:$0xf0] }
 0x105   : > { %1109 = vmatpush.bf16.msrb.mxu0 %v5126_v53  ;;  %1138 = vmatpush.bf16.msrb.mxu1 %v5130_v54  ;;  %v5446_v53 = vor.u32 %v6354_v49, %v5445_v47  ;;  %v5437_v54 = vld [vmem:[%s9213_s3 + $0x150] sm:$0xf]  ;;  %v6404_v49 = vld [vmem:[%s9213_s3 + $0x2f4] sm:$0xf0]  ;;  %v5541_v20 = vld [vmem:[%s9213_s3 + $0x220] sm:$0xf] }
 0x106   : > { %v6284_v56 = vld [vmem:[#allocation2 + $0x34] sm:$0xf0]  ;;  %v5135_v24 = vld [vmem:[#allocation2 + $0x38] sm:$0xf0] }
 0x107   : > { %v5134_v45 = vor.u32 %v6284_v56, %v5133_v9  ;;  %v5138_v57 = vor.u32 %v6280_v55, %v5135_v24  ;;  %v6352_v9 = vld [vmem:[%s9213_s3 + $0x154] sm:$0xf0]  ;;  %v5429_v56 = vld [vmem:[%s9213_s3 + $0x140] sm:$0xf]  ;;  %v6350_v24 = vld [vmem:[%s9213_s3 + $0x144] sm:$0xf0] }
 0x108   : > { %5251 = vmatmul.msk.bf16.vlgmr.msrb.gmra.mxu0 %vm948_vm9, %v7009_v3  ;;  %v5438_v55 = vor.u32 %v6352_v9, %v5437_v54  ;;  %v5461_v9 = vld [vmem:[%s9213_s3 + $0x180] sm:$0xf] }
 0x109   : > { %1167 = vmatpush.bf16.msrb.mxu2 %v5134_v45  ;;  %1196 = vmatpush.bf16.msra.mxu3 %v5138_v57  ;;  %v5517_v45 = vld [vmem:[%s9213_s3 + $0x1f0] sm:$0xf]  ;;  %v5430_v57 = vor.u32 %v6350_v24, %v5429_v56 }
 0x10a   : > { %2082 = vmatpush.bf16.msra.mxu0 %v5326_v33  ;;  %2111 = vmatpush.bf16.msra.mxu1 %v5390_v29  ;;  %v5518_v59 = vor.u32 %v6372_v58, %v5517_v45  ;;  %v5509_v33 = vld [vmem:[%s9213_s3 + $0x1e0] sm:$0xf]  ;;  %v6370_v29 = vld [vmem:[%s9213_s3 + $0x1e4] sm:$0xf0] }
 0x10b   : > { %v5510_v22 = vor.u32 %v6370_v29, %v5509_v33  ;;  %v5573_v45 = vld [vmem:[%s9213_s3 + $0x260] sm:$0xf] }
 0x10c   : > { %v5637_v58 = vld [vmem:[%s9213_s3 + $0x2e0] sm:$0xf] }
 0x10d   : > { %2140 = vmatpush.bf16.msra.mxu2 %v5454_v40  ;;  %2169 = vmatpush.bf16.msrb.mxu3 %v5518_v59 }
 0x10e   : > { %5249 = vmatmul.msk.bf16.gmra.mxu3 %vm948_vm9, %v7014_v7  ;;  %5255 = vmatmul.msk.bf16.vlgmr.msrb.gmra.mxu1 %vm948_vm9, %v7009_v3 }
 0x10f   : > { %2083 = vmatpush.bf16.msra.mxu0 %v5318_v1  ;;  %2112 = vmatpush.bf16.msra.mxu1 %v5382_v14  ;;  %v5501_v1 = vld [vmem:[%s9213_s3 + $0x1d0] sm:$0xf]  ;;  %v6368_v14 = vld [vmem:[%s9213_s3 + $0x1d4] sm:$0xf0] }
 0x110   : > { %v5502_v16 = vor.u32 %v6368_v14, %v5501_v1 }
 0x111   : > { %2141 = vmatpush.bf16.msra.mxu2 %v5446_v53  ;;  %2170 = vmatpush.bf16.msrb.mxu3 %v5510_v22  ;;  %v5565_v22 = vld [vmem:[%s9213_s3 + $0x250] sm:$0xf] }
 0x112   : > { %5246 = vmatmul.msk.bf16.gmra.mxu2 %vm948_vm9, %v7082_v63  ;;  %v5566_v1 = vor.u32 %v6384_v61, %v5565_v22 }
 0x113   : > { %2084 = vmatpush.bf16.msra.mxu0 %v5310_v6  ;;  %2113 = vmatpush.bf16.msra.mxu1 %v5374_v44  ;;  %v6344_v6 = vld [vmem:[%s9213_s3 + $0x114] sm:$0xf0] }
 0x114   : > { %v5406_v4 = vor.u32 %v6344_v6, %v5405_v10 }
 0x115   : > { %2142 = vmatpush.bf16.msra.mxu2 %v5438_v55  ;;  %2171 = vmatpush.bf16.msrb.mxu3 %v5502_v16  ;;  %v6358_v55 = vld [vmem:[%s9213_s3 + $0x184] sm:$0xf0] }
 0x116   : > { %v5462_v24 = vor.u32 %v6358_v55, %v5461_v9 }
 0x117   : > { %2085 = vmatpush.bf16.msra.mxu0 %v5302_v25  ;;  %2114 = vmatpush.bf16.msra.mxu1 %v5366_v26  ;;  %v6342_v26 = vld [vmem:[%s9213_s3 + $0x104] sm:$0xf0] }
 0x118   : > { %5252 = vmatmul.msk.bf16.gmra.mxu0 %vm948_vm9, %v7076_v13  ;;  %v5398_v30 = vor.u32 %v6342_v26, %v5397_v48 }
 0x119   : > { %2143 = vmatpush.bf16.msra.mxu2 %v5430_v57  ;;  %2172 = vmatpush.bf16.msrb.mxu3 %v5494_v2  ;;  %v6386_v57 = vld [vmem:[%s9213_s3 + $0x264] sm:$0xf0] }
 0x11a   : > { %v5574_v59 = vor.u32 %v6386_v57, %v5573_v45  ;;  %v6382_v2 = vld [vmem:[%s9213_s3 + $0x244] sm:$0xf0]  ;;  %v6376_v45 = vld [vmem:[%s9213_s3 + $0x214] sm:$0xf0] }
 0x11b   : > { %2086 = vmatpush.bf16.msra.mxu0 %v5294_v12  ;;  %2115 = vmatpush.bf16.msra.mxu1 %v5358_v36 }
 0x11e   : > { %5250 = vmatmul.msk.bf16.gmra.mxu3 %vm948_vm9, %v7082_v63  ;;  %5256 = vmatmul.msk.bf16.gmra.mxu1 %vm948_vm9, %v7076_v13 }
 0x11f   : > { %2087 = vmatpush.bf16.msra.mxu0 %v5286_v21  ;;  %2116 = vmatpush.bf16.msra.mxu1 %v5350_v18  ;;  %v6362_v21 = vld [vmem:[%s9213_s3 + $0x1a4] sm:$0xf0] }
 0x120   : > { %v5478_v62 = vor.u32 %v6362_v21, %v5477_v38  ;;  %v5549_v38 = vld [vmem:[%s9213_s3 + $0x230] sm:$0xf]  ;;  %v6380_v21 = vld [vmem:[%s9213_s3 + $0x234] sm:$0xf0] }
 0x122   : > { %5259 = vmatmul.msk.bf16.vlgmr.msrb.gmra.mxu2 %vm948_vm9, %v7009_v3  ;;  %v7356_v25 = vpop.permute.xlu1 %710 }
 0x123   : > { %2088 = vmatpush.bf16.msra.mxu0 %v5278_v23 }
 0x127   : > { %2089 = vmatpush.bf16.msra.mxu0 %v5270_v41  ;;  %v5581_v41 = vld [vmem:[%s9213_s3 + $0x270] sm:$0xf] }
 0x128   : > { %5253 = vmatmul.msk.bf16.gmra.mxu0 %vm948_vm9, %v7014_v7  ;;  %v7376_v37 = vpop.permute.xlu2 %715  ;;  %v5582_v47 = vor.u32 %v6388_v42, %v5581_v41  ;;  %v5542_v41 = vor.u32 %v6378_v39, %v5541_v20  ;;  %v5605_v42 = vld [vmem:[%s9213_s3 + $0x2a0] sm:$0xf] }
 0x12b   : > { %2198 = vmatpush.bf16.msrb.mxu0 %v5582_v47 }
 0x12e   : > { %5257 = vmatmul.msk.bf16.gmra.mxu1 %vm948_vm9, %v7014_v7  ;;  %5263 = vmatmul.msk.bf16.vlgmr.msra.gmra.mxu3 %vm948_vm9, %v7009_v3  ;;  %v6328_v3 = vld [vmem:[%s9213_s3 + $0x94] sm:$0xf0] }
 0x12f   : > { %v5342_v46 = vor.u32 %v6328_v3, %v5341_v8  ;;  %2199 = vmatpush.bf16.msrb.mxu0 %v5574_v59 }
 0x130   : > { %v7452_v14 = vpop.permute.xlu1 %725  ;;  %v7503_v47 = vpop.permute.xlu2 %730 }
 0x131   : > { %2117 = vmatpush.bf16.msra.mxu1 %v5342_v46 }
 0x132   : > { %5260 = vmatmul.msk.bf16.gmra.mxu2 %vm948_vm9, %v7076_v13 }
 0x133   : > { %2200 = vmatpush.bf16.msrb.mxu0 %v5566_v1 }
 0x135   : > { %2118 = vmatpush.bf16.msra.mxu1 %v5334_v43  ;;  %v5645_v43 = vld [vmem:[%s9213_s3 + $0x2f0] sm:$0xf] }
 0x136   : > { %v5646_v54 = vor.u32 %v6404_v49, %v5645_v43  ;;  %v6394_v43 = vld [vmem:[%s9213_s3 + $0x2a4] sm:$0xf0] }
 0x138   : > { %5254 = vmatmul.msk.bf16.gmra.mxu0 %vm948_vm9, %v7082_v63 }
 0x139   : > { %2227 = vmatpush.bf16.msrb.mxu1 %v5646_v54  ;;  %v5606_v54 = vor.u32 %v6394_v43, %v5605_v42 }
 0x13e   : > { %5258 = vmatmul.msk.bf16.gmra.mxu1 %vm948_vm9, %v7082_v63  ;;  %5264 = vmatmul.msk.bf16.gmra.mxu3 %vm948_vm9, %v7076_v13  ;;  %v5421_v13 = vld [vmem:[%s9213_s3 + $0x130] sm:$0xf] }
 0x13f   : > { %v5422_v60 = vor.u32 %v6348_v15, %v5421_v13  ;;  %v6402_v13 = vld [vmem:[%s9213_s3 + $0x2e4] sm:$0xf0]  ;;  %v7434_v15 = vpop.permute.xlu0 %720 }
 0x140   : > { %v5638_v33 = vor.u32 %v6402_v13, %v5637_v58  ;;  %v6392_v13 = vld [vmem:[%s9213_s3 + $0x294] sm:$0xf0] }
 0x141   : > { %2144 = vmatpush.bf16.msra.mxu2 %v5422_v60 }
 0x142   : > { %5261 = vmatmul.msk.bf16.gmra.mxu2 %vm948_vm9, %v7014_v7  ;;  %2228 = vmatpush.bf16.msrb.mxu1 %v5638_v33 }
 0x145   : > { %2145 = vmatpush.bf16.msra.mxu2 %v5414_v11  ;;  %v6400_v11 = vld [vmem:[%s9213_s3 + $0x2d4] sm:$0xf0] }
 0x149   : > { %v995_v17 = vpop.f32.mrf.mxu0  ;;  %2146 = vmatpush.bf16.msra.mxu2 %v5406_v4 }
 0x14a   : > { %v1024_v44 = vpop.f32.mrf.mxu1  ;;  %v996_v27 = vadd.f32 %v995_v17, %v7356_v25 }
 0x14b   : > { %v1025_v12 = vadd.f32 %v1024_v44, %v7356_v25 }
 0x14c   : > { %v1218_v5 = vmax.f32 %v996_v27, 0.0  ;;  %v5558_v27 = vor.u32 %v6382_v2, %v5557_v50 }
 0x14d   : > { %2147 = vmatpush.bf16.msra.mxu2 %v5398_v30  ;;  %v1219_v8 = vmax.f32 %v1025_v12, 0.0  ;;  %v5621_v30 = vld [vmem:[%s9213_s3 + $0x2c0] sm:$0xf] }
 0x14e   : > { %5265 = vmatmul.msk.bf16.gmra.mxu3 %vm948_vm9, %v7014_v7  ;;  %v6364_v7 = vld [vmem:[%s9213_s3 + $0x1b4] sm:$0xf0]  ;;  %2201 = vmatpush.bf16.msrb.mxu0 %v5558_v27 }
 0x14f   : > { %v7374_v35 = vpop.f32.mrf.mxu3  ;;  %v5486_v36 = vor.u32 %v6364_v7, %v5485_v31  ;;  %v6398_v31 = vld [vmem:[%s9213_s3 + $0x2c4] sm:$0xf0] }
 0x150   : > { %v5622_v12 = vor.u32 %v6398_v31, %v5621_v30  ;;  %v1006_v57 = vadd.f32 %v7374_v35, %v7503_v47  ;;  %v6420_v35 = vld [vmem:[%s9213_s3 + $0x374] sm:$0xf0] }
 0x151   : > { %v997_v32 = vpop.f32.mrf.mxu0  ;;  %2173 = vmatpush.bf16.msrb.mxu3 %v5486_v36 }
 0x152   : > { %5262 = vmatmul.msk.bf16.gmra.mxu2 %vm948_vm9, %v7082_v63  ;;  %v998_v18 = vadd.f32 %v997_v32, %v7376_v37  ;;  %v1026_v51 = vpop.f32.mrf.mxu1 }
 0x153   : > { %v1027_v23 = vadd.f32 %v1026_v51, %v7376_v37  ;;  %v5613_v51 = vld [vmem:[%s9213_s3 + $0x2b0] sm:$0xf] }
 0x154   : > { %v1226_v3 = vmax.f32 %v998_v18, 0.0  ;;  %v5550_v18 = vor.u32 %v6380_v21, %v5549_v38 }
 0x155   : > { %v1227_v46 = vmax.f32 %v1027_v23, 0.0  ;;  %2174 = vmatpush.bf16.msrb.mxu3 %v5478_v62  ;;  %v6396_v62 = vld [vmem:[%s9213_s3 + $0x2b4] sm:$0xf0] }
 0x156   : > { %v7394_v40 = vpack.c.bf16 %v1226_v3, %v1218_v5  ;;  %v5614_v23 = vor.u32 %v6396_v62, %v5613_v51  ;;  %2202 = vmatpush.bf16.msrb.mxu0 %v5550_v18  ;;  %v5693_v18 = vld [vmem:[%s9213_s3 + $0x350] sm:$0xf]  ;;  %v6416_v51 = vld [vmem:[%s9213_s3 + $0x354] sm:$0xf0] }
 0x157   : > { %v7396_v19 = vpack.c.bf16 %v1227_v46, %v1219_v8  ;;  %v7398_v0 = vpop.f32.mrf.mxu3  ;;  %v7489_v46 = vpop.permute.xlu1 %735 }
 0x158   : > { %2090 = vmatmul.bf16.vlgmr.msra.gmra.mxu0 %v7394_v40  ;;  %v1008_v9 = vadd.f32 %v7398_v0, %v7489_v46  ;;  %v5597_v0 = vld [vmem:[%s9213_s3 + $0x290] sm:$0xf] }
 0x159   : > { %2119 = vmatmul.bf16.vlgmr.msra.gmra.mxu1 %v7396_v19  ;;  %2175 = vmatpush.bf16.msrb.mxu3 %v5470_v28 }
 0x15a   : > { %v1000_v53 = vpop.f32.mrf.mxu0  ;;  %2203 = vmatpush.bf16.msrb.mxu0 %v5542_v41  ;;  %v1258_v22 = vmax.f32 %v1008_v9, 0.0 }
 0x15b   : > { %v1029_v56 = vpop.f32.mrf.mxu1  ;;  %v1001_v60 = vadd.f32 %v1000_v53, %v7434_v15 }
 0x15c   : > { %v1030_v29 = vadd.f32 %v1029_v56, %v7434_v15 }
 0x15d   : > { %2176 = vmatpush.bf16.msrb.mxu3 %v5462_v24  ;;  %v1234_v52 = vmax.f32 %v1001_v60, 0.0  ;;  %v5533_v24 = vld [vmem:[%s9213_s3 + $0x210] sm:$0xf]  ;;  %v5598_v60 = vor.u32 %v6392_v13, %v5597_v0  ;;  %v6412_v13 = vld [vmem:[%s9213_s3 + $0x334] sm:$0xf0] }
 0x15e   : > { %5266 = vmatmul.msk.bf16.gmra.mxu3 %vm948_vm9, %v7082_v63  ;;  %v5629_v63 = vld [vmem:[%s9213_s3 + $0x2d0] sm:$0xf]  ;;  %v1235_v4 = vmax.f32 %v1030_v29, 0.0  ;;  %v5534_v59 = vor.u32 %v6376_v45, %v5533_v24  ;;  %vm4951_vm9 = vcmask 130112  }
 0x15f   : > { %v5630_v17 = vor.u32 %v6400_v11, %v5629_v63  ;;  %v5709_v29 = vld [vmem:[%s9213_s3 + $0x370] sm:$0xf] }
 0x160   : > { %2204 = vmatpush.bf16.msrb.mxu0 %v5534_v59  ;;  %v5710_v63 = vor.u32 %v6420_v35, %v5709_v29  ;;  %v5677_v0 = vld [vmem:[%s9213_s3 + $0x330] sm:$0xf] }
 0x161   : > { %v7447_v34 = vpop.f32.mrf.mxu3  ;;  %2229 = vmatpush.bf16.msrb.mxu1 %v5630_v17  ;;  %v6374_v17 = vld [vmem:[%s9213_s3 + $0x204] sm:$0xf0]  ;;  %v5678_v35 = vor.u32 %v6412_v13, %v5677_v0 }
 0x162   : > { %v1002_v16 = vpop.f32.mrf.mxu0  ;;  %2256 = vmatpush.bf16.msrb.mxu2 %v5710_v63 }
 0x163   : > { %v1003_v10 = vadd.f32 %v1002_v16, %v7452_v14  ;;  %v1031_v6 = vpop.f32.mrf.mxu1  ;;  %v5525_v16 = vld [vmem:[%s9213_s3 + $0x200] sm:$0xf] }
 0x164   : > { %v1032_v44 = vadd.f32 %v1031_v6, %v7452_v14 }
 0x165   : > { %v1242_v48 = vmax.f32 %v1003_v10, 0.0  ;;  %v1053_v26 = vpop.f32.mrf.mxu2  ;;  %2230 = vmatpush.bf16.msrb.mxu1 %v5622_v12  ;;  %v1250_v10 = vmax.f32 %v1006_v57, 0.0 }
 0x166   : > { %v1243_v7 = vmax.f32 %v1032_v44, 0.0  ;;  %v1054_v8 = vadd.f32 %v1053_v26, %v7356_v25  ;;  %v5589_v44 = vld [vmem:[%s9213_s3 + $0x280] sm:$0xf]  ;;  %v6418_v26 = vld [vmem:[%s9213_s3 + $0x364] sm:$0xf0] }
 0x167   : > { %v7468_v36 = vpack.c.bf16 %v1242_v48, %v1234_v52  ;;  %v5526_v52 = vor.u32 %v6374_v17, %v5525_v16  ;;  %v5701_v48 = vld [vmem:[%s9213_s3 + $0x360] sm:$0xf]  ;;  %v7551_v27 = vpack.c.bf16 %v1258_v22, %v1250_v10  ;;  %v6434_v22 = vld [vmem:[%s9213_s3 + $0x3e4] sm:$0xf0] }
 0x168   : > { %v7470_v32 = vpack.c.bf16 %v1243_v7, %v1235_v4  ;;  %v1220_v49 = vmax.f32 %v1054_v8, 0.0  ;;  %v6390_v4 = vld [vmem:[%s9213_s3 + $0x284] sm:$0xf0]  ;;  %v5702_v30 = vor.u32 %v6418_v26, %v5701_v48  ;;  %v5694_v8 = vor.u32 %v6416_v51, %v5693_v18  ;;  %v5749_v18 = vld [vmem:[%s9213_s3 + $0x3c0] sm:$0xf] }
 0x169   : > { %v7478_v5 = vpop.f32.mrf.mxu3  ;;  %2095 = vmatmul.bf16.gmra.mxu0 %v7468_v36  ;;  %2231 = vmatpush.bf16.msrb.mxu1 %v5614_v23  ;;  %v5590_v2 = vor.u32 %v6390_v4, %v5589_v44  ;;  %v7566_v23 = vpop.permute.xlu0 %745 }
 0x16a   : > { %2124 = vmatmul.bf16.gmra.mxu1 %v7470_v32  ;;  %2205 = vmatpush.bf16.msrb.mxu0 %v5526_v52  ;;  %v6410_v52 = vld [vmem:[%s9213_s3 + $0x324] sm:$0xf0] }
 0x16b   : > { %v1034_v3 = vpop.f32.mrf.mxu1  ;;  %2257 = vmatpush.bf16.msrb.mxu2 %v5702_v30 }
 0x16c   : > { %v1035_v55 = vadd.f32 %v1034_v3, %v7503_v47 }
 0x16d   : > { %v1055_v28 = vpop.f32.mrf.mxu2  ;;  %2232 = vmatpush.bf16.msrb.mxu1 %v5606_v54  ;;  %v1013_v54 = vadd.f32 %v7478_v5, %v7566_v23 }
 0x16e   : > { %v1056_v53 = vadd.f32 %v1055_v28, %v7376_v37  ;;  %v1251_v1 = vmax.f32 %v1035_v55, 0.0  ;;  %v7568_v28 = vpop.permute.xlu2 %740  ;;  %v5773_v55 = vld [vmem:[%s9213_s3 + $0x3f0] sm:$0xf] }
 0x16f   : > { %2258 = vmatpush.bf16.msrb.mxu2 %v5694_v8  ;;  %v1011_v57 = vadd.f32 %v7447_v34, %v7568_v28  ;;  %v1274_v34 = vmax.f32 %v1013_v54, 0.0  ;;  %v6430_v8 = vld [vmem:[%s9213_s3 + $0x3c4] sm:$0xf0] }
 0x170   : > { %v1228_v56 = vmax.f32 %v1056_v53, 0.0  ;;  %v6414_v53 = vld [vmem:[%s9213_s3 + $0x344] sm:$0xf0] }
 0x171   : > { %v1082_v58 = vpop.f32.mrf.mxu3  ;;  %2233 = vmatpush.bf16.msrb.mxu1 %v5598_v60  ;;  %v5765_v60 = vld [vmem:[%s9213_s3 + $0x3e0] sm:$0xf] }
 0x172   : > { %v7523_v33 = vpack.c.bf16 %v1228_v56, %v1220_v49  ;;  %v1083_v31 = vadd.f32 %v1082_v58, %v7356_v25  ;;  %v5685_v49 = vld [vmem:[%s9213_s3 + $0x340] sm:$0xf]  ;;  %v6436_v56 = vld [vmem:[%s9213_s3 + $0x3f4] sm:$0xf0]  ;;  %v5766_v63 = vor.u32 %v6434_v22, %v5765_v60  ;;  %v6426_v22 = vld [vmem:[%s9213_s3 + $0x3a4] sm:$0xf0] }
 0x173   : > { %v1036_v61 = vpop.f32.mrf.mxu1  ;;  %v5686_v9 = vor.u32 %v6414_v53, %v5685_v49  ;;  %v5774_v45 = vor.u32 %v6436_v56, %v5773_v55  ;;  %v6406_v55 = vld [vmem:[%s9213_s3 + $0x304] sm:$0xf0] }
 0x174   : > { %v1037_v11 = vadd.f32 %v1036_v61, %v7489_v46  ;;  %2148 = vmatmul.bf16.vlgmr.msra.gmra.mxu2 %v7523_v33  ;;  %v1221_v3 = vmax.f32 %v1083_v31, 0.0 }
 0x175   : > { %v1058_v6 = vpop.f32.mrf.mxu2  ;;  %2234 = vmatpush.bf16.msrb.mxu1 %v5590_v2  ;;  %2259 = vmatpush.bf16.msrb.mxu2 %v5686_v9  ;;  %v6432_v2 = vld [vmem:[%s9213_s3 + $0x3d4] sm:$0xf0]  ;;  %v5653_v9 = vld [vmem:[%s9213_s3 + $0x300] sm:$0xf] }
 0x176   : > { %v1259_v50 = vmax.f32 %v1037_v11, 0.0  ;;  %v1059_v38 = vadd.f32 %v1058_v6, %v7434_v15  ;;  %2285 = vmatpush.bf16.msra.mxu3 %v5774_v45  ;;  %v5669_v6 = vld [vmem:[%s9213_s3 + $0x320] sm:$0xf]  ;;  %v5741_v45 = vld [vmem:[%s9213_s3 + $0x3b0] sm:$0xf] }
 0x177   : > { %v5670_v4 = vor.u32 %v6410_v52, %v5669_v6 }
 0x178   : > { %v7554_v7 = vpack.c.bf16 %v1259_v50, %v1251_v1  ;;  %v1236_v41 = vmax.f32 %v1059_v38, 0.0  ;;  %v1266_v1 = vmax.f32 %v1011_v57, 0.0  ;;  %v5757_v50 = vld [vmem:[%s9213_s3 + $0x3d0] sm:$0xf]  ;;  %v6428_v57 = vld [vmem:[%s9213_s3 + $0x3b4] sm:$0xf0] }
 0x179   : > { %v1084_v12 = vpop.f32.mrf.mxu3  ;;  %2100 = vmatmul.bf16.gmra.mxu0 %v7551_v27  ;;  %2260 = vmatpush.bf16.msrb.mxu2 %v5678_v35  ;;  %v5758_v30 = vor.u32 %v6432_v2, %v5757_v50  ;;  %v5661_v38 = vld [vmem:[%s9213_s3 + $0x310] sm:$0xf]  ;;  %v5742_v0 = vor.u32 %v6428_v57, %v5741_v45  ;;  %v5733_v35 = vld [vmem:[%s9213_s3 + $0x3a0] sm:$0xf]  ;;  %v6424_v50 = vld [vmem:[%s9213_s3 + $0x394] sm:$0xf0] }
 0x17a   : > { %v1085_v21 = vadd.f32 %v1084_v12, %v7376_v37  ;;  %2129 = vmatmul.bf16.gmra.mxu1 %v7554_v7  ;;  %2286 = vmatpush.bf16.msra.mxu3 %v5766_v63  ;;  %v7613_v44 = vpack.c.bf16 %v1274_v34, %v1266_v1  ;;  %v5734_v1 = vor.u32 %v6426_v22, %v5733_v35 }
 0x17b   : > { %v1039_v62 = vpop.f32.mrf.mxu1 }
 0x17c   : > { %v1229_v20 = vmax.f32 %v1085_v21, 0.0  ;;  %v1040_v5 = vadd.f32 %v1039_v62, %v7568_v28  ;;  %v6408_v21 = vld [vmem:[%s9213_s3 + $0x314] sm:$0xf0] }
 0x17d   : > { %v1060_v39 = vpop.f32.mrf.mxu2  ;;  %2261 = vmatpush.bf16.msrb.mxu2 %v5670_v4  ;;  %v5662_v62 = vor.u32 %v6408_v21, %v5661_v38  ;;  %v5725_v4 = vld [vmem:[%s9213_s3 + $0x390] sm:$0xf]  ;;  %v5327_v38 = vld [vmem:[%s9213_s3 + $0x78] sm:$0xf0] }
 0x17e   : > { %v7570_v42 = vpack.c.bf16 %v1229_v20, %v1221_v3  ;;  %v1061_v43 = vadd.f32 %v1060_v39, %v7452_v14  ;;  %v1267_v17 = vmax.f32 %v1040_v5, 0.0  ;;  %2287 = vmatpush.bf16.msra.mxu3 %v5758_v30 }
 0x180   : > { %v1244_v24 = vmax.f32 %v1061_v43, 0.0  ;;  %2177 = vmatmul.bf16.vlgmr.msrb.gmra.mxu3 %v7570_v42 }
 0x181   : > { %v1087_v58 = vpop.f32.mrf.mxu3  ;;  %2262 = vmatpush.bf16.msrb.mxu2 %v5662_v62  ;;  %v5391_v62 = vld [vmem:[%s9213_s3 + $0xf8] sm:$0xf0] }
 0x182   : > { %v7591_v59 = vpack.c.bf16 %v1244_v24, %v1236_v41  ;;  %v1088_v48 = vadd.f32 %v1087_v58, %v7434_v15  ;;  %v5750_v41 = vor.u32 %v6430_v8, %v5749_v18  ;;  %v5654_v24 = vor.u32 %v6406_v55, %v5653_v9  ;;  %v6321_v55 = vld [vmem:[%s9213_s3 + $0x64] sm:$0xf] }
 0x183   : > { %v1041_v29 = vpop.f32.mrf.mxu1 }
 0x184   : > { %v1042_v61 = vadd.f32 %v1041_v29, %v7566_v23  ;;  %2153 = vmatmul.bf16.gmra.mxu2 %v7591_v59  ;;  %v1237_v3 = vmax.f32 %v1088_v48, 0.0  ;;  %2288 = vmatpush.bf16.msra.mxu3 %v5750_v41  ;;  %v5726_v48 = vor.u32 %v6424_v50, %v5725_v4 }
 0x185   : > { %v1063_v11 = vpop.f32.mrf.mxu2  ;;  %v1111_v16 = vpop.f32.mrf.mxu0  ;;  %2263 = vmatpush.bf16.msrb.mxu2 %v5654_v24 }
 0x186   : > { %v1275_v10 = vmax.f32 %v1042_v61, 0.0  ;;  %v1064_v20 = vadd.f32 %v1063_v11, %v7503_v47  ;;  %v1112_v13 = vadd.f32 %v1111_v16, %v7356_v25 }
 0x188   : > { %v7622_v26 = vpack.c.bf16 %v1275_v10, %v1267_v17  ;;  %v1252_v58 = vmax.f32 %v1064_v20, 0.0  ;;  %2289 = vmatpush.bf16.msra.mxu3 %v5742_v0  ;;  %v1222_v16 = vmax.f32 %v1112_v13, 0.0  ;;  %v5717_v20 = vld [vmem:[%s9213_s3 + $0x380] sm:$0xf] }
 0x189   : > { %v1089_v31 = vpop.f32.mrf.mxu3  ;;  %2105 = vmatmul.bf16.gmra.mxu0 %v7613_v44 }
 0x18a   : > { %v1090_v12 = vadd.f32 %v1089_v31, %v7452_v14  ;;  %2134 = vmatmul.bf16.gmra.mxu1 %v7622_v26 }
 0x18b   : > { %v1140_v51 = vpop.f32.mrf.mxu1 }
 0x18c   : > { %v1245_v39 = vmax.f32 %v1090_v12, 0.0  ;;  %v1141_v34 = vadd.f32 %v1140_v51, %v7356_v25  ;;  %2290 = vmatpush.bf16.msra.mxu3 %v5734_v1  ;;  %v6323_v12 = vld [vmem:[%s9213_s3 + $0x74] sm:$0xf] }
 0x18d   : > { %v1065_v43 = vpop.f32.mrf.mxu2  ;;  %v1113_v49 = vpop.f32.mrf.mxu0  ;;  %v5330_v18 = vor.u32 %v6323_v12, %v5327_v38  ;;  %v6339_v51 = vld [vmem:[%s9213_s3 + $0xf4] sm:$0xf]  ;;  %v6317_v12 = vld [vmem:[%s9213_s3 + $0x44] sm:$0xf]  ;;  %v5303_v38 = vld [vmem:[%s9213_s3 + $0x48] sm:$0xf0] }
 0x18e   : > { %v1066_v53 = vadd.f32 %v1065_v43, %v7489_v46  ;;  %v7641_v54 = vpack.c.bf16 %v1245_v39, %v1237_v3  ;;  %v1114_v56 = vadd.f32 %v1113_v49, %v7376_v37  ;;  %v1223_v6 = vmax.f32 %v1141_v34, 0.0  ;;  %v6422_v39 = vld [vmem:[%s9213_s3 + $0x384] sm:$0xf0] }
 0x18f   : > { %v5394_v3 = vor.u32 %v6339_v51, %v5391_v62  ;;  %2314 = vmatpush.bf16.msra.mxu0 %v5330_v18  ;;  %v5718_v43 = vor.u32 %v6422_v39, %v5717_v20  ;;  %v5306_v62 = vor.u32 %v6317_v12, %v5303_v38  ;;  %v6311_v12 = vld [vmem:[%s9213_s3 + $0x14] sm:$0xf]  ;;  %v5279_v38 = vld [vmem:[%s9213_s3 + $0x18] sm:$0xf0] }
 0x190   : > { %v1260_v5 = vmax.f32 %v1066_v53, 0.0  ;;  %2182 = vmatmul.bf16.gmra.mxu3 %v7641_v54  ;;  %v1230_v61 = vmax.f32 %v1114_v56, 0.0  ;;  %v5319_v56 = vld [vmem:[%s9213_s3 + $0x68] sm:$0xf0] }
 0x191   : > { %v1092_v60 = vpop.f32.mrf.mxu3  ;;  %2291 = vmatpush.bf16.msra.mxu3 %v5726_v48  ;;  %2343 = vmatpush.bf16.msra.mxu1 %v5394_v3  ;;  %v5322_v57 = vor.u32 %v6321_v55, %v5319_v56  ;;  %v5367_v3 = vld [vmem:[%s9213_s3 + $0xc8] sm:$0xf0]  ;;  %v5295_v55 = vld [vmem:[%s9213_s3 + $0x38] sm:$0xf0] }
 0x192   : > { %v7659_v29 = vpack.c.bf16 %v1260_v5, %v1252_v58  ;;  %v7675_v2 = vpack.c.bf16 %v1230_v61, %v1222_v16  ;;  %v1093_v30 = vadd.f32 %v1092_v60, %v7503_v47  ;;  %v6337_v58 = vld [vmem:[%s9213_s3 + $0xe4] sm:$0xf]  ;;  %v5383_v5 = vld [vmem:[%s9213_s3 + $0xe8] sm:$0xf0]  ;;  %v6319_v61 = vld [vmem:[%s9213_s3 + $0x54] sm:$0xf] }
 0x193   : > { %v1142_v63 = vpop.f32.mrf.mxu1  ;;  %2315 = vmatpush.bf16.msra.mxu0 %v5322_v57  ;;  %v5386_v34 = vor.u32 %v6337_v58, %v5383_v5  ;;  %v5359_v57 = vld [vmem:[%s9213_s3 + $0xb8] sm:$0xf0] }
 0x194   : > { %v1143_v11 = vadd.f32 %v1142_v63, %v7376_v37  ;;  %2158 = vmatmul.bf16.gmra.mxu2 %v7659_v29  ;;  %v1253_v49 = vmax.f32 %v1093_v30, 0.0  ;;  %v5311_v63 = vld [vmem:[%s9213_s3 + $0x58] sm:$0xf0] }
 0x195   : > { %v1068_v17 = vpop.f32.mrf.mxu2  ;;  %v1116_v10 = vpop.f32.mrf.mxu0  ;;  %2292 = vmatpush.bf16.msra.mxu3 %v5718_v43  ;;  %2344 = vmatpush.bf16.msra.mxu1 %v5386_v34  ;;  %v5314_v16 = vor.u32 %v6319_v61, %v5311_v63  ;;  %v5287_v61 = vld [vmem:[%s9213_s3 + $0x28] sm:$0xf0] }
 0x196   : > { %v1231_v52 = vmax.f32 %v1143_v11, 0.0  ;;  %v1069_v53 = vadd.f32 %v1068_v17, %v7568_v28  ;;  %v1117_v1 = vadd.f32 %v1116_v10, %v7434_v15  ;;  %v6335_v17 = vld [vmem:[%s9213_s3 + $0xd4] sm:$0xf] }
 0x197   : > { %2316 = vmatpush.bf16.msra.mxu0 %v5314_v16  ;;  %v6329_v16 = vld [vmem:[%s9213_s3 + $0xa4] sm:$0xf] }
 0x198   : > { %v7678_v31 = vpack.c.bf16 %v1231_v52, %v1223_v6  ;;  %v1268_v35 = vmax.f32 %v1069_v53, 0.0  ;;  %v5375_v6 = vld [vmem:[%s9213_s3 + $0xd8] sm:$0xf0] }
 0x199   : > { %v1094_v21 = vpop.f32.mrf.mxu3  ;;  %2206 = vmatmul.bf16.vlgmr.msrb.gmra.mxu0 %v7675_v2  ;;  %v5378_v50 = vor.u32 %v6335_v17, %v5375_v6  ;;  %v5351_v17 = vld [vmem:[%s9213_s3 + $0xa8] sm:$0xf0] }
 0x19a   : > { %v1095_v8 = vadd.f32 %v1094_v21, %v7489_v46  ;;  %2235 = vmatmul.bf16.vlgmr.msrb.gmra.mxu1 %v7678_v31  ;;  %v1238_v21 = vmax.f32 %v1117_v1, 0.0 }
 0x19b   : > { %v1145_v41 = vpop.f32.mrf.mxu1  ;;  %2345 = vmatpush.bf16.msra.mxu1 %v5378_v50  ;;  %2317 = vmatpush.bf16.msra.mxu0 %v5306_v62  ;;  %v5282_v62 = vor.u32 %v6311_v12, %v5279_v38  ;;  %v5439_v12 = vld [vmem:[%s9213_s3 + $0x158] sm:$0xf0] }
 0x19c   : > { %v1261_v9 = vmax.f32 %v1095_v8, 0.0  ;;  %v1146_v52 = vadd.f32 %v1145_v41, %v7434_v15  ;;  %v6333_v8 = vld [vmem:[%s9213_s3 + $0xc4] sm:$0xf] }
 0x19d   : > { %v1070_v24 = vpop.f32.mrf.mxu2  ;;  %v1118_v45 = vpop.f32.mrf.mxu0  ;;  %v5370_v41 = vor.u32 %v6333_v8, %v5367_v3  ;;  %v6327_v8 = vld [vmem:[%s9213_s3 + $0x94] sm:$0xf]  ;;  %v5343_v3 = vld [vmem:[%s9213_s3 + $0x98] sm:$0xf0] }
 0x19e   : > { %v1071_v0 = vadd.f32 %v1070_v24, %v7566_v23  ;;  %v7715_v13 = vpack.c.bf16 %v1261_v9, %v1253_v49  ;;  %v1119_v60 = vadd.f32 %v1118_v45, %v7452_v14  ;;  %v1239_v20 = vmax.f32 %v1146_v52, 0.0  ;;  %v6315_v9 = vld [vmem:[%s9213_s3 + $0x34] sm:$0xf] }
 0x19f   : > { %2346 = vmatpush.bf16.msra.mxu1 %v5370_v41  ;;  %v5298_v24 = vor.u32 %v6315_v9, %v5295_v55  ;;  %v6331_v45 = vld [vmem:[%s9213_s3 + $0xb4] sm:$0xf]  ;;  %v5346_v41 = vor.u32 %v6327_v8, %v5343_v3 }
 0x1a0   : > { %v1276_v22 = vmax.f32 %v1071_v0, 0.0  ;;  %2187 = vmatmul.bf16.gmra.mxu3 %v7715_v13  ;;  %v1246_v48 = vmax.f32 %v1119_v60, 0.0  ;;  %v5362_v5 = vor.u32 %v6331_v45, %v5359_v57  ;;  %v6309_v45 = vld [vmem:[%s9213_s3 + $0x4] sm:$0xf]  ;;  %v5271_v57 = vld [vmem:[%s9213_s3 + $0x8] sm:$0xf0] }
 0x1a1   : > { %v1097_v11 = vpop.f32.mrf.mxu3  ;;  %2318 = vmatpush.bf16.msra.mxu0 %v5298_v24 }
 0x1a2   : > { %v7733_v4 = vpack.c.bf16 %v1276_v22, %v1268_v35  ;;  %v7749_v43 = vpack.c.bf16 %v1246_v48, %v1238_v21  ;;  %v1098_v49 = vadd.f32 %v1097_v11, %v7568_v28  ;;  %v6313_v22 = vld [vmem:[%s9213_s3 + $0x24] sm:$0xf]  ;;  %v5354_v48 = vor.u32 %v6329_v16, %v5351_v17 }
 0x1a3   : > { %v1147_v30 = vpop.f32.mrf.mxu1  ;;  %2347 = vmatpush.bf16.msra.mxu1 %v5362_v5  ;;  %v5290_v11 = vor.u32 %v6313_v22, %v5287_v61 }
 0x1a4   : > { %v1148_v10 = vadd.f32 %v1147_v30, %v7452_v14  ;;  %2163 = vmatmul.bf16.gmra.mxu2 %v7733_v4  ;;  %v1269_v60 = vmax.f32 %v1098_v49, 0.0  ;;  %v5455_v49 = vld [vmem:[%s9213_s3 + $0x178] sm:$0xf0] }
 0x1a5   : > { %v1169_v18 = vpop.f32.mrf.mxu2  ;;  %v1121_v51 = vpop.f32.mrf.mxu0  ;;  %2319 = vmatpush.bf16.msra.mxu0 %v5290_v11  ;;  %v5447_v11 = vld [vmem:[%s9213_s3 + $0x168] sm:$0xf0] }
 0x1a6   : > { %v1247_v39 = vmax.f32 %v1148_v10, 0.0  ;;  %v1170_v34 = vadd.f32 %v1169_v18, %v7356_v25  ;;  %v1122_v21 = vadd.f32 %v1121_v51, %v7503_v47  ;;  %v6355_v51 = vld [vmem:[%s9213_s3 + $0x174] sm:$0xf] }
 0x1a7   : > { %2348 = vmatpush.bf16.msra.mxu1 %v5354_v48 }
 0x1a8   : > { %v7752_v53 = vpack.c.bf16 %v1247_v39, %v1239_v20  ;;  %v1224_v30 = vmax.f32 %v1170_v34, 0.0  ;;  %v6325_v34 = vld [vmem:[%s9213_s3 + $0x84] sm:$0xf] }
 0x1a9   : > { %v1099_v56 = vpop.f32.mrf.mxu3  ;;  %2211 = vmatmul.bf16.gmra.mxu0 %v7749_v43 }
 0x1aa   : > { %v1100_v58 = vadd.f32 %v1099_v56, %v7566_v23  ;;  %2240 = vmatmul.bf16.gmra.mxu1 %v7752_v53  ;;  %2320 = vmatpush.bf16.msra.mxu0 %v5282_v62  ;;  %v5458_v56 = vor.u32 %v6355_v51, %v5455_v49  ;;  %v5431_v51 = vld [vmem:[%s9213_s3 + $0x148] sm:$0xf0] }
 0x1ab   : > { %v1150_v0 = vpop.f32.mrf.mxu1  ;;  %2349 = vmatpush.bf16.msra.mxu1 %v5346_v41  ;;  %v6349_v41 = vld [vmem:[%s9213_s3 + $0x144] sm:$0xf] }
 0x1ac   : > { %v1277_v35 = vmax.f32 %v1100_v58, 0.0  ;;  %v1151_v20 = vadd.f32 %v1150_v0, %v7503_v47  ;;  %v1254_v58 = vmax.f32 %v1122_v21, 0.0  ;;  %2372 = vmatpush.bf16.msra.mxu2 %v5458_v56  ;;  %v5519_v56 = vld [vmem:[%s9213_s3 + $0x1f8] sm:$0xf0] }
 0x1ad   : > { %v1171_v63 = vpop.f32.mrf.mxu2  ;;  %v1123_v1 = vpop.f32.mrf.mxu0 }
 0x1ae   : > { %v1172_v6 = vadd.f32 %v1171_v63, %v7376_v37  ;;  %v7783_v52 = vpack.c.bf16 %v1277_v35, %v1269_v60  ;;  %v1124_v50 = vadd.f32 %v1123_v1, %v7489_v46  ;;  %v5274_v60 = vor.u32 %v6309_v45, %v5271_v57  ;;  %v5335_v35 = vld [vmem:[%s9213_s3 + $0x88] sm:$0xf0]  ;;  %v6353_v1 = vld [vmem:[%s9213_s3 + $0x164] sm:$0xf] }
 0x1af   : > { %v1255_v22 = vmax.f32 %v1151_v20, 0.0  ;;  %v5338_v63 = vor.u32 %v6325_v34, %v5335_v35  ;;  %v5450_v17 = vor.u32 %v6353_v1, %v5447_v11  ;;  %v6347_v35 = vld [vmem:[%s9213_s3 + $0x134] sm:$0xf]  ;;  %v5511_v11 = vld [vmem:[%s9213_s3 + $0x1e8] sm:$0xf0] }
 0x1b0   : > { %v1232_v10 = vmax.f32 %v1172_v6, 0.0  ;;  %2192 = vmatmul.bf16.gmra.mxu3 %v7783_v52  ;;  %v1262_v9 = vmax.f32 %v1124_v50, 0.0  ;;  %2321 = vmatpush.bf16.msra.mxu0 %v5274_v60 }
 0x1b1   : > { %v1198_v18 = vpop.f32.mrf.mxu3  ;;  %2350 = vmatpush.bf16.msra.mxu1 %v5338_v63  ;;  %2373 = vmatpush.bf16.msra.mxu2 %v5450_v17 }
 0x1b2   : > { %v7801_v39 = vpack.c.bf16 %v1232_v10, %v1224_v30  ;;  %v7829_v16 = vpack.c.bf16 %v1262_v9, %v1254_v58  ;;  %v1199_v6 = vadd.f32 %v1198_v18, %v7356_v25  ;;  %v6351_v10 = vld [vmem:[%s9213_s3 + $0x154] sm:$0xf]  ;;  %v5434_v9 = vor.u32 %v6349_v41, %v5431_v51 }
 0x1b3   : > { %v1152_v55 = vpop.f32.mrf.mxu1  ;;  %v5442_v38 = vor.u32 %v6351_v10, %v5439_v12 }
 0x1b4   : > { %v1153_v24 = vadd.f32 %v1152_v55, %v7489_v46  ;;  %2264 = vmatmul.bf16.vlgmr.msrb.gmra.mxu2 %v7801_v39  ;;  %v1225_v21 = vmax.f32 %v1199_v6, 0.0  ;;  %v6371_v55 = vld [vmem:[%s9213_s3 + $0x1f4] sm:$0xf] }
 0x1b5   : > { %v1174_v5 = vpop.f32.mrf.mxu2  ;;  %v1126_v0 = vpop.f32.mrf.mxu0  ;;  %2374 = vmatpush.bf16.msra.mxu2 %v5442_v38  ;;  %v5522_v57 = vor.u32 %v6371_v55, %v5519_v56  ;;  %v5415_v38 = vld [vmem:[%s9213_s3 + $0x128] sm:$0xf0]  ;;  %v5407_v55 = vld [vmem:[%s9213_s3 + $0x118] sm:$0xf0] }
 0x1b6   : > { %v1263_v61 = vmax.f32 %v1153_v24, 0.0  ;;  %v1175_v18 = vadd.f32 %v1174_v5, %v7434_v15  ;;  %v1127_v58 = vadd.f32 %v1126_v0, %v7568_v28 }
 0x1b7   : > { %2401 = vmatpush.bf16.msrb.mxu3 %v5522_v57 }
 0x1b8   : > { %v7832_v50 = vpack.c.bf16 %v1263_v61, %v1255_v22  ;;  %v1240_v24 = vmax.f32 %v1175_v18, 0.0  ;;  %v5423_v22 = vld [vmem:[%s9213_s3 + $0x138] sm:$0xf0]  ;;  %v6369_v61 = vld [vmem:[%s9213_s3 + $0x1e4] sm:$0xf] }
 0x1b9   : > { %v1200_v48 = vpop.f32.mrf.mxu3  ;;  %2216 = vmatmul.bf16.gmra.mxu0 %v7829_v16  ;;  %2375 = vmatpush.bf16.msra.mxu2 %v5434_v9  ;;  %v5426_v1 = vor.u32 %v6347_v35, %v5423_v22  ;;  %v5514_v6 = vor.u32 %v6369_v61, %v5511_v11  ;;  %v6343_v9 = vld [vmem:[%s9213_s3 + $0x114] sm:$0xf]  ;;  %v6341_v22 = vld [vmem:[%s9213_s3 + $0x104] sm:$0xf]  ;;  %v5399_v61 = vld [vmem:[%s9213_s3 + $0x108] sm:$0xf0] }
 0x1ba   : > { %v1201_v30 = vadd.f32 %v1200_v48, %v7376_v37  ;;  %2245 = vmatmul.bf16.gmra.mxu1 %v7832_v50  ;;  %v1270_v48 = vmax.f32 %v1127_v58, 0.0  ;;  %v5410_v56 = vor.u32 %v6343_v9, %v5407_v55  ;;  %v6387_v9 = vld [vmem:[%s9213_s3 + $0x274] sm:$0xf]  ;;  %v5583_v55 = vld [vmem:[%s9213_s3 + $0x278] sm:$0xf0] }
 0x1bb   : > { %v1155_v25 = vpop.f32.mrf.mxu1  ;;  %2402 = vmatpush.bf16.msrb.mxu3 %v5514_v6 }
 0x1bc   : > { %v1233_v62 = vmax.f32 %v1201_v30, 0.0  ;;  %v1156_v60 = vadd.f32 %v1155_v25, %v7568_v28  ;;  %v6345_v25 = vld [vmem:[%s9213_s3 + $0x124] sm:$0xf] }
 0x1bd   : > { %v1176_v8 = vpop.f32.mrf.mxu2  ;;  %v1128_v3 = vpop.f32.mrf.mxu0  ;;  %2376 = vmatpush.bf16.msra.mxu2 %v5426_v1  ;;  %v5418_v18 = vor.u32 %v6345_v25, %v5415_v38  ;;  %v5487_v1 = vld [vmem:[%s9213_s3 + $0x1b8] sm:$0xf0] }
 0x1be   : > { %v7844_v37 = vpack.c.bf16 %v1233_v62, %v1225_v21  ;;  %v1177_v20 = vadd.f32 %v1176_v8, %v7452_v14  ;;  %v1129_v49 = vadd.f32 %v1128_v3, %v7566_v23  ;;  %v1271_v10 = vmax.f32 %v1156_v60, 0.0  ;;  %v6367_v62 = vld [vmem:[%s9213_s3 + $0x1d4] sm:$0xf]  ;;  %v5503_v8 = vld [vmem:[%s9213_s3 + $0x1d8] sm:$0xf0] }
 0x1bf   : > { %v5506_v41 = vor.u32 %v6367_v62, %v5503_v8  ;;  %v6359_v62 = vld [vmem:[%s9213_s3 + $0x194] sm:$0xf]  ;;  %v5471_v8 = vld [vmem:[%s9213_s3 + $0x198] sm:$0xf0] }
 0x1c0   : > { %v1248_v45 = vmax.f32 %v1177_v20, 0.0  ;;  %2293 = vmatmul.bf16.vlgmr.msra.gmra.mxu3 %v7844_v37  ;;  %v1278_v0 = vmax.f32 %v1129_v49, 0.0 }
 0x1c1   : > { %v1203_v5 = vpop.f32.mrf.mxu3  ;;  %2377 = vmatpush.bf16.msra.mxu2 %v5418_v18  ;;  %2403 = vmatpush.bf16.msrb.mxu3 %v5506_v41  ;;  %v5474_v41 = vor.u32 %v6359_v62, %v5471_v8  ;;  %v5567_v62 = vld [vmem:[%s9213_s3 + $0x258] sm:$0xf0] }
 0x1c2   : > { %v7863_v34 = vpack.c.bf16 %v1248_v45, %v1240_v24  ;;  %v7885_v21 = vpack.c.bf16 %v1278_v0, %v1270_v48  ;;  %v1204_v3 = vadd.f32 %v1203_v5, %v7434_v15  ;;  %v6365_v15 = vld [vmem:[%s9213_s3 + $0x1c4] sm:$0xf]  ;;  %v6363_v0 = vld [vmem:[%s9213_s3 + $0x1b4] sm:$0xf] }
 0x1c3   : > { %v1157_v63 = vpop.f32.mrf.mxu1  ;;  %v5490_v6 = vor.u32 %v6363_v0, %v5487_v1  ;;  %v5639_v1 = vld [vmem:[%s9213_s3 + $0x2e8] sm:$0xf0] }
 0x1c4   : > { %v1158_v17 = vadd.f32 %v1157_v63, %v7566_v23  ;;  %2269 = vmatmul.bf16.gmra.mxu2 %v7863_v34  ;;  %v1241_v24 = vmax.f32 %v1204_v3, 0.0  ;;  %v5402_v63 = vor.u32 %v6341_v22, %v5399_v61 }
 0x1c5   : > { %v1179_v30 = vpop.f32.mrf.mxu2  ;;  %2378 = vmatpush.bf16.msra.mxu2 %v5410_v56  ;;  %v5586_v56 = vor.u32 %v6387_v9, %v5583_v55 }
 0x1c6   : > { %v1279_v12 = vmax.f32 %v1158_v17, 0.0  ;;  %v1180_v45 = vadd.f32 %v1179_v30, %v7503_v47 }
 0x1c7   : > { %2430 = vmatpush.bf16.msrb.mxu0 %v5586_v56  ;;  %v5559_v56 = vld [vmem:[%s9213_s3 + $0x248] sm:$0xf0] }
 0x1c8   : > { %v7894_v20 = vpack.c.bf16 %v1279_v12, %v1271_v10  ;;  %v1256_v11 = vmax.f32 %v1180_v45, 0.0  ;;  %v6361_v10 = vld [vmem:[%s9213_s3 + $0x1a4] sm:$0xf]  ;;  %v5479_v12 = vld [vmem:[%s9213_s3 + $0x1a8] sm:$0xf0] }
 0x1c9   : > { %v1205_v51 = vpop.f32.mrf.mxu3  ;;  %2221 = vmatmul.bf16.gmra.mxu0 %v7885_v21  ;;  %2379 = vmatpush.bf16.msra.mxu2 %v5402_v63  ;;  %v5482_v25 = vor.u32 %v6361_v10, %v5479_v12  ;;  %v6401_v63 = vld [vmem:[%s9213_s3 + $0x2e4] sm:$0xf] }
 0x1ca   : > { %v1206_v49 = vadd.f32 %v1205_v51, %v7452_v14  ;;  %2250 = vmatmul.bf16.gmra.mxu1 %v7894_v20  ;;  %v5495_v14 = vld [vmem:[%s9213_s3 + $0x1c8] sm:$0xf0] }
 0x1cb   : > { %v5498_v58 = vor.u32 %v6365_v15, %v5495_v14  ;;  %v6403_v14 = vld [vmem:[%s9213_s3 + $0x2f4] sm:$0xf] }
 0x1cc   : > { %v1249_v57 = vmax.f32 %v1206_v49, 0.0 }
 0x1cd   : > { %v1181_v5 = vpop.f32.mrf.mxu2  ;;  %2404 = vmatpush.bf16.msrb.mxu3 %v5498_v58 }
 0x1ce   : > { %v1182_v60 = vadd.f32 %v1181_v5, %v7489_v46  ;;  %v7913_v35 = vpack.c.bf16 %v1249_v57, %v1241_v24  ;;  %v6357_v57 = vld [vmem:[%s9213_s3 + $0x184] sm:$0xf] }
 0x1d0   : > { %v1264_v17 = vmax.f32 %v1182_v60, 0.0  ;;  %2298 = vmatmul.bf16.gmra.mxu3 %v7913_v35 }
 0x1d1   : > { %v1208_v48 = vpop.f32.mrf.mxu3  ;;  %2405 = vmatpush.bf16.msrb.mxu3 %v5490_v6 }
 0x1d2   : > { %v7928_v30 = vpack.c.bf16 %v1264_v17, %v1256_v11  ;;  %v1209_v51 = vadd.f32 %v1208_v48, %v7503_v47  ;;  %v5647_v47 = vld [vmem:[%s9213_s3 + $0x2f8] sm:$0xf0]  ;;  %v5642_v48 = vor.u32 %v6401_v63, %v5639_v1 }
 0x1d3   : > { %v5650_v45 = vor.u32 %v6403_v14, %v5647_v47  ;;  %v6397_v47 = vld [vmem:[%s9213_s3 + $0x2c4] sm:$0xf] }
 0x1d4   : > { %2274 = vmatmul.bf16.gmra.mxu2 %v7928_v30  ;;  %v1257_v5 = vmax.f32 %v1209_v51, 0.0  ;;  %v5631_v51 = vld [vmem:[%s9213_s3 + $0x2d8] sm:$0xf0] }
 0x1d5   : > { %v1184_v38 = vpop.f32.mrf.mxu2  ;;  %v2091_v18 = vpop.f32.mrf.mxu0  ;;  %2406 = vmatpush.bf16.msrb.mxu3 %v5482_v25  ;;  %2459 = vmatpush.bf16.msrb.mxu1 %v5650_v45 }
 0x1d6   : > { %v2120_v3 = vpop.f32.mrf.mxu1  ;;  %v1185_v60 = vadd.f32 %v1184_v38, %v7568_v28 }
 0x1d7   : > { %v7944_v49 = vadd.f32 %v2120_v3, %v2091_v18  ;;  %v6383_v18 = vld [vmem:[%s9213_s3 + $0x254] sm:$0xf] }
 0x1d8   : > { %v1272_v12 = vmax.f32 %v1185_v60, 0.0  ;;  %v5570_v3 = vor.u32 %v6383_v18, %v5567_v62  ;;  %v6379_v60 = vld [vmem:[%s9213_s3 + $0x234] sm:$0xf] }
 0x1d9   : > { %v1210_v15 = vpop.f32.mrf.mxu3  ;;  %2322 = vmatmul.bf16.vlgmr.msra.gmra.mxu0 %v7394_v40  ;;  %v5463_v40 = vld [vmem:[%s9213_s3 + $0x188] sm:$0xf0]  ;;  %2407 = vmatpush.bf16.msrb.mxu3 %v5474_v41  ;;  %v6399_v41 = vld [vmem:[%s9213_s3 + $0x2d4] sm:$0xf] }
 0x1da   : > { %v1211_v24 = vadd.f32 %v1210_v15, %v7489_v46  ;;  %2351 = vmatmul.bf16.vlgmr.msra.gmra.mxu1 %v7396_v19  ;;  %v5466_v58 = vor.u32 %v6357_v57, %v5463_v40  ;;  %v6385_v19 = vld [vmem:[%s9213_s3 + $0x264] sm:$0xf]  ;;  %v5575_v46 = vld [vmem:[%s9213_s3 + $0x268] sm:$0xf0]  ;;  %v5634_v55 = vor.u32 %v6399_v41, %v5631_v51  ;;  %v6391_v41 = vld [vmem:[%s9213_s3 + $0x294] sm:$0xf] }
 0x1db   : > { %v5578_v0 = vor.u32 %v6385_v19, %v5575_v46  ;;  %2460 = vmatpush.bf16.msrb.mxu1 %v5642_v48  ;;  %v6381_v15 = vld [vmem:[%s9213_s3 + $0x244] sm:$0xf]  ;;  %v6395_v19 = vld [vmem:[%s9213_s3 + $0x2b4] sm:$0xf] }
 0x1dc   : > { %v1265_v22 = vmax.f32 %v1211_v24, 0.0  ;;  %v5562_v14 = vor.u32 %v6381_v15, %v5559_v56  ;;  %v5623_v24 = vld [vmem:[%s9213_s3 + $0x2c8] sm:$0xf0]  ;;  %v6419_v56 = vld [vmem:[%s9213_s3 + $0x374] sm:$0xf] }
 0x1dd   : > { %v1186_v61 = vpop.f32.mrf.mxu2  ;;  %v2093_v17 = vpop.f32.mrf.mxu0  ;;  %2408 = vmatpush.bf16.msrb.mxu3 %v5466_v58  ;;  %2431 = vmatpush.bf16.msrb.mxu0 %v5578_v0  ;;  %v5626_v57 = vor.u32 %v6397_v47, %v5623_v24  ;;  %v6373_v24 = vld [vmem:[%s9213_s3 + $0x204] sm:$0xf] }
 0x1de   : > { %v1187_v11 = vadd.f32 %v1186_v61, %v7566_v23  ;;  %v7981_v6 = vpack.c.bf16 %v1265_v22, %v1257_v5  ;;  %v2122_v10 = vpop.f32.mrf.mxu1  ;;  %v5551_v22 = vld [vmem:[%s9213_s3 + $0x238] sm:$0xf0] }
 0x1df   : > { %v7983_v38 = vadd.f32 %v2122_v10, %v2093_v17  ;;  %2461 = vmatpush.bf16.msrb.mxu1 %v5634_v55  ;;  %v5554_v61 = vor.u32 %v6379_v60, %v5551_v22  ;;  %v6377_v17 = vld [vmem:[%s9213_s3 + $0x224] sm:$0xf]  ;;  %v5599_v55 = vld [vmem:[%s9213_s3 + $0x298] sm:$0xf0] }
 0x1e0   : > { %v1280_v25 = vmax.f32 %v1187_v11, 0.0  ;;  %2303 = vmatmul.bf16.gmra.mxu3 %v7981_v6  ;;  %v5602_v15 = vor.u32 %v6391_v41, %v5599_v55  ;;  %v6417_v22 = vld [vmem:[%s9213_s3 + $0x364] sm:$0xf]  ;;  %v5679_v41 = vld [vmem:[%s9213_s3 + $0x338] sm:$0xf0] }
 0x1e1   : > { %v1213_v8 = vpop.f32.mrf.mxu3  ;;  %2432 = vmatpush.bf16.msrb.mxu0 %v5570_v3  ;;  %v5535_v3 = vld [vmem:[%s9213_s3 + $0x218] sm:$0xf0] }
 0x1e2   : > { %v7998_v9 = vpack.c.bf16 %v1280_v25, %v1272_v12  ;;  %v1214_v58 = vadd.f32 %v1213_v8, %v7568_v28  ;;  %v5615_v28 = vld [vmem:[%s9213_s3 + $0x2b8] sm:$0xf0]  ;;  %v6375_v8 = vld [vmem:[%s9213_s3 + $0x214] sm:$0xf] }
 0x1e3   : > { %2462 = vmatpush.bf16.msrb.mxu1 %v5626_v57  ;;  %v5618_v63 = vor.u32 %v6395_v19, %v5615_v28  ;;  %v5538_v51 = vor.u32 %v6375_v8, %v5535_v3  ;;  %v6389_v57 = vld [vmem:[%s9213_s3 + $0x284] sm:$0xf]  ;;  %v5703_v19 = vld [vmem:[%s9213_s3 + $0x368] sm:$0xf0]  ;;  %v6411_v3 = vld [vmem:[%s9213_s3 + $0x334] sm:$0xf] }
 0x1e4   : > { %2279 = vmatmul.bf16.gmra.mxu2 %v7998_v9  ;;  %v1273_v1 = vmax.f32 %v1214_v58, 0.0  ;;  %v5591_v58 = vld [vmem:[%s9213_s3 + $0x288] sm:$0xf0]  ;;  %v5706_v28 = vor.u32 %v6417_v22, %v5703_v19  ;;  %v6407_v19 = vld [vmem:[%s9213_s3 + $0x314] sm:$0xf] }
 0x1e5   : > { %2433 = vmatpush.bf16.msrb.mxu0 %v5562_v14  ;;  %v5711_v14 = vld [vmem:[%s9213_s3 + $0x378] sm:$0xf0]  ;;  %v5594_v60 = vor.u32 %v6389_v57, %v5591_v58 }
 0x1e6   : > { %v2096_v45 = vpop.f32.mrf.mxu0  ;;  %v5714_v47 = vor.u32 %v6419_v56, %v5711_v14 }
 0x1e7   : > { %v2125_v40 = vpop.f32.mrf.mxu1  ;;  %2463 = vmatpush.bf16.msrb.mxu1 %v5618_v63 }
 0x1e8   : > { %v8014_v5 = vadd.f32 %v2125_v40, %v2096_v45  ;;  %v5527_v45 = vld [vmem:[%s9213_s3 + $0x208] sm:$0xf0]  ;;  %2488 = vmatpush.bf16.msrb.mxu2 %v5714_v47  ;;  %v6409_v47 = vld [vmem:[%s9213_s3 + $0x324] sm:$0xf] }
 0x1e9   : > { %v1215_v46 = vpop.f32.mrf.mxu3  ;;  %2327 = vmatmul.bf16.gmra.mxu0 %v7468_v36  ;;  %v5543_v36 = vld [vmem:[%s9213_s3 + $0x228] sm:$0xf0]  ;;  %v5530_v40 = vor.u32 %v6373_v24, %v5527_v45  ;;  %v6431_v45 = vld [vmem:[%s9213_s3 + $0x3d4] sm:$0xf] }
 0x1ea   : > { %v1216_v0 = vadd.f32 %v1215_v46, %v7566_v23  ;;  %2356 = vmatmul.bf16.gmra.mxu1 %v7470_v32  ;;  %2434 = vmatpush.bf16.msrb.mxu0 %v5554_v61  ;;  %v5546_v48 = vor.u32 %v6377_v17, %v5543_v36  ;;  %v6393_v23 = vld [vmem:[%s9213_s3 + $0x2a4] sm:$0xf]  ;;  %v5607_v32 = vld [vmem:[%s9213_s3 + $0x2a8] sm:$0xf0] }
 0x1eb   : > { %v5610_v25 = vor.u32 %v6393_v23, %v5607_v32  ;;  %v5671_v24 = vld [vmem:[%s9213_s3 + $0x328] sm:$0xf0] }
 0x1ec   : > { %v1281_v11 = vmax.f32 %v1216_v0, 0.0  ;;  %2489 = vmatpush.bf16.msrb.mxu2 %v5706_v28  ;;  %v5674_v58 = vor.u32 %v6409_v47, %v5671_v24 }
 0x1ed   : > { %2464 = vmatpush.bf16.msrb.mxu1 %v5610_v25 }
 0x1ee   : > { %v2098_v10 = vpop.f32.mrf.mxu0  ;;  %v8043_v12 = vpack.c.bf16 %v1281_v11, %v1273_v1  ;;  %2435 = vmatpush.bf16.msrb.mxu0 %v5546_v48  ;;  %v6415_v1 = vld [vmem:[%s9213_s3 + $0x354] sm:$0xf]  ;;  %v5695_v11 = vld [vmem:[%s9213_s3 + $0x358] sm:$0xf0] }
 0x1ef   : > { %v2127_v18 = vpop.f32.mrf.mxu1  ;;  %v5698_v17 = vor.u32 %v6415_v1, %v5695_v11  ;;  %v6405_v11 = vld [vmem:[%s9213_s3 + $0x304] sm:$0xf] }
 0x1f0   : > { %v8045_v62 = vadd.f32 %v2127_v18, %v2098_v10  ;;  %2308 = vmatmul.bf16.gmra.mxu3 %v8043_v12  ;;  %v5775_v10 = vld [vmem:[%s9213_s3 + $0x3f8] sm:$0xf0] }
 0x1f1   : > { %2465 = vmatpush.bf16.msrb.mxu1 %v5602_v15  ;;  %2490 = vmatpush.bf16.msrb.mxu2 %v5698_v17  ;;  %v5682_v15 = vor.u32 %v6411_v3, %v5679_v41  ;;  %v5655_v17 = vld [vmem:[%s9213_s3 + $0x308] sm:$0xf0] }
 0x1f2   : > { %2436 = vmatpush.bf16.msrb.mxu0 %v5538_v51  ;;  %v6433_v51 = vld [vmem:[%s9213_s3 + $0x3e4] sm:$0xf] }
 0x1f4   : > { %2380 = vmatmul.bf16.vlgmr.msra.gmra.mxu2 %v7523_v33 }
 0x1f5   : > { %2466 = vmatpush.bf16.msrb.mxu1 %v5594_v60 }
 0x1f6   : > { %v2101_v33 = vpop.f32.mrf.mxu0  ;;  %2437 = vmatpush.bf16.msrb.mxu0 %v5530_v40 }
 0x1f7   : > { %v2130_v46 = vpop.f32.mrf.mxu1  ;;  %v2149_v61 = vpop.f32.mrf.mxu2 }
 0x1f8   : > { %v8085_v0 = vadd.f32 %v2130_v46, %v2101_v33  ;;  %v2150_v63 = vadd.f32 %v2149_v61, %v7944_v49  ;;  %v6413_v49 = vld [vmem:[%s9213_s3 + $0x344] sm:$0xf]  ;;  %v5663_v46 = vld [vmem:[%s9213_s3 + $0x318] sm:$0xf0] }
 0x1f9   : > { %2332 = vmatmul.bf16.gmra.mxu0 %v7551_v27  ;;  %v5687_v27 = vld [vmem:[%s9213_s3 + $0x348] sm:$0xf0]  ;;  %v6429_v61 = vld [vmem:[%s9213_s3 + $0x3c4] sm:$0xf]  ;;  %v5666_v28 = vor.u32 %v6407_v19, %v5663_v46 }
 0x1fa   : > { %2361 = vmatmul.bf16.gmra.mxu1 %v7554_v7  ;;  %v6435_v7 = vld [vmem:[%s9213_s3 + $0x3f4] sm:$0xf]  ;;  %v5690_v32 = vor.u32 %v6413_v49, %v5687_v27 }
 0x1fb   : > { %v5778_v8 = vor.u32 %v6435_v7, %v5775_v10  ;;  %v5658_v7 = vor.u32 %v6405_v11, %v5655_v17 }
 0x1fc   : > { %2491 = vmatpush.bf16.msrb.mxu2 %v5690_v32 }
 0x1fd   : > { %2517 = vmatpush.bf16.msra.mxu3 %v5778_v8  ;;  %v5735_v8 = vld [vmem:[%s9213_s3 + $0x3a8] sm:$0xf0] }
 0x1fe   : > { %v2103_v36 = vpop.f32.mrf.mxu0 }
 0x1ff   : > { %v2132_v48 = vpop.f32.mrf.mxu1  ;;  %v2151_v23 = vpop.f32.mrf.mxu2 }
 0x200   : > { %v8108_v25 = vadd.f32 %v2132_v48, %v2103_v36  ;;  %v2152_v18 = vadd.f32 %v2151_v23, %v7983_v38  ;;  %2409 = vmatmul.bf16.vlgmr.msrb.gmra.mxu3 %v7570_v42  ;;  %v5767_v42 = vld [vmem:[%s9213_s3 + $0x3e8] sm:$0xf0]  ;;  %2492 = vmatpush.bf16.msrb.mxu2 %v5682_v15  ;;  %v6427_v36 = vld [vmem:[%s9213_s3 + $0x3b4] sm:$0xf]  ;;  %v5743_v48 = vld [vmem:[%s9213_s3 + $0x3b8] sm:$0xf0] }
 0x201   : > { %v5770_v56 = vor.u32 %v6433_v51, %v5767_v42  ;;  %v5746_v10 = vor.u32 %v6427_v36, %v5743_v48 }
 0x203   : > { %v2178_v55 = vpop.f32.mrf.mxu3  ;;  %2518 = vmatpush.bf16.msra.mxu3 %v5770_v56 }
 0x204   : > { %v2179_v38 = vadd.f32 %v2178_v55, %v2150_v63  ;;  %2385 = vmatmul.bf16.gmra.mxu2 %v7591_v59  ;;  %v5759_v59 = vld [vmem:[%s9213_s3 + $0x3d8] sm:$0xf0] }
 0x205   : > { %v5762_v22 = vor.u32 %v6431_v45, %v5759_v59  ;;  %2493 = vmatpush.bf16.msrb.mxu2 %v5674_v58  ;;  %v5719_v45 = vld [vmem:[%s9213_s3 + $0x388] sm:$0xf0] }
 0x206   : > { %v2106_v14 = vpop.f32.mrf.mxu0 }
 0x207   : > { %v2135_v57 = vpop.f32.mrf.mxu1  ;;  %v2154_v40 = vpop.f32.mrf.mxu2  ;;  %2519 = vmatpush.bf16.msra.mxu3 %v5762_v22 }
 0x208   : > { %v8137_v33 = vadd.f32 %v2135_v57, %v2106_v14  ;;  %v2155_v60 = vadd.f32 %v2154_v40, %v8014_v5 }
 0x209   : > { %2337 = vmatmul.bf16.gmra.mxu0 %v7613_v44  ;;  %v5751_v44 = vld [vmem:[%s9213_s3 + $0x3c8] sm:$0xf0]  ;;  %2494 = vmatpush.bf16.msrb.mxu2 %v5666_v28 }
 0x20a   : > { %2366 = vmatmul.bf16.gmra.mxu1 %v7622_v26  ;;  %v5754_v63 = vor.u32 %v6429_v61, %v5751_v44 }
 0x20b   : > { %v2180_v5 = vpop.f32.mrf.mxu3 }
 0x20c   : > { %v8154_v26 = vadd.f32 %v2180_v5, %v2152_v18  ;;  %2520 = vmatpush.bf16.msra.mxu3 %v5754_v63  ;;  %v6425_v18 = vld [vmem:[%s9213_s3 + $0x3a4] sm:$0xf] }
 0x20d   : > { %2495 = vmatpush.bf16.msrb.mxu2 %v5658_v7  ;;  %v5738_v41 = vor.u32 %v6425_v18, %v5735_v8 }
 0x20e   : > { %v2108_v1 = vpop.f32.mrf.mxu0 }
 0x20f   : > { %v2137_v49 = vpop.f32.mrf.mxu1  ;;  %v2156_v27 = vpop.f32.mrf.mxu2 }
 0x210   : > { %v2138_v23 = vadd.f32 %v2137_v49, %v2108_v1  ;;  %v2157_v32 = vadd.f32 %v2156_v27, %v8045_v62  ;;  %2414 = vmatmul.bf16.gmra.mxu3 %v7641_v54  ;;  %v6423_v54 = vld [vmem:[%s9213_s3 + $0x394] sm:$0xf]  ;;  %v5727_v62 = vld [vmem:[%s9213_s3 + $0x398] sm:$0xf0] }
 0x211   : > { %2521 = vmatpush.bf16.msra.mxu3 %v5746_v10  ;;  %v5730_v14 = vor.u32 %v6423_v54, %v5727_v62 }
 0x213   : > { %v2183_v3 = vpop.f32.mrf.mxu3 }
 0x214   : > { %v2184_v51 = vadd.f32 %v2183_v3, %v2155_v60  ;;  %2390 = vmatmul.bf16.gmra.mxu2 %v7659_v29  ;;  %v6421_v29 = vld [vmem:[%s9213_s3 + $0x384] sm:$0xf] }
 0x215   : > { %2522 = vmatpush.bf16.msra.mxu3 %v5738_v41 }
 0x216   : > { %v2207_v55 = vpop.f32.mrf.mxu0 }
 0x217   : > { %v2159_v15 = vpop.f32.mrf.mxu2  ;;  %v2208_v42 = vadd.f32 %v2207_v55, %v2179_v38  ;;  %v2236_v56 = vpop.f32.mrf.mxu1  ;;  %v5722_v38 = vor.u32 %v6421_v29, %v5719_v45 }
 0x218   : > { %v2160_v47 = vadd.f32 %v2159_v15, %v8085_v0 }
 0x219   : > { %v2237_v24 = vadd.f32 %v2236_v56, %v2208_v42  ;;  %2438 = vmatmul.bf16.vlgmr.msrb.gmra.mxu0 %v7675_v2  ;;  %2523 = vmatpush.bf16.msra.mxu3 %v5730_v14 }
 0x21a   : > { %2467 = vmatmul.bf16.vlgmr.msrb.gmra.mxu1 %v7678_v31 }
 0x21b   : > { %v2185_v57 = vpop.f32.mrf.mxu3 }
 0x21c   : > { %v8192_v40 = vadd.f32 %v2185_v57, %v2157_v32 }
 0x21d   : > { %2524 = vmatpush.bf16.msra.mxu3 %v5722_v38 }
 0x21e   : > { %v8194_v58 = vpop.f32.mrf.mxu0 }
 0x21f   : > { %v2161_v0 = vpop.f32.mrf.mxu2  ;;  %v8196_v2 = vpop.f32.mrf.mxu1 }
 0x220   : > { %v2162_v31 = vadd.f32 %v2161_v0, %v8108_v25  ;;  %2419 = vmatmul.bf16.gmra.mxu3 %v7715_v13 }
 0x223   : > { %v2188_v59 = vpop.f32.mrf.mxu3 }
 0x224   : > { %v2189_v60 = vadd.f32 %v2188_v59, %v2160_v47  ;;  %2395 = vmatmul.bf16.gmra.mxu2 %v7733_v4 }
 0x226   : > { %v2212_v22 = vpop.f32.mrf.mxu0 }
 0x227   : > { %v2164_v19 = vpop.f32.mrf.mxu2  ;;  %v2213_v46 = vadd.f32 %v2212_v22, %v2184_v51  ;;  %v2241_v61 = vpop.f32.mrf.mxu1 }
 0x228   : > { %v2165_v5 = vadd.f32 %v2164_v19, %v8137_v33 }
 0x229   : > { %v2242_v28 = vadd.f32 %v2241_v61, %v2213_v46  ;;  %2443 = vmatmul.bf16.gmra.mxu0 %v7749_v43 }
 0x22a   : > { %2472 = vmatmul.bf16.gmra.mxu1 %v7752_v53 }
 0x22b   : > { %v2190_v44 = vpop.f32.mrf.mxu3 }
 0x22c   : > { %v8204_v63 = vadd.f32 %v2190_v44, %v2162_v31 }
 0x22e   : > { %v8206_v25 = vpop.f32.mrf.mxu0 }
 0x22f   : > { %v2166_v13 = vpop.f32.mrf.mxu2  ;;  %v8208_v1 = vpop.f32.mrf.mxu1 }
 0x230   : > { %v2167_v4 = vadd.f32 %v2166_v13, %v2138_v23  ;;  %2424 = vmatmul.bf16.gmra.mxu3 %v7783_v52 }
 0x233   : > { %v2193_v11 = vpop.f32.mrf.mxu3 }
 0x234   : > { %v2194_v17 = vadd.f32 %v2193_v11, %v2165_v5  ;;  %2496 = vmatmul.bf16.vlgmr.msrb.gmra.mxu2 %v7801_v39 }
 0x236   : > { %v2217_v33 = vpop.f32.mrf.mxu0 }
 0x237   : > { %v2218_v36 = vadd.f32 %v2217_v33, %v2189_v60  ;;  %v2246_v43 = vpop.f32.mrf.mxu1  ;;  %v2265_v49 = vpop.f32.mrf.mxu2 }
 0x238   : > { %v2266_v53 = vadd.f32 %v2265_v49, %v2237_v24 }
 0x239   : > { %v2247_v27 = vadd.f32 %v2246_v43, %v2218_v36  ;;  %2448 = vmatmul.bf16.gmra.mxu0 %v7829_v16 }
 0x23a   : > { %2477 = vmatmul.bf16.gmra.mxu1 %v7832_v50 }
 0x23b   : > { %v2195_v7 = vpop.f32.mrf.mxu3 }
 0x23c   : > { %v8214_v48 = vadd.f32 %v2195_v7, %v2167_v4 }
 0x23e   : > { %9236 = vst [vmem:[#allocation10_spill] sm:$0xff] %v8214_v48  ;;  %v8216_v23 = vpop.f32.mrf.mxu0 }
 0x23f   : > { %v8218_v52 = vpop.f32.mrf.mxu1  ;;  %v8220_v32 = vpop.f32.mrf.mxu2 }
 0x240   : > { %2525 = vmatmul.bf16.vlgmr.msra.gmra.mxu3 %v7844_v37 }
 0x243   : > { %v2294_v39 = vpop.f32.mrf.mxu3 }
 0x244   : > { %v8223_v10 = vadd.f32 %v2294_v39, %v2266_v53  ;;  %2501 = vmatmul.bf16.gmra.mxu2 %v7863_v34 }
 0x246   : > { %v2222_v18 = vpop.f32.mrf.mxu0 }
 0x247   : > { %v2223_v16 = vadd.f32 %v2222_v18, %v2194_v17  ;;  %v2270_v8 = vpop.f32.mrf.mxu2  ;;  %v2251_v50 = vpop.f32.mrf.mxu1 }
 0x248   : > { %v2271_v3 = vadd.f32 %v2270_v8, %v2242_v28 }
 0x249   : > { %v2252_v41 = vadd.f32 %v2251_v50, %v2223_v16  ;;  %2453 = vmatmul.bf16.gmra.mxu0 %v7885_v21 }
 0x24a   : > { %2482 = vmatmul.bf16.gmra.mxu1 %v7894_v20 }
 0x24b   : > { %v8228_v51 = vpop.f32.mrf.mxu3 }
 0x24e   : > { %v8233_v37 = vpop.f32.mrf.mxu0 }
 0x24f   : > { %v8230_v55 = vpop.f32.mrf.mxu2  ;;  %9237 = vst [vmem:[#allocation11_spill] sm:$0xff] %v8233_v37  ;;  %v8238_v62 = vpop.f32.mrf.mxu1 }
 0x250   : > { %2530 = vmatmul.bf16.gmra.mxu3 %v7913_v35  ;;  %9238 = vst [vmem:[#allocation12_spill] sm:$0xff] %v8238_v62 }
 0x253   : > { %v2299_v54 = vpop.f32.mrf.mxu3 }
 0x254   : > { %v8235_v34 = vadd.f32 %v2299_v54, %v2271_v3  ;;  %2506 = vmatmul.bf16.gmra.mxu2 %v7928_v30 }
 0x256   : > { %v2323_v21 = vpop.f32.mrf.mxu0 }
 0x257   : > { %v2275_v15 = vpop.f32.mrf.mxu2  ;;  %v2352_v14 = vpop.f32.mrf.mxu1 }
 0x258   : > { %v2276_v42 = vadd.f32 %v2275_v15, %v2247_v27  ;;  %v2353_v15 = vadd.f32 %v2352_v14, %v2323_v21 }
 0x25b   : > { %v8240_v56 = vpop.f32.mrf.mxu3 }
 0x25e   : > { %v2325_v24 = vpop.f32.mrf.mxu0 }
 0x25f   : > { %v8242_v20 = vpop.f32.mrf.mxu2  ;;  %v2354_v45 = vpop.f32.mrf.mxu1 }
 0x260   : > { %2535 = vmatmul.bf16.gmra.mxu3 %v7981_v6 }
 0x263   : > { %v2304_v35 = vpop.f32.mrf.mxu3 }
 0x264   : > { %v8245_v47 = vadd.f32 %v2304_v35, %v2276_v42  ;;  %2511 = vmatmul.bf16.gmra.mxu2 %v7998_v9 }
 0x266   : > { %v2328_v38 = vpop.f32.mrf.mxu0 }
 0x267   : > { %v2280_v29 = vpop.f32.mrf.mxu2  ;;  %v2357_v59 = vpop.f32.mrf.mxu1 }
 0x268   : > { %v2281_v30 = vadd.f32 %v2280_v29, %v2252_v41 }
 0x26b   : > { %v8248_v57 = vpop.f32.mrf.mxu3 }
 0x26c   : > { %9239 = vst [vmem:[#allocation13_spill] sm:$0xff] %v8248_v57  ;;  %v2210_v57 = vadd.f32 %v8194_v58, %v8154_v26 }
 0x26e   : > { %v8255_v22 = vpop.f32.mrf.mxu0 }
 0x26f   : > { %v8250_v0 = vpop.f32.mrf.mxu2  ;;  %v2359_v9 = vpop.f32.mrf.mxu1 }
 0x270   : > { %9240 = vst [vmem:[#allocation14_spill] sm:$0xff] %v8250_v0  ;;  %2540 = vmatmul.bf16.gmra.mxu3 %v8043_v12  ;;  %v2355_v0 = vadd.f32 %v2354_v45, %v2325_v24  ;;  %v2358_v24 = vadd.f32 %v2357_v59, %v2328_v38 }
 0x273   : > { %v2309_v31 = vpop.f32.mrf.mxu3 }
 0x274   : > { %v8253_v60 = vadd.f32 %v2309_v31, %v2281_v30 }
 0x276   : > { %9241 = vst [vmem:[#allocation15_spill] sm:$0xff] %v8253_v60  ;;  %v8259_v61 = vpop.f32.mrf.mxu0 }
 0x277   : > { %v2381_v6 = vpop.f32.mrf.mxu2  ;;  %v8261_v44 = vpop.f32.mrf.mxu1 }
 0x278   : > { %v2382_v35 = vadd.f32 %v2381_v6, %v2353_v15 }
 0x27b   : > { %v8257_v19 = vpop.f32.mrf.mxu3 }
 0x27c   : > { %9242 = vst [vmem:[#allocation16_spill] sm:$0xff] %v8257_v19 }
 0x27e   : > { %v8263_v4 = vpop.f32.mrf.mxu0 }
 0x27f   : > { %v2383_v46 = vpop.f32.mrf.mxu2  ;;  %v8265_v11 = vpop.f32.mrf.mxu1 }
 0x280   : > { %v2384_v37 = vadd.f32 %v2383_v46, %v2355_v0 }
 0x283   : > { %v2410_v5 = vpop.f32.mrf.mxu3 }
 0x284   : > { %v2411_v29 = vadd.f32 %v2410_v5, %v2382_v35 }
 0x286   : > { %v8267_v33 = vpop.f32.mrf.mxu0 }
 0x287   : > { %v2386_v28 = vpop.f32.mrf.mxu2  ;;  %v8273_v49 = vpop.f32.mrf.mxu1 }
 0x28b   : > { %v2412_v13 = vpop.f32.mrf.mxu3 }
 0x28e   : > { %v8277_v27 = vpop.f32.mrf.mxu0 }
 0x28f   : > { %v2388_v12 = vpop.f32.mrf.mxu2  ;;  %9243 = vst [vmem:[#allocation17_spill] sm:$0xff] %v8277_v27  ;;  %v8281_v39 = vpop.f32.mrf.mxu1 }
 0x290   : > { %9244 = vst [vmem:[#allocation18_spill] sm:$0xff] %v8281_v39  ;;  %v2413_v39 = vadd.f32 %v2412_v13, %v2384_v37  ;;  %v2239_v37 = vadd.f32 %v8196_v2, %v2210_v57 }
 0x292   : > { %v2268_v58 = vadd.f32 %v8220_v32, %v2239_v37 }
 0x293   : > { %v2415_v17 = vpop.f32.mrf.mxu3 }
 0x296   : > { %v2439_v16 = vpop.f32.mrf.mxu0 }
 0x297   : > { %v8269_v36 = vpop.f32.mrf.mxu2  ;;  %v2468_v3 = vpop.f32.mrf.mxu1  ;;  %v2440_v19 = vadd.f32 %v2439_v16, %v2411_v29 }
 0x299   : > { %v2469_v48 = vadd.f32 %v2468_v3, %v2440_v19 }
 0x29b   : > { %v8271_v43 = vpop.f32.mrf.mxu3 }
 0x29e   : > { %v2441_v54 = vpop.f32.mrf.mxu0 }
 0x29f   : > { %v8275_v53 = vpop.f32.mrf.mxu2  ;;  %v2470_v30 = vpop.f32.mrf.mxu1  ;;  %v2442_v21 = vadd.f32 %v2441_v54, %v2413_v39  ;;  %v2297_v39 = vadd.f32 %v8228_v51, %v2268_v58 }
 0x2a1   : > { %v2471_v19 = vadd.f32 %v2470_v30, %v2442_v21 }
 0x2a3   : > { %v8279_v7 = vpop.f32.mrf.mxu3 }
 0x2a6   : > { %v2444_v62 = vpop.f32.mrf.mxu0 }
 0x2a7   : > { %v8283_v18 = vpop.f32.mrf.mxu2  ;;  %v2473_v14 = vpop.f32.mrf.mxu1 }
 0x2ab   : > { %v8285_v8 = vpop.f32.mrf.mxu3 }
 0x2ae   : > { %v2446_v26 = vpop.f32.mrf.mxu0 }
 0x2af   : > { %v8287_v50 = vpop.f32.mrf.mxu2  ;;  %v2475_v59 = vpop.f32.mrf.mxu1 }
 0x2b0   : > { %9245 = vst [vmem:[#allocation19_spill] sm:$0xff] %v8287_v50 }
 0x2b3   : > { %v8289_v41 = vpop.f32.mrf.mxu3 }
 0x2b7   : > { %v2497_v42 = vpop.f32.mrf.mxu2 }
 0x2b8   : > { %v2498_v27 = vadd.f32 %v2497_v42, %v2469_v48  ;;  %v2387_v48 = vadd.f32 %v2386_v28, %v2358_v24 }
 0x2ba   : > { %v2416_v46 = vadd.f32 %v2415_v17, %v2387_v48  ;;  %v2363_v17 = vadd.f32 %v8261_v44, %v8259_v61 }
 0x2bb   : > { %v8291_v31 = vpop.f32.mrf.mxu3 }
 0x2bc   : > { %v2445_v16 = vadd.f32 %v2444_v62, %v2416_v46  ;;  %v2449_v62 = vpop.f32.mrf.mxu0  ;;  %v2220_v46 = vadd.f32 %v8216_v23, %v8204_v63 }
 0x2be   : > { %v2474_v15 = vadd.f32 %v2473_v14, %v2445_v16 }
 0x2bf   : > { %v2499_v60 = vpop.f32.mrf.mxu2 }
 0x2c0   : > { %v2500_v13 = vadd.f32 %v2499_v60, %v2471_v19 }
 0x2c3   : > { %v2526_v50 = vpop.f32.mrf.mxu3 }
 0x2c4   : > { %v2527_v6 = vadd.f32 %v2526_v50, %v2498_v27 }
 0x2c6   : > { %v2546_v45 = vpack.c.bf16 %v2527_v6, %v8223_v10  ;;  %v2360_v10 = vadd.f32 %v2359_v9, %v8255_v22  ;;  %v2215_v22 = vadd.f32 %v8206_v25, %v8192_v40  ;;  %v2478_v6 = vpop.f32.mrf.mxu1 }
 0x2c7   : > { %v2502_v0 = vpop.f32.mrf.mxu2 }
 0x2c8   : > { %2556 = vst.msk [vmem:[#allocation3] sm:$0xff] %vm8296_vm11, %v2546_v45  ;;  %v2389_v54 = vadd.f32 %v2388_v12, %v2360_v10  ;;  %v2503_v51 = vadd.f32 %v2502_v0, %v2474_v15  ;;  %v2244_v21 = vadd.f32 %v8208_v1, %v2215_v22  ;;  %v2451_v45 = vpop.f32.mrf.mxu0  ;;  %v2365_v0 = vadd.f32 %v8265_v11, %v8263_v4  ;;  %v9250_v15 = vld [vmem:[#allocation17_spill] sm:$0xff] }
 0x2ca   : > { %v2418_v32 = vadd.f32 %v8271_v43, %v2389_v54  ;;  %v2392_v43 = vadd.f32 %v8269_v36, %v2363_v17  ;;  %v2273_v25 = vadd.f32 %v8230_v55, %v2244_v21  ;;  %v2394_v58 = vadd.f32 %v8275_v53, %v2365_v0  ;;  %v9253_v21 = vld [vmem:[#allocation10_spill] sm:$0xff] }
 0x2cb   : > { %v2528_v27 = vpop.f32.mrf.mxu3 }
 0x2cc   : > { %v2529_v38 = vadd.f32 %v2528_v27, %v2500_v13  ;;  %v2447_v9 = vadd.f32 %v2446_v26, %v2418_v32  ;;  %v2302_v44 = vadd.f32 %v8240_v56, %v2273_v25  ;;  %v2423_v56 = vadd.f32 %v8285_v8, %v2394_v58  ;;  %v9251_v32 = vld [vmem:[#allocation18_spill] sm:$0xff]  ;;  %v9255_v25 = vld [vmem:[#allocation15_spill] sm:$0xff]  ;;  %v9258_v58 = vld [vmem:[#allocation16_spill] sm:$0xff] }
 0x2cd   : > { %v2249_v8 = vadd.f32 %v8218_v52, %v2220_v46 }
 0x2ce   : > { %v2547_v50 = vpack.c.bf16 %v2529_v38, %v2297_v39  ;;  %v2476_v14 = vadd.f32 %v2475_v59, %v2447_v9  ;;  %v2480_v4 = vpop.f32.mrf.mxu1  ;;  %v2452_v13 = vadd.f32 %v2451_v45, %v2423_v56  ;;  %v2368_v39 = vadd.f32 %v8273_v49, %v8267_v33  ;;  %v9249_v33 = vld [vmem:[#allocation13_spill] sm:$0xff] }
 0x2cf   : > { %v2564_v2 = vld [vmem:[#allocation3] sm:$0xf]  ;;  %v2504_v57 = vpop.f32.mrf.mxu2  ;;  %v2278_v63 = vadd.f32 %v8242_v20, %v2249_v8 }
 0x2d0   : > { %v8307_v28 = vld [vmem:[#allocation3] sm:$0xff]  ;;  %2557 = vst.msk [vmem:[#allocation3 + $0x8] sm:$0xff] %vm8296_vm11, %v2547_v50  ;;  %v2505_v1 = vadd.f32 %v2504_v57, %v2476_v14  ;;  %v2454_v38 = vpop.f32.mrf.mxu0  ;;  %v2397_v50 = vadd.f32 %v8283_v18, %v2368_v39 }
 0x2d1   : > { %v2581_v3 = vld [vmem:[#allocation3] sm:$0xf]  ;;  %2693 = vrot.lane.b32.xlu0 %v8307_v28, %s9226_s15  ;;  %2573 = vst.msk [vmem:[#allocation4] sm:$0xf] %vm2572_vm12, %v2564_v2  ;;  %v2481_v2 = vadd.f32 %v2480_v4, %v2452_v13  ;;  %v2307_v49 = vadd.f32 %v9249_v33, %v2278_v63 }
 0x2d2   : > { %2597 = vrot.lane.b32.xlu1 %v2581_v3, %s9248_s16  ;;  %v2426_v23 = vadd.f32 %v8289_v41, %v2397_v50  ;;  %v2629_v63 = vld [vmem:[#allocation3] sm:$0xf] }
 0x2d3   : > { %v2531_v60 = vpop.f32.mrf.mxu3 }
 0x2d4   : > { %v2532_v12 = vadd.f32 %v2531_v60, %v2503_v51  ;;  %v2455_v18 = vadd.f32 %v2454_v38, %v2426_v23  ;;  %v2370_v51 = vadd.f32 %v9251_v32, %v9250_v15 }
 0x2d6   : > { %v2548_v42 = vpack.c.bf16 %v2532_v12, %v8235_v34  ;;  %v2421_v34 = vadd.f32 %v8279_v7, %v2392_v43  ;;  %v2483_v3 = vpop.f32.mrf.mxu1  ;;  %v9252_v12 = vld [vmem:[#allocation19_spill] sm:$0xff] }
 0x2d7   : > { %v2565_v35 = vld [vmem:[#allocation3 + $0x8] sm:$0xf]  ;;  %v2507_v40 = vpop.f32.mrf.mxu2  ;;  %v2399_v20 = vadd.f32 %v9252_v12, %v2370_v51  ;;  %v2484_v17 = vadd.f32 %v2483_v3, %v2455_v18 }
 0x2d8   : > { %v2582_v29 = vld [vmem:[#allocation3 + $0x8] sm:$0xf]  ;;  %2558 = vst.msk [vmem:[#allocation3 + $0x10] sm:$0xff] %vm8296_vm11, %v2548_v42  ;;  %v2450_v36 = vadd.f32 %v2449_v62, %v2421_v34  ;;  %v2456_v41 = vpop.f32.mrf.mxu0 }
 0x2d9   : > { %v8321_v30 = vld [vmem:[#allocation3 + $0x8] sm:$0xff]  ;;  %2599 = vrot.lane.b32.xlu2 %v2582_v29, %s9248_s16  ;;  %2574 = vst.msk [vmem:[#allocation4 + $0x4] sm:$0xf] %vm2572_vm12, %v2565_v35  ;;  %v2428_v42 = vadd.f32 %v8291_v31, %v2399_v20 }
 0x2da   : > { %2695 = vrot.lane.b32.xlu1 %v8321_v30, %s9226_s15  ;;  %v2479_v55 = vadd.f32 %v2478_v6, %v2450_v36  ;;  %v9254_v43 = vld [vmem:[#allocation11_spill] sm:$0xff]  ;;  %v9257_v31 = vld [vmem:[#allocation14_spill] sm:$0xff] }
 0x2db   : > { %v2533_v61 = vpop.f32.mrf.mxu3  ;;  %v2225_v14 = vadd.f32 %v9254_v43, %v9253_v21  ;;  %v2457_v6 = vadd.f32 %v2456_v41, %v2428_v42  ;;  %v2630_v3 = vld [vmem:[#allocation3 + $0x8] sm:$0xf] }
 0x2dc   : > { %v2534_v24 = vadd.f32 %v2533_v61, %v2505_v1  ;;  %v2508_v11 = vadd.f32 %v2507_v40, %v2479_v55 }
 0x2de   : > { %v2549_v37 = vpack.c.bf16 %v2534_v24, %v2302_v44  ;;  %v2485_v1 = vpop.f32.mrf.mxu1  ;;  %v9256_v24 = vld [vmem:[#allocation12_spill] sm:$0xff] }
 0x2df   : > { %v2566_v48 = vld [vmem:[#allocation3 + $0x10] sm:$0xf]  ;;  %v2509_v53 = vpop.f32.mrf.mxu2  ;;  %v2254_v45 = vadd.f32 %v9256_v24, %v2225_v14  ;;  %v2486_v0 = vadd.f32 %v2485_v1, %v2457_v6 }
 0x2e0   : > { %v2583_v19 = vld [vmem:[#allocation3 + $0x10] sm:$0xf]  ;;  %2559 = vst.msk [vmem:[#allocation3 + $0x18] sm:$0xff] %vm8296_vm11, %v2549_v37  ;;  %v2510_v52 = vadd.f32 %v2509_v53, %v2481_v2 }
 0x2e1   : > { %v8336_v26 = vld [vmem:[#allocation3 + $0x10] sm:$0xff]  ;;  %2601 = vrot.lane.b32.xlu2 %v2583_v19, %s9248_s16  ;;  %2575 = vst.msk [vmem:[#allocation4 + $0x8] sm:$0xf] %vm2572_vm12, %v2566_v48  ;;  %v2283_v37 = vadd.f32 %v9257_v31, %v2254_v45 }
 0x2e2   : > { %2697 = vrot.lane.b32.xlu0 %v8336_v26, %s9226_s15  ;;  %2827 = vrot.lane.b32.xlu1 %v8336_v26, %s6713_s22 }
 0x2e3   : > { %v2536_v7 = vpop.f32.mrf.mxu3  ;;  %v2312_v55 = vadd.f32 %v9258_v58, %v2283_v37 }
 0x2e4   : > { %v2537_v27 = vadd.f32 %v2536_v7, %v2508_v11 }
 0x2e6   : > { %v2550_v16 = vpack.c.bf16 %v2537_v27, %v8245_v47 }
 0x2e7   : > { %v2567_v10 = vld [vmem:[#allocation3 + $0x18] sm:$0xf]  ;;  %v2512_v54 = vpop.f32.mrf.mxu2 }
 0x2e8   : > { %v8353_v59 = vld [vmem:[#allocation3 + $0x18] sm:$0xff]  ;;  %2560 = vst.msk [vmem:[#allocation3 + $0x20] sm:$0xff] %vm8296_vm11, %v2550_v16  ;;  %v2513_v35 = vadd.f32 %v2512_v54, %v2484_v17 }
 0x2e9   : > { %2829 = vrot.lane.b32.xlu2 %v8353_v59, %s6713_s22  ;;  %2576 = vst.msk [vmem:[#allocation4 + $0xc] sm:$0xf] %vm2572_vm12, %v2567_v10  ;;  %v2584_v9 = vld [vmem:[#allocation3 + $0x18] sm:$0xf]  ;;  %v2631_v10 = vld [vmem:[#allocation3 + $0x10] sm:$0xf] }
 0x2ea   : > { %2957 = vrot.lane.b32.xlu0 %v8336_v26, %s6714_s24  ;;  %2699 = vrot.lane.b32.xlu1 %v8353_v59, %s9226_s15  ;;  %v2632_v50 = vld [vmem:[#allocation3 + $0x18] sm:$0xf] }
 0x2eb   : > { %v2538_v47 = vpop.f32.mrf.mxu3 }
 0x2ec   : > { %v2539_v57 = vadd.f32 %v2538_v47, %v2510_v52 }
 0x2ee   : > { %v2551_v62 = vpack.c.bf16 %v2539_v57, %v2307_v49 }
 0x2ef   : > { %v2568_v60 = vld [vmem:[#allocation3 + $0x20] sm:$0xf]  ;;  %v2514_v44 = vpop.f32.mrf.mxu2 }
 0x2f0   : > { %v8371_v22 = vld [vmem:[#allocation3 + $0x20] sm:$0xff]  ;;  %2561 = vst.msk [vmem:[#allocation3 + $0x28] sm:$0xff] %vm8296_vm11, %v2551_v62  ;;  %v2515_v48 = vadd.f32 %v2514_v44, %v2486_v0 }
 0x2f1   : > { %2701 = vrot.lane.b32.xlu2 %v8371_v22, %s9226_s15  ;;  %2577 = vst.msk [vmem:[#allocation4 + $0x10] sm:$0xf] %vm2572_vm12, %v2568_v60  ;;  %v2585_v36 = vld [vmem:[#allocation3 + $0x20] sm:$0xf] }
 0x2f2   : > { %2603 = vrot.lane.b32.xlu0 %v2584_v9, %s9248_s16  ;;  %2959 = vrot.lane.b32.xlu1 %v8353_v59, %s6714_s24  ;;  %v2633_v38 = vld [vmem:[#allocation3 + $0x20] sm:$0xf] }
 0x2f3   : > { %v2541_v29 = vpop.f32.mrf.mxu3 }
 0x2f4   : > { %v2542_v40 = vadd.f32 %v2541_v29, %v2513_v35 }
 0x2f6   : > { %v2552_v34 = vpack.c.bf16 %v2542_v40, %v9255_v25 }
 0x2f7   : > { %v2569_v61 = vld [vmem:[#allocation3 + $0x28] sm:$0xf] }
 0x2f8   : > { %2562 = vst.msk [vmem:[#allocation3 + $0x30] sm:$0xff] %vm8296_vm11, %v2552_v34  ;;  %v8397_v53 = vld [vmem:[#allocation3 + $0x28] sm:$0xff] }
 0x2f9   : > { %2961 = vrot.lane.b32.xlu2 %v8371_v22, %s6714_s24  ;;  %2578 = vst.msk [vmem:[#allocation4 + $0x14] sm:$0xf] %vm2572_vm12, %v2569_v61  ;;  %v2586_v7 = vld [vmem:[#allocation3 + $0x28] sm:$0xf] }
 0x2fa   : > { %2605 = vrot.lane.b32.xlu0 %v2585_v36, %s9248_s16  ;;  %2831 = vrot.lane.b32.xlu1 %v8371_v22, %s6713_s22  ;;  %v2634_v16 = vld [vmem:[#allocation3 + $0x28] sm:$0xf] }
 0x2fb   : > { %v2543_v19 = vpop.f32.mrf.mxu3 }
 0x2fc   : > { %v2544_v56 = vadd.f32 %v2543_v19, %v2515_v48 }
 0x2fe   : > { %v2553_v4 = vpack.c.bf16 %v2544_v56, %v2312_v55 }
 0x2ff   : > { %v2570_v11 = vld [vmem:[#allocation3 + $0x30] sm:$0xf] }
 0x300   : > { %2563 = vst.msk [vmem:[#allocation3 + $0x38] sm:$0xff] %vm8296_vm11, %v2553_v4  ;;  %v8407_v13 = vld [vmem:[#allocation3 + $0x30] sm:$0xff]  ;;  %vm4959_vm11 = vcmask 261312  }
 0x301   : > { %2833 = vrot.lane.b32.xlu2 %v8397_v53, %s6713_s22  ;;  %2579 = vst.msk [vmem:[#allocation4 + $0x18] sm:$0xf] %vm2572_vm12, %v2570_v11  ;;  %v2587_v5 = vld [vmem:[#allocation3 + $0x30] sm:$0xf] }
 0x302   : > { %2703 = vrot.lane.b32.xlu0 %v8397_v53, %s9226_s15  ;;  %2607 = vrot.lane.b32.xlu1 %v2586_v7, %s9248_s16  ;;  %v2635_v39 = vld [vmem:[#allocation3 + $0x30] sm:$0xf] }
 0x307   : > { %v2571_v46 = vld [vmem:[#allocation3 + $0x38] sm:$0xf] }
 0x308   : > { %2580 = vst.msk [vmem:[#allocation4 + $0x1c] sm:$0xf] %vm2572_vm12, %v2571_v46  ;;  %v2588_v27 = vld [vmem:[#allocation3 + $0x38] sm:$0xf] }
 0x309   : > { %2965 = vrot.lane.b32.xlu2 %v8407_v13, %s6714_s24  ;;  %v2684_v54 = vld [vmem:[#allocation3 + $0x38] sm:$0xff] }
 0x30a   : > { %2963 = vrot.lane.b32.xlu0 %v8397_v53, %s6714_s24  ;;  %2609 = vrot.lane.b32.xlu1 %v2587_v5, %s9248_s16  ;;  %v2636_v24 = vld [vmem:[#allocation3 + $0x38] sm:$0xf] }
 0x311   : > { %2611 = vrot.lane.b32.xlu2 %v2588_v27, %s9248_s16 }
 0x312   : > { %2705 = vrot.lane.b32.xlu0 %v8407_v13, %s9226_s15  ;;  %2835 = vrot.lane.b32.xlu1 %v8407_v13, %s6713_s22 }
 0x319   : > { %2823 = vrot.lane.b32.xlu2 %v8307_v28, %s6713_s22 }
 0x31a   : > { %2825 = vrot.lane.b32.xlu0 %v8321_v30, %s6713_s22  ;;  %2657 = vrot.lane.b32.xlu1 %v2635_v39, %s9259_s29 }
 0x321   : > { %2770 = vrot.lane.b32.xlu2 %v8407_v13, %s6715_s30 }
 0x322   : > { %2953 = vrot.lane.b32.xlu0 %v8307_v28, %s6714_s24  ;;  %2955 = vrot.lane.b32.xlu1 %v8321_v30, %s6714_s24 }
 0x329   : > { %2655 = vrot.lane.b32.xlu2 %v2634_v16, %s9259_s29 }
 0x32a   : > { %2900 = vrot.lane.b32.xlu0 %v8407_v13, %s6716_s25  ;;  %2653 = vrot.lane.b32.xlu1 %v2633_v38, %s9259_s29 }
 0x331   : > { %2766 = vrot.lane.b32.xlu2 %v8371_v22, %s6715_s30 }
 0x332   : > { %2768 = vrot.lane.b32.xlu0 %v8397_v53, %s6715_s30  ;;  %2649 = vrot.lane.b32.xlu1 %v2631_v10, %s9259_s29 }
 0x333   : > { %v2600_v8 = vpop.permute.xlu2 %2599 }
 0x334   : > { %2622 = vst.msk [vmem:[#allocation4 + $0x24] sm:$0xf] %vm2572_vm12, %v2600_v8 }
 0x339   : > { %2651 = vrot.lane.b32.xlu2 %v2632_v50, %s9259_s29 }
 0x33a   : > { %2896 = vrot.lane.b32.xlu0 %v8371_v22, %s6716_s25  ;;  %2898 = vrot.lane.b32.xlu1 %v8397_v53, %s6716_s25 }
 0x33b   : > { %v2602_v2 = vpop.permute.xlu2 %2601 }
 0x33c   : > { %2623 = vst.msk [vmem:[#allocation4 + $0x28] sm:$0xf] %vm2572_vm12, %v2602_v2 }
 0x341   : > { %2762 = vrot.lane.b32.xlu2 %v8336_v26, %s6715_s30 }
 0x342   : > { %2764 = vrot.lane.b32.xlu0 %v8353_v59, %s6715_s30  ;;  %2645 = vrot.lane.b32.xlu1 %v2629_v63, %s9259_s29 }
 0x343   : > { %v2830_v23 = vpop.permute.xlu2 %2829  ;;  %v2694_v52 = vpop.permute.xlu0 %2693 }
 0x344   : > { %v2842_v47 = vrot.slane %v2830_v23, 4  ;;  %v2709_v33 = vrot.slane %v2694_v52, 4  ;;  %v2598_v49 = vpop.permute.xlu1 %2597 }
 0x345   : > { %2621 = vst.msk [vmem:[#allocation4 + $0x20] sm:$0xf] %vm2572_vm12, %v2598_v49 }
 0x346   : > { %v2851_v18 = vsel %vm2847_vm13, %v2830_v23, %v2842_v47  ;;  %v2718_v57 = vsel %vm2717_vm14, %v2694_v52, %v2709_v33 }
 0x347   : > { %2867 = vst.msk [vmem:[#allocation4 + $0xac] sm:$0xf] %vm2572_vm12, %v2851_v18 }
 0x348   : > { %2734 = vst.msk [vmem:[#allocation4 + $0x60] sm:$0xf] %vm2572_vm12, %v2718_v57  ;;  %v3166_v57 = vld [vmem:[%s9215_s5 + $0x18] sm:$0xff] }
 0x349   : > { %2647 = vrot.lane.b32.xlu2 %v2630_v3, %s9259_s29  ;;  %v3167_v3 = vld [vmem:[%s9215_s5 + $0x20] sm:$0xff] }
 0x34a   : > { %2892 = vrot.lane.b32.xlu0 %v8336_v26, %s6716_s25  ;;  %2707 = vrot.lane.b32.xlu1 %v2684_v54, %s9226_s15 }
 0x34b   : > { %v2702_v15 = vpop.permute.xlu2 %2701 }
 0x34c   : > { %v2713_v32 = vrot.slane %v2702_v15, 4  ;;  %v2696_v51 = vpop.permute.xlu1 %2695 }
 0x34d   : > { %v2710_v62 = vrot.slane %v2696_v51, 4 }
 0x34e   : > { %v2722_v60 = vsel %vm2717_vm14, %v2702_v15, %v2713_v32  ;;  %v3168_v15 = vld [vmem:[%s9215_s5 + $0x28] sm:$0xff] }
 0x34f   : > { %2738 = vst.msk [vmem:[#allocation4 + $0x70] sm:$0xf] %vm2572_vm12, %v2722_v60  ;;  %v2719_v9 = vsel %vm2717_vm14, %v2696_v51, %v2710_v62 }
 0x350   : > { %2735 = vst.msk [vmem:[#allocation4 + $0x64] sm:$0xf] %vm2572_vm12, %v2719_v9 }
 0x351   : > { %2837 = vrot.lane.b32.xlu2 %v2684_v54, %s6713_s22  ;;  %s6720_s22 = smov 115  }
 0x352   : > { %2967 = vrot.lane.b32.xlu0 %v2684_v54, %s6714_s24  ;;  %2894 = vrot.lane.b32.xlu1 %v8353_v59, %s6716_s25  ;;  %s6721_s24 = smov 121  }
 0x353   : > { %v2962_v12 = vpop.permute.xlu2 %2961 }
 0x354   : > { %v2698_v20 = vpop.permute.xlu0 %2697  ;;  %v2973_v17 = vrot.slane %v2962_v12, 4  ;;  %v2828_v42 = vpop.permute.xlu1 %2827 }
 0x355   : > { %v2711_v41 = vrot.slane %v2698_v20, 4  ;;  %v2841_v35 = vrot.slane %v2828_v42, 4 }
 0x356   : > { %v2982_v29 = vsel %vm2977_vm15, %v2962_v12, %v2973_v17 }
 0x357   : > { %v2720_v21 = vsel %vm2717_vm14, %v2698_v20, %v2711_v41  ;;  %2998 = vst.msk [vmem:[#allocation4 + $0xf0] sm:$0xf] %vm2572_vm12, %v2982_v29  ;;  %v2850_v43 = vsel %vm2847_vm13, %v2828_v42, %v2841_v35  ;;  %v3169_v42 = vld [vmem:[%s9215_s5 + $0x30] sm:$0xff]  ;;  %v3170_v35 = vld [vmem:[%s9215_s5 + $0x38] sm:$0xff]  ;;  %v6461_v29 = vld [vmem:[#allocation4 + $0x20] sm:$0xff] }
 0x358   : > { %2736 = vst.msk [vmem:[#allocation4 + $0x68] sm:$0xf] %vm2572_vm12, %v2720_v21 }
 0x359   : > { %2866 = vst.msk [vmem:[#allocation4 + $0xa8] sm:$0xf] %vm2572_vm12, %v2850_v43  ;;  %3030 = vrot.lane.b32.xlu2 %v8407_v13, %s6717_s12 }
 0x35a   : > { %2888 = vrot.lane.b32.xlu0 %v8307_v28, %s6716_s25  ;;  %2758 = vrot.lane.b32.xlu1 %v8307_v28, %s6715_s30 }
 0x35b   : > { %v2834_v14 = vpop.permute.xlu2 %2833 }
 0x35c   : > { %v2958_v6 = vpop.permute.xlu0 %2957  ;;  %v2844_v40 = vrot.slane %v2834_v14, 4  ;;  %v2700_v34 = vpop.permute.xlu1 %2699 }
 0x35d   : > { %v2971_v25 = vrot.slane %v2958_v6, 4  ;;  %v2712_v1 = vrot.slane %v2700_v34, 4 }
 0x35e   : > { %v2853_v61 = vsel %vm2847_vm13, %v2834_v14, %v2844_v40  ;;  %v6460_v40 = vld [vmem:[#allocation4 + $0x18] sm:$0xff] }
 0x35f   : > { %v2980_v44 = vsel %vm2977_vm15, %v2958_v6, %v2971_v25  ;;  %2869 = vst.msk [vmem:[#allocation4 + $0xb4] sm:$0xf] %vm2572_vm12, %v2853_v61  ;;  %v2721_v36 = vsel %vm2717_vm14, %v2700_v34, %v2712_v1  ;;  %v6459_v61 = vld [vmem:[#allocation4 + $0x10] sm:$0xff] }
 0x360   : > { %2996 = vst.msk [vmem:[#allocation4 + $0xe8] sm:$0xf] %vm2572_vm12, %v2980_v44 }
 0x361   : > { %2737 = vst.msk [vmem:[#allocation4 + $0x6c] sm:$0xf] %vm2572_vm12, %v2721_v36  ;;  %2659 = vrot.lane.b32.xlu2 %v2636_v24, %s9259_s29 }
 0x362   : > { %2772 = vrot.lane.b32.xlu0 %v2684_v54, %s6715_s30  ;;  %2902 = vrot.lane.b32.xlu1 %v2684_v54, %s6716_s25 }
 0x363   : > { %v2966_v45 = vpop.permute.xlu2 %2965 }
 0x364   : > { %v2604_v0 = vpop.permute.xlu0 %2603  ;;  %v2975_v31 = vrot.slane %v2966_v45, 4  ;;  %v2960_v37 = vpop.permute.xlu1 %2959 }
 0x365   : > { %2624 = vst.msk [vmem:[#allocation4 + $0x2c] sm:$0xf] %vm2572_vm12, %v2604_v0  ;;  %v2972_v48 = vrot.slane %v2960_v37, 4 }
 0x366   : > { %v2984_v19 = vsel %vm2977_vm15, %v2966_v45, %v2975_v31  ;;  %v6458_v31 = vld [vmem:[#allocation4 + $0x8] sm:$0xff] }
 0x367   : > { %3000 = vst.msk [vmem:[#allocation4 + $0xf8] sm:$0xf] %vm2572_vm12, %v2984_v19  ;;  %v2981_v58 = vsel %vm2977_vm15, %v2960_v37, %v2972_v48  ;;  %v5781_v19 = vld [vmem:[%s9214_s4] sm:$0xf] }
 0x368   : > { %2997 = vst.msk [vmem:[#allocation4 + $0xec] sm:$0xf] %vm2572_vm12, %v2981_v58  ;;  %v6439_v58 = vld [vmem:[%s9214_s4 + $0x10] sm:$0xf0] }
 0x369   : > { %2760 = vrot.lane.b32.xlu2 %v8321_v30, %s6715_s30 }
 0x36a   : > { %3032 = vrot.lane.b32.xlu0 %v2684_v54, %s6717_s12  ;;  %2890 = vrot.lane.b32.xlu1 %v8321_v30, %s6716_s25  ;;  %s5027_s25 = scalar_lea.hbm %s9221_s11, %s6804_s21 }
 0x36b   : > { %v2612_v55 = vpop.permute.xlu2 %2611  ;;  %s5031_s1 = sshll.u32 %s5027_s25, 4  ;;  %s5032_s1 = int_to_ptr.hbm [resolvable:$true] %s5031_s1 }
 0x36c   : > { %v2606_v56 = vpop.permute.xlu0 %2605  ;;  %2628 = vst.msk [vmem:[#allocation4 + $0x3c] sm:$0xf] %vm2572_vm12, %v2612_v55  ;;  %v2832_v4 = vpop.permute.xlu1 %2831  ;;  %v6462_v20 = vld [vmem:[#allocation4 + $0x28] sm:$0xff]  ;;  %v6457_v55 = vld [vmem:[#allocation4] sm:$0xff] }
 0x36d   : > { %2625 = vst.msk [vmem:[#allocation4 + $0x30] sm:$0xf] %vm2572_vm12, %v2606_v56  ;;  %v2843_v11 = vrot.slane %v2832_v4, 4  ;;  %v5782_v56 = vor.u32 %v6439_v58, %v5781_v19  ;;  %v6470_v19 = vld [vmem:[#allocation4 + $0x68] sm:$0xff] }
 0x36f   : > { %v2852_v7 = vsel %vm2847_vm13, %v2832_v4, %v2843_v11 }
 0x370   : > { %2868 = vst.msk [vmem:[#allocation4 + $0xb0] sm:$0xf] %vm2572_vm12, %v2852_v7 }
 0x371   : > { %3026 = vrot.lane.b32.xlu2 %v8371_v22, %s6717_s12 }
 0x372   : > { %3028 = vrot.lane.b32.xlu0 %v8397_v53, %s6717_s12  ;;  %3022 = vrot.lane.b32.xlu1 %v8336_v26, %s6717_s12 }
 0x373   : > { %v2824_v46 = vpop.permute.xlu2 %2823 }
 0x374   : > { %v2704_v13 = vpop.permute.xlu0 %2703  ;;  %v2839_v5 = vrot.slane %v2824_v46, 4  ;;  %v2608_v39 = vpop.permute.xlu1 %2607 }
 0x375   : > { %v2714_v27 = vrot.slane %v2704_v13, 4  ;;  %2626 = vst.msk [vmem:[#allocation4 + $0x34] sm:$0xf] %vm2572_vm12, %v2608_v39 }
 0x376   : > { %v2848_v16 = vsel %vm2847_vm13, %v2824_v46, %v2839_v5 }
 0x377   : > { %v2723_v38 = vsel %vm2717_vm14, %v2704_v13, %v2714_v27  ;;  %2864 = vst.msk [vmem:[#allocation4 + $0xa0] sm:$0xf] %vm2572_vm12, %v2848_v16 }
 0x378   : > { %2739 = vst.msk [vmem:[#allocation4 + $0x74] sm:$0xf] %vm2572_vm12, %v2723_v38 }
 0x379   : > { %3024 = vrot.lane.b32.xlu2 %v8353_v59, %s6717_s12  ;;  %v3163_v59 = vld [vmem:[%s9215_s5] sm:$0xff] }
 0x37a   : > { %3018 = vrot.lane.b32.xlu0 %v8307_v28, %s6717_s12  ;;  %3020 = vrot.lane.b32.xlu1 %v8321_v30, %s6717_s12  ;;  %v3164_v28 = vld [vmem:[%s9215_s5 + $0x8] sm:$0xff]  ;;  %v3165_v30 = vld [vmem:[%s9215_s5 + $0x10] sm:$0xff] }
 0x37b   : > { %v2771_v26 = vpop.permute.xlu2 %2770 }
 0x37c   : > { %v2964_v22 = vpop.permute.xlu0 %2963  ;;  %v2780_v53 = vrot.slane %v2771_v26, 4  ;;  %v2610_v8 = vpop.permute.xlu1 %2609  ;;  %v6463_v32 = vld [vmem:[#allocation4 + $0x30] sm:$0xff] }
 0x37d   : > { %v2974_v10 = vrot.slane %v2964_v22, 4  ;;  %2627 = vst.msk [vmem:[#allocation4 + $0x38] sm:$0xf] %vm2572_vm12, %v2610_v8  ;;  %v6444_v8 = vld [vmem:[%s9214_s4 + $0x38] sm:$0xf0] }
 0x37e   : > { %v2789_v50 = vsel %vm2782_vm0, %v2771_v26, %v2780_v53 }
 0x37f   : > { %v2983_v2 = vsel %vm2977_vm15, %v2964_v22, %v2974_v10  ;;  %2805 = vst.msk [vmem:[#allocation4 + $0x98] sm:$0xf] %vm2572_vm12, %v2789_v50  ;;  %v5801_v10 = vld [vmem:[%s9214_s4 + $0x28] sm:$0xf] }
 0x380   : > { %2999 = vst.msk [vmem:[#allocation4 + $0xf4] sm:$0xf] %vm2572_vm12, %v2983_v2  ;;  %v5802_v2 = vor.u32 %v6444_v8, %v5801_v10 }
 0x381   : > { %3173 = vperm.xlu2 %6635, %v3163_v59  }
 0x382   : > { %3178 = vperm.xlu0 %6636, %v3164_v28   ;;  %3183 = vperm.xlu1 %6634, %v3165_v30  }
 0x383   : > { %v2656_v63 = vpop.permute.xlu2 %2655 }
 0x384   : > { %v2706_v23 = vpop.permute.xlu0 %2705  ;;  %2674 = vst.msk [vmem:[#allocation4 + $0x54] sm:$0xf] %vm2572_vm12, %v2656_v63  ;;  %v2836_v47 = vpop.permute.xlu1 %2835  ;;  %v6464_v33 = vld [vmem:[#allocation4 + $0x38] sm:$0xff] }
 0x385   : > { %v2715_v52 = vrot.slane %v2706_v23, 4  ;;  %v2845_v49 = vrot.slane %v2836_v47, 4  ;;  %3540 = vmatpush.bf16.msra.mxu0 %v6464_v33 }
 0x387   : > { %v2724_v18 = vsel %vm2717_vm14, %v2706_v23, %v2715_v52  ;;  %v2854_v54 = vsel %vm2847_vm13, %v2836_v47, %v2845_v49  ;;  %v6479_v49 = vld [vmem:[#allocation4 + $0xb0] sm:$0xff] }
 0x388   : > { %2740 = vst.msk [vmem:[#allocation4 + $0x78] sm:$0xf] %vm2572_vm12, %v2724_v18 }
 0x389   : > { %2870 = vst.msk [vmem:[#allocation4 + $0xb8] sm:$0xf] %vm2572_vm12, %v2854_v54  ;;  %3188 = vperm.xlu2 %6635, %v3166_v57   ;;  %3541 = vmatpush.bf16.msra.mxu0 %v6463_v32 }
 0x38a   : > { %3193 = vperm.xlu0 %6636, %v3167_v3   ;;  %3198 = vperm.xlu1 %6634, %v3168_v15  }
 0x38b   : > { %v2767_v51 = vpop.permute.xlu2 %2766 }
 0x38c   : > { %v2826_v62 = vpop.permute.xlu0 %2825  ;;  %v2778_v60 = vrot.slane %v2767_v51, 4  ;;  %v2658_v12 = vpop.permute.xlu1 %2657 }
 0x38d   : > { %v2840_v9 = vrot.slane %v2826_v62, 4  ;;  %2675 = vst.msk [vmem:[#allocation4 + $0x58] sm:$0xf] %vm2572_vm12, %v2658_v12  ;;  %3542 = vmatpush.bf16.msra.mxu0 %v6462_v20 }
 0x38e   : > { %v2787_v17 = vsel %vm2782_vm0, %v2767_v51, %v2778_v60  ;;  %v6478_v51 = vld [vmem:[#allocation4 + $0xa8] sm:$0xff]  ;;  %v6449_v60 = vld [vmem:[%s9214_s4 + $0x60] sm:$0xf0] }
 0x38f   : > { %v2849_v41 = vsel %vm2847_vm13, %v2826_v62, %v2840_v9  ;;  %2803 = vst.msk [vmem:[#allocation4 + $0x90] sm:$0xf] %vm2572_vm12, %v2787_v17  ;;  %v5821_v62 = vld [vmem:[%s9214_s4 + $0x50] sm:$0xf] }
 0x390   : > { %2865 = vst.msk [vmem:[#allocation4 + $0xa4] sm:$0xf] %vm2572_vm12, %v2849_v41  ;;  %v5822_v12 = vor.u32 %v6449_v60, %v5821_v62 }
 0x391   : > { %3203 = vperm.xlu2 %6635, %v3169_v42   ;;  %3543 = vmatpush.bf16.msra.mxu0 %v6461_v29 }
 0x392   : > { %3208 = vperm.xlu0 %6636, %v3170_v35  }
 0x393   : > { %v2652_v21 = vpop.permute.xlu2 %2651 }
 0x394   : > { %v2954_v43 = vpop.permute.xlu0 %2953  ;;  %2672 = vst.msk [vmem:[#allocation4 + $0x4c] sm:$0xf] %vm2572_vm12, %v2652_v21  ;;  %v2956_v6 = vpop.permute.xlu1 %2955 }
 0x395   : > { %v2969_v14 = vrot.slane %v2954_v43, 4  ;;  %v2970_v25 = vrot.slane %v2956_v6, 4  ;;  %3544 = vmatpush.bf16.msra.mxu0 %v6460_v40 }
 0x397   : > { %v2978_v34 = vsel %vm2977_vm15, %v2954_v43, %v2969_v14  ;;  %v2979_v1 = vsel %vm2977_vm15, %v2956_v6, %v2970_v25  ;;  %v6477_v20 = vld [vmem:[#allocation4 + $0xa0] sm:$0xff] }
 0x398   : > { %2994 = vst.msk [vmem:[#allocation4 + $0xe0] sm:$0xf] %vm2572_vm12, %v2978_v34 }
 0x399   : > { %2995 = vst.msk [vmem:[#allocation4 + $0xe4] sm:$0xf] %vm2572_vm12, %v2979_v1  ;;  %3545 = vmatpush.bf16.msra.mxu0 %v6459_v61  ;;  %v6471_v1 = vld [vmem:[#allocation4 + $0x70] sm:$0xff] }
 0x39b   : > { %v2763_v44 = vpop.permute.xlu2 %2762 }
 0x39c   : > { %v2901_v36 = vpop.permute.xlu0 %2900  ;;  %v2776_v24 = vrot.slane %v2763_v44, 4  ;;  %v2654_v0 = vpop.permute.xlu1 %2653 }
 0x39d   : > { %v2910_v45 = vrot.slane %v2901_v36, 4  ;;  %2673 = vst.msk [vmem:[#allocation4 + $0x50] sm:$0xf] %vm2572_vm12, %v2654_v0  ;;  %3546 = vmatpush.bf16.msra.mxu0 %v6458_v31  ;;  %v5841_v31 = vld [vmem:[%s9214_s4 + $0x78] sm:$0xf] }
 0x39e   : > { %v2785_v37 = vsel %vm2782_vm0, %v2763_v44, %v2776_v24 }
 0x39f   : > { %v2919_v48 = vsel %vm2912_vm1, %v2901_v36, %v2910_v45  ;;  %2801 = vst.msk [vmem:[#allocation4 + $0x88] sm:$0xf] %vm2572_vm12, %v2785_v37  ;;  %v6454_v37 = vld [vmem:[%s9214_s4 + $0x88] sm:$0xf0] }
 0x3a0   : > { %2935 = vst.msk [vmem:[#allocation4 + $0xd8] sm:$0xf] %vm2572_vm12, %v2919_v48 }
 0x3a1   : > { %3547 = vmatpush.bf16.msra.mxu0 %v6457_v55  ;;  %v5842_v55 = vor.u32 %v6454_v37, %v5841_v31  ;;  %v5823_v31 = vld [vmem:[%s9214_s4 + $0x64] sm:$0xf0] }
 0x3a3   : > { %v2648_v4 = vpop.permute.xlu2 %2647 }
 0x3a4   : > { %v2769_v11 = vpop.permute.xlu0 %2768  ;;  %2670 = vst.msk [vmem:[#allocation4 + $0x44] sm:$0xf] %vm2572_vm12, %v2648_v4  ;;  %v2650_v46 = vpop.permute.xlu1 %2649  ;;  %3548 = vmatmul.bf16.vlgmr.msra.gmra.mxu0 %v5782_v56  ;;  %v6467_v10 = vld [vmem:[#allocation4 + $0x50] sm:$0xff] }
 0x3a5   : > { %v2779_v7 = vrot.slane %v2769_v11, 4  ;;  %2671 = vst.msk [vmem:[#allocation4 + $0x48] sm:$0xf] %vm2572_vm12, %v2650_v46 }
 0x3a7   : > { %v2788_v13 = vsel %vm2782_vm0, %v2769_v11, %v2779_v7  ;;  %v6469_v11 = vld [vmem:[#allocation4 + $0x60] sm:$0xff] }
 0x3a8   : > { %2804 = vst.msk [vmem:[#allocation4 + $0x94] sm:$0xf] %vm2572_vm12, %v2788_v13 }
 0x3ab   : > { %v2838_v5 = vpop.permute.xlu2 %2837 }
 0x3ac   : > { %v2897_v27 = vpop.permute.xlu0 %2896  ;;  %v2846_v39 = vrot.slane %v2838_v5, 4  ;;  %v2899_v38 = vpop.permute.xlu1 %2898 }
 0x3ad   : > { %v2908_v16 = vrot.slane %v2897_v27, 4  ;;  %v2909_v26 = vrot.slane %v2899_v38, 4 }
 0x3ae   : > { %v2855_v22 = vsel %vm2847_vm13, %v2838_v5, %v2846_v39  ;;  %v6487_v5 = vld [vmem:[#allocation4 + $0xf0] sm:$0xff]  ;;  %vm4967_vm13 = vcmask 392512  }
 0x3af   : > { %v2917_v53 = vsel %vm2912_vm1, %v2897_v27, %v2908_v16  ;;  %2871 = vst.msk [vmem:[#allocation4 + $0xbc] sm:$0xf] %vm2572_vm12, %v2855_v22  ;;  %v2918_v50 = vsel %vm2912_vm1, %v2899_v38, %v2909_v26  ;;  %v6486_v22 = vld [vmem:[#allocation4 + $0xe8] sm:$0xff] }
 0x3b0   : > { %2933 = vst.msk [vmem:[#allocation4 + $0xd0] sm:$0xf] %vm2572_vm12, %v2917_v53 }
 0x3b1   : > { %2934 = vst.msk [vmem:[#allocation4 + $0xd4] sm:$0xf] %vm2572_vm12, %v2918_v50 }
 0x3b3   : > { %v3031_v59 = vpop.permute.xlu2 %3030 }
 0x3b4   : > { %v2765_v28 = vpop.permute.xlu0 %2764  ;;  %v3040_v30 = vrot.slane %v3031_v59, 4  ;;  %v2646_v23 = vpop.permute.xlu1 %2645  ;;  %3553 = vmatmul.bf16.gmra.mxu0 %v5802_v2  ;;  %v6485_v2 = vld [vmem:[#allocation4 + $0xe0] sm:$0xff] }
 0x3b5   : > { %v2777_v63 = vrot.slane %v2765_v28, 4  ;;  %2669 = vst.msk [vmem:[#allocation4 + $0x40] sm:$0xf] %vm2572_vm12, %v2646_v23 }
 0x3b6   : > { %v3049_v52 = vsel %vm3042_vm2, %v3031_v59, %v3040_v30  ;;  %v6480_v33 = vld [vmem:[#allocation4 + $0xb8] sm:$0xff] }
 0x3b7   : > { %v2786_v47 = vsel %vm2782_vm0, %v2765_v28, %v2777_v63  ;;  %3065 = vst.msk [vmem:[#allocation4 + $0x118] sm:$0xf] %vm2572_vm12, %v3049_v52  ;;  %3598 = vmatpush.bf16.msra.mxu2 %v6480_v33  ;;  %v6466_v63 = vld [vmem:[#allocation4 + $0x48] sm:$0xff]  ;;  %v5803_v33 = vld [vmem:[%s9214_s4 + $0x3c] sm:$0xf0] }
 0x3b8   : > { %2802 = vst.msk [vmem:[#allocation4 + $0x8c] sm:$0xf] %vm2572_vm12, %v2786_v47  ;;  %v6442_v47 = vld [vmem:[%s9214_s4 + $0x2c] sm:$0xf] }
 0x3b9   : > { %v5806_v62 = vor.u32 %v6442_v47, %v5803_v33  ;;  %v6453_v47 = vld [vmem:[%s9214_s4 + $0x84] sm:$0xf]  ;;  %v5851_v33 = vld [vmem:[%s9214_s4 + $0x94] sm:$0xf0] }
 0x3bb   : > { %v2660_v18 = vpop.permute.xlu2 %2659  ;;  %3599 = vmatpush.bf16.msra.mxu2 %v6479_v49  ;;  %v6437_v49 = vld [vmem:[%s9214_s4 + $0x4] sm:$0xf] }
 0x3bc   : > { %v2893_v57 = vpop.permute.xlu0 %2892  ;;  %2676 = vst.msk [vmem:[#allocation4 + $0x5c] sm:$0xf] %vm2572_vm12, %v2660_v18  ;;  %v2708_v54 = vpop.permute.xlu1 %2707  ;;  %v5783_v18 = vld [vmem:[%s9214_s4 + $0x14] sm:$0xf0] }
 0x3bd   : > { %v2906_v3 = vrot.slane %v2893_v57, 4  ;;  %v2716_v15 = vrot.slane %v2708_v54, 4 }
 0x3bf   : > { %v2915_v32 = vsel %vm2912_vm1, %v2893_v57, %v2906_v3  ;;  %v2725_v9 = vsel %vm2717_vm14, %v2708_v54, %v2716_v15  ;;  %3600 = vmatpush.bf16.msra.mxu2 %v6478_v51  ;;  %v6465_v3 = vld [vmem:[#allocation4 + $0x40] sm:$0xff]  ;;  %v6475_v54 = vld [vmem:[#allocation4 + $0x90] sm:$0xff]  ;;  %vm4971_vm14 = vcmask 458112  }
 0x3c0   : > { %2931 = vst.msk [vmem:[#allocation4 + $0xc8] sm:$0xf] %vm2572_vm12, %v2915_v32  ;;  %v6483_v51 = vld [vmem:[#allocation4 + $0xd0] sm:$0xff] }
 0x3c1   : > { %2741 = vst.msk [vmem:[#allocation4 + $0x7c] sm:$0xf] %vm2572_vm12, %v2725_v9  ;;  %v5786_v9 = vor.u32 %v6437_v49, %v5783_v18  ;;  %v5854_v18 = vor.u32 %v6453_v47, %v5851_v33 }
 0x3c3   : > { %v2761_v17 = vpop.permute.xlu2 %2760  ;;  %3601 = vmatpush.bf16.msra.mxu2 %v6477_v20  ;;  %v6468_v26 = vld [vmem:[#allocation4 + $0x58] sm:$0xff] }
 0x3c4   : > { %v2968_v41 = vpop.permute.xlu0 %2967  ;;  %v2775_v42 = vrot.slane %v2761_v17, 4  ;;  %v2895_v29 = vpop.permute.xlu1 %2894  ;;  %3558 = vmatmul.bf16.gmra.mxu0 %v5822_v12 }
 0x3c5   : > { %v2976_v35 = vrot.slane %v2968_v41, 4  ;;  %v2907_v21 = vrot.slane %v2895_v29, 4 }
 0x3c6   : > { %v2784_v43 = vsel %vm2782_vm0, %v2761_v17, %v2775_v42 }
 0x3c7   : > { %v2985_v14 = vsel %vm2977_vm15, %v2968_v41, %v2976_v35  ;;  %2800 = vst.msk [vmem:[#allocation4 + $0x84] sm:$0xf] %vm2572_vm12, %v2784_v43  ;;  %v2916_v6 = vsel %vm2912_vm1, %v2895_v29, %v2907_v21  ;;  %v6474_v41 = vld [vmem:[#allocation4 + $0x88] sm:$0xff]  ;;  %v6440_v29 = vld [vmem:[%s9214_s4 + $0x18] sm:$0xf0]  ;;  %vm4975_vm15 = vcmask 523712  }
 0x3c8   : > { %v6472_v40 = vld [vmem:[#allocation4 + $0x78] sm:$0xff]  ;;  %3001 = vst.msk [vmem:[#allocation4 + $0xfc] sm:$0xf] %vm2572_vm12, %v2985_v14  ;;  %v5789_v35 = vld [vmem:[%s9214_s4 + $0x8] sm:$0xf] }
 0x3c9   : > { %2932 = vst.msk [vmem:[#allocation4 + $0xcc] sm:$0xf] %vm2572_vm12, %v2916_v6  ;;  %3569 = vmatpush.bf16.msrb.mxu0 %v6472_v40  ;;  %6562 = vmatpush.bf16.msra.mxu1 %v6472_v40  ;;  %v6438_v21 = vld [vmem:[%s9214_s4 + $0xc] sm:$0xf]  ;;  %v5791_v43 = vld [vmem:[%s9214_s4 + $0x1c] sm:$0xf0] }
 0x3cb   : > { %v3027_v25 = vpop.permute.xlu2 %3026 }
 0x3cc   : > { %v2889_v34 = vpop.permute.xlu0 %2888  ;;  %v3038_v61 = vrot.slane %v3027_v25, 4  ;;  %v2759_v36 = vpop.permute.xlu1 %2758 }
 0x3cd   : > { %v2904_v44 = vrot.slane %v2889_v34, 4  ;;  %v2774_v24 = vrot.slane %v2759_v36, 4  ;;  %3570 = vmatpush.bf16.msrb.mxu0 %v6471_v1  ;;  %6563 = vmatpush.bf16.msra.mxu1 %v6471_v1  ;;  %v5790_v1 = vor.u32 %v6440_v29, %v5789_v35  ;;  %v6498_v35 = vld [vmem:[%s9216_s6 + $0x28] sm:$0xff]  ;;  %v6497_v29 = vld [vmem:[%s9216_s6 + $0x20] sm:$0xff] }
 0x3ce   : > { %v3047_v45 = vsel %vm3042_vm2, %v3027_v25, %v3038_v61 }
 0x3cf   : > { %v2913_v0 = vsel %vm2912_vm1, %v2889_v34, %v2904_v44  ;;  %3063 = vst.msk [vmem:[#allocation4 + $0x110] sm:$0xf] %vm2572_vm12, %v3047_v45  ;;  %v2783_v48 = vsel %vm2782_vm0, %v2759_v36, %v2774_v24  ;;  %v6488_v58 = vld [vmem:[#allocation4 + $0xf8] sm:$0xff]  ;;  %v5794_v44 = vor.u32 %v6438_v21, %v5791_v43 }
 0x3d0   : > { %2929 = vst.msk [vmem:[#allocation4 + $0xc0] sm:$0xf] %vm2572_vm12, %v2913_v0  ;;  %3627 = vmatpush.bf16.msrb.mxu3 %v6488_v58  ;;  %v6482_v42 = vld [vmem:[#allocation4 + $0xc8] sm:$0xff]  ;;  %v6447_v0 = vld [vmem:[%s9214_s4 + $0x54] sm:$0xf]  ;;  %v6496_v43 = vld [vmem:[%s9216_s6 + $0x18] sm:$0xff] }
 0x3d1   : > { %2799 = vst.msk [vmem:[#allocation4 + $0x80] sm:$0xf] %vm2572_vm12, %v2783_v48  ;;  %3571 = vmatpush.bf16.msrb.mxu0 %v6470_v19  ;;  %6564 = vmatpush.bf16.msra.mxu1 %v6470_v19  ;;  %v5826_v48 = vor.u32 %v6447_v0, %v5823_v31  ;;  %v5797_v19 = vld [vmem:[%s9214_s4 + $0x10] sm:$0xf]  ;;  %v6441_v58 = vld [vmem:[%s9214_s4 + $0x20] sm:$0xf0] }
 0x3d3   : > { %v3025_v56 = vpop.permute.xlu2 %3024 }
 0x3d4   : > { %v2773_v4 = vpop.permute.xlu0 %2772  ;;  %v3037_v7 = vrot.slane %v3025_v56, 4  ;;  %v2903_v13 = vpop.permute.xlu1 %2902  ;;  %3563 = vmatmul.bf16.gmra.mxu0 %v5842_v55  ;;  %3628 = vmatpush.bf16.msrb.mxu3 %v6487_v5 }
 0x3d5   : > { %v2781_v46 = vrot.slane %v2773_v4, 4  ;;  %v2911_v27 = vrot.slane %v2903_v13, 4  ;;  %6565 = vmatpush.bf16.msra.mxu1 %v6469_v11  ;;  %3572 = vmatpush.bf16.msrb.mxu0 %v6469_v11  ;;  %v6445_v11 = vld [vmem:[%s9214_s4 + $0x40] sm:$0xf0] }
 0x3d6   : > { %v3046_v39 = vsel %vm3042_vm2, %v3025_v56, %v3037_v7  ;;  %v5798_v56 = vor.u32 %v6441_v58, %v5797_v19  ;;  %v6443_v7 = vld [vmem:[%s9214_s4 + $0x34] sm:$0xf] }
 0x3d7   : > { %v2790_v16 = vsel %vm2782_vm0, %v2773_v4, %v2781_v46  ;;  %3062 = vst.msk [vmem:[#allocation4 + $0x10c] sm:$0xf] %vm2572_vm12, %v3046_v39  ;;  %v2920_v38 = vsel %vm2912_vm1, %v2903_v13, %v2911_v27  ;;  %v5809_v4 = vld [vmem:[%s9214_s4 + $0x30] sm:$0xf]  ;;  %v5811_v46 = vld [vmem:[%s9214_s4 + $0x44] sm:$0xf0] }
 0x3d8   : > { %2806 = vst.msk [vmem:[#allocation4 + $0x9c] sm:$0xf] %vm2572_vm12, %v2790_v16  ;;  %3629 = vmatpush.bf16.msrb.mxu3 %v6486_v22  ;;  %v6473_v6 = vld [vmem:[#allocation4 + $0x80] sm:$0xff]  ;;  %v5810_v13 = vor.u32 %v6445_v11, %v5809_v4  ;;  %v5814_v5 = vor.u32 %v6443_v7, %v5811_v46  ;;  %v6452_v27 = vld [vmem:[%s9214_s4 + $0x7c] sm:$0xf]  ;;  %vm4992_vm0 = vcmask 1041409  }
 0x3d9   : > { %2936 = vst.msk [vmem:[#allocation4 + $0xdc] sm:$0xf] %vm2572_vm12, %v2920_v38  ;;  %6566 = vmatpush.bf16.msra.mxu1 %v6468_v26  ;;  %3573 = vmatpush.bf16.msrb.mxu0 %v6468_v26  ;;  %v5843_v39 = vld [vmem:[%s9214_s4 + $0x8c] sm:$0xf0]  ;;  %v5817_v38 = vld [vmem:[%s9214_s4 + $0x38] sm:$0xf] }
 0x3da   : > { %v5846_v16 = vor.u32 %v6452_v27, %v5843_v39  ;;  %v6446_v26 = vld [vmem:[%s9214_s4 + $0x48] sm:$0xf0] }
 0x3db   : > { %v5818_v22 = vor.u32 %v6446_v26, %v5817_v38 }
 0x3dc   : > { %v3033_v53 = vpop.permute.xlu0 %3032  ;;  %v2891_v50 = vpop.permute.xlu1 %2890  ;;  %3630 = vmatpush.bf16.msrb.mxu3 %v6485_v2 }
 0x3dd   : > { %v3041_v8 = vrot.slane %v3033_v53, 4  ;;  %v2905_v59 = vrot.slane %v2891_v50, 4  ;;  %6567 = vmatpush.bf16.msra.mxu1 %v6467_v10  ;;  %3574 = vmatpush.bf16.msrb.mxu0 %v6467_v10  ;;  %v6450_v10 = vld [vmem:[%s9214_s4 + $0x68] sm:$0xf0] }
 0x3df   : > { %v3050_v28 = vsel %vm3042_vm2, %v3033_v53, %v3041_v8  ;;  %v2914_v30 = vsel %vm2912_vm1, %v2891_v50, %v2905_v59  ;;  %v6476_v23 = vld [vmem:[#allocation4 + $0x98] sm:$0xff]  ;;  %v5831_v50 = vld [vmem:[%s9214_s4 + $0x6c] sm:$0xf0]  ;;  %vm4995_vm1 = vcmask 517120  }
 0x3e0   : > { %3066 = vst.msk [vmem:[#allocation4 + $0x11c] sm:$0xf] %vm2572_vm12, %v3050_v28  ;;  %v6484_v52 = vld [vmem:[#allocation4 + $0xd8] sm:$0xff]  ;;  %3602 = vmatpush.bf16.msra.mxu2 %v6476_v23  ;;  %v5837_v28 = vld [vmem:[%s9214_s4 + $0x60] sm:$0xf] }
 0x3e1   : > { %2930 = vst.msk [vmem:[#allocation4 + $0xc4] sm:$0xf] %vm2572_vm12, %v2914_v30  ;;  %6568 = vmatpush.bf16.msra.mxu1 %v6466_v63  ;;  %3575 = vmatpush.bf16.msrb.mxu0 %v6466_v63  ;;  %v5829_v53 = vld [vmem:[%s9214_s4 + $0x58] sm:$0xf]  ;;  %v6448_v8 = vld [vmem:[%s9214_s4 + $0x5c] sm:$0xf] }
 0x3e2   : > { %3631 = vmatpush.bf16.msrb.mxu3 %v6484_v52  ;;  %v5830_v2 = vor.u32 %v6450_v10, %v5829_v53  ;;  %v5834_v59 = vor.u32 %v6448_v8, %v5831_v50  ;;  %v6451_v30 = vld [vmem:[%s9214_s4 + $0x70] sm:$0xf0]  ;;  %v5849_v23 = vld [vmem:[%s9214_s4 + $0x80] sm:$0xf] }
 0x3e3   : > { %v5838_v63 = vor.u32 %v6451_v30, %v5837_v28  ;;  %v6455_v52 = vld [vmem:[%s9214_s4 + $0x90] sm:$0xf0] }
 0x3e4   : > { %v3029_v57 = vpop.permute.xlu0 %3028  ;;  %v3023_v32 = vpop.permute.xlu1 %3022  ;;  %3603 = vmatpush.bf16.msra.mxu2 %v6475_v54  ;;  %v5850_v49 = vor.u32 %v6455_v52, %v5849_v23  ;;  %v6456_v54 = vld [vmem:[%s9214_s4 + $0x98] sm:$0xf0] }
 0x3e5   : > { %v3039_v15 = vrot.slane %v3029_v57, 4  ;;  %v3036_v60 = vrot.slane %v3023_v32, 4  ;;  %6569 = vmatpush.bf16.msra.mxu1 %v6465_v3  ;;  %3576 = vmatpush.bf16.msrb.mxu0 %v6465_v3  ;;  %v5857_v3 = vld [vmem:[%s9214_s4 + $0x88] sm:$0xf] }
 0x3e6   : > { %3632 = vmatpush.bf16.msrb.mxu3 %v6483_v51 }
 0x3e7   : > { %v3048_v12 = vsel %vm3042_vm2, %v3029_v57, %v3039_v15  ;;  %v6492_v20 = vld [vmem:[#allocation4 + $0x118] sm:$0xff]  ;;  %v3045_v17 = vsel %vm3042_vm2, %v3023_v32, %v3036_v60  ;;  %v5858_v15 = vor.u32 %v6456_v54, %v5857_v3 }
 0x3e8   : > { %3064 = vst.msk [vmem:[#allocation4 + $0x114] sm:$0xf] %vm2572_vm12, %v3048_v12  ;;  %3582 = vmatmul.bf16.vlgmr.msra.gmra.mxu1 %v5806_v62  ;;  %3577 = vmatmul.bf16.vlgmr.msrb.gmra.mxu0 %v5786_v9  ;;  %v6481_v34 = vld [vmem:[#allocation4 + $0xc0] sm:$0xff]  ;;  %v6037_v9 = vld [vmem:[%s9216_s6 + $0x38] sm:$0xf] }
 0x3e9   : > { %3061 = vst.msk [vmem:[#allocation4 + $0x108] sm:$0xf] %vm2572_vm12, %v3045_v17  ;;  %3660 = vmatpush.bf16.msra.mxu0 %v6492_v20  ;;  %3604 = vmatpush.bf16.msra.mxu2 %v6474_v41  ;;  %v6500_v12 = vld [vmem:[%s9216_s6 + $0x38] sm:$0x30] }
 0x3ea   : > { %3633 = vmatpush.bf16.msrb.mxu3 %v6482_v42  ;;  %v6038_v20 = vor.u32 %v6500_v12, %v6037_v9  ;;  %v6499_v42 = vld [vmem:[%s9216_s6 + $0x30] sm:$0xff] }
 0x3ec   : > { %v3019_v14 = vpop.permute.xlu0 %3018  ;;  %v3021_v25 = vpop.permute.xlu1 %3020  ;;  %v3775_v17 = vsel %vm3773_vm4, %v6038_v20, 0 }
 0x3ed   : > { %v3034_v40 = vrot.slane %v3019_v14, 4  ;;  %v3035_v61 = vrot.slane %v3021_v25, 4  ;;  %3605 = vmatpush.bf16.msra.mxu2 %v6473_v6  ;;  %3777 = vmatpush.bf16.msrb.mxu1 %v3775_v17 }
 0x3ee   : > { %3634 = vmatpush.bf16.msrb.mxu3 %v6481_v34 }
 0x3ef   : > { %v3043_v36 = vsel %vm3042_vm2, %v3019_v14, %v3034_v40  ;;  %v6491_v24 = vld [vmem:[#allocation4 + $0x110] sm:$0xff]  ;;  %v3044_v45 = vsel %vm3042_vm2, %v3021_v25, %v3035_v61  ;;  %v6494_v40 = vld [vmem:[%s9216_s6 + $0x8] sm:$0xff]  ;;  %v6493_v25 = vld [vmem:[%s9216_s6] sm:$0xff]  ;;  %vm5016_vm2 = vcmask 8192  }
 0x3f0   : > { %3059 = vst.msk [vmem:[#allocation4 + $0x100] sm:$0xf] %vm2572_vm12, %v3043_v36  ;;  %3606 = vmatmul.bf16.vlgmr.msra.gmra.mxu2 %v5790_v1  ;;  %3661 = vmatpush.bf16.msra.mxu0 %v6491_v24  ;;  %v6490_v37 = vld [vmem:[#allocation4 + $0x108] sm:$0xff]  ;;  %v6495_v14 = vld [vmem:[%s9216_s6 + $0x10] sm:$0xff]  ;;  %v3174_v36 = vpop.permute.xlu2 %3173 }
 0x3f1   : > { %3060 = vst.msk [vmem:[#allocation4 + $0x104] sm:$0xf] %vm2572_vm12, %v3044_v45  ;;  %3635 = vmatmul.bf16.vlgmr.msrb.gmra.mxu3 %v5794_v44  ;;  %3778 = vmatpush.bf16.msrb.mxu1 %v6499_v42  ;;  %vm4963_vm12 = vcmask 326912  }
 0x3f4   : > { %3662 = vmatpush.bf16.msra.mxu0 %v6490_v37  ;;  %v3179_v0 = vpop.permute.xlu0 %3178 }
 0x3f5   : > { %3779 = vmatpush.bf16.msrb.mxu1 %v6498_v35 }
 0x3f8   : > { %v6489_v55 = vld [vmem:[#allocation4 + $0x100] sm:$0xff]  ;;  %3587 = vmatmul.bf16.gmra.mxu1 %v5826_v48  ;;  %v3189_v8 = vpop.permute.xlu2 %3188 }
 0x3f9   : > { %3663 = vmatpush.bf16.msra.mxu0 %v6489_v55  ;;  %3780 = vmatpush.bf16.msrb.mxu1 %v6497_v29 }
 0x3fc   : > { %6003 = vmatmul.msk.bf16.vlgmr.msra.gmra.mxu0 %vm3527_vm3, %v5798_v56  ;;  %v3194_v9 = vpop.permute.xlu0 %3193 }
 0x3fd   : > { %3781 = vmatpush.bf16.msrb.mxu1 %v6496_v43 }
 0x400   : > { %3611 = vmatmul.bf16.gmra.mxu2 %v5810_v13 }
 0x401   : > { %3640 = vmatmul.bf16.gmra.mxu3 %v5814_v5  ;;  %3782 = vmatpush.bf16.msrb.mxu1 %v6495_v14 }
 0x405   : > { %3783 = vmatpush.bf16.msrb.mxu1 %v6494_v40 }
 0x408   : > { %3592 = vmatmul.bf16.gmra.mxu1 %v5846_v16 }
 0x409   : > { %3784 = vmatpush.bf16.msrb.mxu1 %v6493_v25 }
 0x40c   : > { %6004 = vmatmul.msk.bf16.gmra.mxu0 %vm3527_vm3, %v5818_v22  ;;  %v3184_v22 = vpop.permute.xlu1 %3183 }
 0x410   : > { %3616 = vmatmul.bf16.gmra.mxu2 %v5830_v2 }
 0x411   : > { %3645 = vmatmul.bf16.gmra.mxu3 %v5834_v59 }
 0x414   : > { %v3199_v17 = vpop.permute.xlu1 %3198 }
 0x41c   : > { %6005 = vmatmul.msk.bf16.gmra.mxu0 %vm3527_vm3, %v5838_v63 }
 0x420   : > { %3621 = vmatmul.bf16.gmra.mxu2 %v5850_v49 }
 0x421   : > { %3650 = vmatmul.bf16.gmra.mxu3 %v5854_v18  ;;  %v3549_v57 = vpop.f32.mrf.mxu0 }
 0x422   : > { %v3550_v45 = vadd.f32 %v3549_v57, %v3174_v36 }
 0x429   : > { %v3551_v32 = vpop.f32.mrf.mxu0 }
 0x42a   : > { %v3552_v31 = vadd.f32 %v3551_v32, %v3179_v0 }
 0x42c   : > { %6006 = vmatmul.msk.bf16.gmra.mxu0 %vm3527_vm3, %v5858_v15 }
 0x431   : > { %v3554_v51 = vpop.f32.mrf.mxu0 }
 0x432   : > { %v3555_v53 = vadd.f32 %v3554_v51, %v3184_v22 }
 0x439   : > { %v3556_v62 = vpop.f32.mrf.mxu0 }
 0x43a   : > { %v3557_v50 = vadd.f32 %v3556_v62, %v3189_v8 }
 0x441   : > { %v8744_v60 = vpop.f32.mrf.mxu0 }
 0x442   : > { %v3560_v12 = vadd.f32 %v8744_v60, %v3194_v9 }
 0x449   : > { %v8752_v41 = vpop.f32.mrf.mxu0 }
 0x44a   : > { %v3562_v42 = vadd.f32 %v8752_v41, %v3199_v17  ;;  %v3204_v41 = vpop.permute.xlu2 %3203 }
 0x451   : > { %v8763_v21 = vpop.f32.mrf.mxu0 }
 0x459   : > { %v8771_v6 = vpop.f32.mrf.mxu0 }
 0x465   : > { %v3578_v34 = vpop.f32.mrf.mxu0  ;;  %v3583_v24 = vpop.f32.mrf.mxu1 }
 0x466   : > { %v3579_v37 = vadd.f32 %v3578_v34, %v3550_v45  ;;  %v3584_v2 = vadd.f32 %v3583_v24, %v3555_v53 }
 0x46d   : > { %v3580_v1 = vpop.f32.mrf.mxu0  ;;  %v3585_v7 = vpop.f32.mrf.mxu1 }
 0x46e   : > { %v3581_v19 = vadd.f32 %v3580_v1, %v3552_v31  ;;  %v3586_v30 = vadd.f32 %v3585_v7, %v3557_v50 }
 0x473   : > { %v3607_v61 = vpop.f32.mrf.mxu2 }
 0x474   : > { %v3636_v44 = vpop.f32.mrf.mxu3  ;;  %v3608_v58 = vadd.f32 %v3607_v61, %v3579_v37 }
 0x475   : > { %v3588_v59 = vpop.f32.mrf.mxu1 }
 0x476   : > { %v3637_v11 = vadd.f32 %v3636_v44, %v3608_v58  ;;  %v3589_v35 = vadd.f32 %v3588_v59, %v3560_v12  ;;  %v3209_v58 = vpop.permute.xlu0 %3208 }
 0x479   : > { %v3665_v48 = vpop.f32.mrf.mxu0 }
 0x47a   : > { %v3666_v46 = vadd.f32 %v3665_v48, %v3637_v11  ;;  %v3565_v48 = vadd.f32 %v8763_v21, %v3204_v41 }
 0x47b   : > { %v3609_v55 = vpop.f32.mrf.mxu2 }
 0x47c   : > { %v3610_v56 = vadd.f32 %v3609_v55, %v3581_v19  ;;  %v3638_v4 = vpop.f32.mrf.mxu3  ;;  %v3685_v16 = vmax.f32 %v3666_v46, 0.0 }
 0x47d   : > { %v3590_v54 = vpop.f32.mrf.mxu1 }
 0x47e   : > { %v3639_v13 = vadd.f32 %v3638_v4, %v3610_v56  ;;  %v3591_v43 = vadd.f32 %v3590_v54, %v3562_v42  ;;  %v3567_v56 = vadd.f32 %v8771_v6, %v3209_v58 }
 0x481   : > { %v3667_v5 = vpop.f32.mrf.mxu0 }
 0x482   : > { %v3668_v27 = vadd.f32 %v3667_v5, %v3639_v13 }
 0x483   : > { %v3612_v39 = vpop.f32.mrf.mxu2 }
 0x484   : > { %v3686_v38 = vmax.f32 %v3668_v27, 0.0  ;;  %v3641_v26 = vpop.f32.mrf.mxu3  ;;  %v3613_v63 = vadd.f32 %v3612_v39, %v3584_v2 }
 0x485   : > { %v3593_v1 = vpop.f32.mrf.mxu1 }
 0x486   : > { %v3693_v10 = vpack.c.bf16 %v3686_v38, %v3685_v16  ;;  %v3642_v33 = vadd.f32 %v3641_v26, %v3613_v63  ;;  %v3594_v4 = vadd.f32 %v3593_v1, %v3565_v48 }
 0x488   : > { %6039 = vmatmul.msk.bf16.vlgmr.msrb.gmra.mxu1 %vm3760_vm5, %v3693_v10 }
 0x489   : > { %v3670_v28 = vpop.f32.mrf.mxu0 }
 0x48a   : > { %v3671_v49 = vadd.f32 %v3670_v28, %v3642_v33 }
 0x48b   : > { %v3614_v23 = vpop.f32.mrf.mxu2 }
 0x48c   : > { %v3615_v52 = vadd.f32 %v3614_v23, %v3586_v30  ;;  %v3643_v47 = vpop.f32.mrf.mxu3  ;;  %v3687_v32 = vmax.f32 %v3671_v49, 0.0 }
 0x48d   : > { %v3595_v55 = vpop.f32.mrf.mxu1 }
 0x48e   : > { %v3644_v18 = vadd.f32 %v3643_v47, %v3615_v52  ;;  %v3596_v7 = vadd.f32 %v3595_v55, %v3567_v56 }
 0x491   : > { %v3672_v57 = vpop.f32.mrf.mxu0 }
 0x492   : > { %v3673_v3 = vadd.f32 %v3672_v57, %v3644_v18 }
 0x493   : > { %v3617_v15 = vpop.f32.mrf.mxu2 }
 0x494   : > { %v3688_v51 = vmax.f32 %v3673_v3, 0.0  ;;  %v3646_v62 = vpop.f32.mrf.mxu3  ;;  %v3618_v14 = vadd.f32 %v3617_v15, %v3589_v35 }
 0x496   : > { %v3694_v20 = vpack.c.bf16 %v3688_v51, %v3687_v32  ;;  %v3647_v61 = vadd.f32 %v3646_v62, %v3618_v14 }
 0x498   : > { %6040 = vmatmul.msk.bf16.gmra.mxu1 %vm3760_vm5, %v3694_v20 }
 0x499   : > { %v3675_v29 = vpop.f32.mrf.mxu0 }
 0x49a   : > { %v3676_v44 = vadd.f32 %v3675_v29, %v3647_v61 }
 0x49b   : > { %v3619_v40 = vpop.f32.mrf.mxu2 }
 0x49c   : > { %v3620_v25 = vadd.f32 %v3619_v40, %v3591_v43  ;;  %v3648_v34 = vpop.f32.mrf.mxu3  ;;  %v3689_v0 = vmax.f32 %v3676_v44, 0.0 }
 0x49e   : > { %v3649_v36 = vadd.f32 %v3648_v34, %v3620_v25 }
 0x4a1   : > { %v3677_v24 = vpop.f32.mrf.mxu0 }
 0x4a2   : > { %v3678_v45 = vadd.f32 %v3677_v24, %v3649_v36 }
 0x4a3   : > { %v3622_v60 = vpop.f32.mrf.mxu2 }
 0x4a4   : > { %v3690_v31 = vmax.f32 %v3678_v45, 0.0  ;;  %v3651_v37 = vpop.f32.mrf.mxu3  ;;  %v3623_v46 = vadd.f32 %v3622_v60, %v3594_v4 }
 0x4a6   : > { %v3695_v19 = vpack.c.bf16 %v3690_v31, %v3689_v0  ;;  %v3652_v39 = vadd.f32 %v3651_v37, %v3623_v46 }
 0x4a8   : > { %6041 = vmatmul.msk.bf16.gmra.mxu1 %vm3760_vm5, %v3695_v19 }
 0x4a9   : > { %v3680_v11 = vpop.f32.mrf.mxu0 }
 0x4aa   : > { %v3681_v16 = vadd.f32 %v3680_v11, %v3652_v39 }
 0x4ab   : > { %v3624_v13 = vpop.f32.mrf.mxu2 }
 0x4ac   : > { %v3625_v5 = vadd.f32 %v3624_v13, %v3596_v7  ;;  %v3653_v27 = vpop.f32.mrf.mxu3  ;;  %v3691_v21 = vmax.f32 %v3681_v16, 0.0 }
 0x4ae   : > { %v3654_v38 = vadd.f32 %v3653_v27, %v3625_v5 }
 0x4b1   : > { %v3682_v26 = vpop.f32.mrf.mxu0 }
 0x4b2   : > { %v3683_v22 = vadd.f32 %v3682_v26, %v3654_v38 }
 0x4b4   : > { %v3692_v53 = vmax.f32 %v3683_v22, 0.0 }
 0x4b6   : > { %v3696_v10 = vpack.c.bf16 %v3692_v53, %v3691_v21 }
 0x4b8   : > { %6042 = vmatmul.msk.bf16.gmra.mxu1 %vm3760_vm5, %v3696_v10 }
 0x505   : > { %v3786_v6 = vpop.f32.mrf.mxu1 }
 0x506   : > { %v3806_v8 = vpack.c.bf16 %v3786_v6, %v3786_v6 }
 0x508   : > { %3815 = vst.msk [vmem:[#allocation5] sm:$0xf] %vm3814_vm6, %v3806_v8 }
 0x50d   : > { %v3788_v50 = vpop.f32.mrf.mxu1 }
 0x50e   : > { %v3807_v2 = vpack.c.bf16 %v3788_v50, %v3788_v50 }
 0x50f   : > { %v3823_v59 = vld [vmem:[#allocation5] sm:$0xf] }
 0x510   : > { %v3936_v28 = vld [vmem:[#allocation5] sm:$0xf]  ;;  %3832 = vst.msk [vmem:[#allocation6] sm:$0xf] %vm3831_vm7, %v3823_v59 }
 0x511   : > { %v3840_v30 = vld [vmem:[#allocation5] sm:$0xf]  ;;  %3952 = vrot.lane.b32.xlu0 %v3936_v28, %s6718_s13  ;;  %3816 = vst.msk [vmem:[#allocation5 + $0x4] sm:$0xf] %vm3814_vm6, %v3807_v2 }
 0x512   : > { %3856 = vrot.lane.b32.xlu1 %v3840_v30, %s9248_s16  ;;  %v3888_v52 = vld [vmem:[#allocation5] sm:$0xf] }
 0x513   : > { %v4128_v5 = vld [vmem:[#allocation5] sm:$0xf] }
 0x514   : > { %v4032_v39 = vld [vmem:[#allocation5] sm:$0xf] }
 0x515   : > { %v3791_v63 = vpop.f32.mrf.mxu1 }
 0x516   : > { %v3808_v23 = vpack.c.bf16 %v3791_v63, %v3791_v63 }
 0x518   : > { %v3824_v47 = vld [vmem:[#allocation5 + $0x4] sm:$0xf]  ;;  %3817 = vst.msk [vmem:[#allocation5 + $0x8] sm:$0xf] %vm3814_vm6, %v3808_v23 }
 0x519   : > { %3904 = vrot.lane.b32.xlu0 %v3888_v52, %s9259_s29  ;;  %v3937_v33 = vld [vmem:[#allocation5 + $0x4] sm:$0xf]  ;;  %3833 = vst.msk [vmem:[#allocation6 + $0x4] sm:$0xf] %vm3831_vm7, %v3824_v47 }
 0x51a   : > { %3954 = vrot.lane.b32.xlu1 %v3937_v33, %s6718_s13  ;;  %v3841_v49 = vld [vmem:[#allocation5 + $0x4] sm:$0xf] }
 0x51b   : > { %3858 = vrot.lane.b32.xlu2 %v3841_v49, %s9248_s16  ;;  %v3889_v32 = vld [vmem:[#allocation5 + $0x4] sm:$0xf] }
 0x51c   : > { %v4129_v26 = vld [vmem:[#allocation5 + $0x4] sm:$0xf] }
 0x51d   : > { %v3793_v18 = vpop.f32.mrf.mxu1  ;;  %v4033_v21 = vld [vmem:[#allocation5 + $0x4] sm:$0xf] }
 0x51e   : > { %v3809_v57 = vpack.c.bf16 %v3793_v18, %v3793_v18 }
 0x51f   : > { %v3825_v3 = vld [vmem:[#allocation5 + $0x8] sm:$0xf] }
 0x520   : > { %v3890_v54 = vld [vmem:[#allocation5 + $0x8] sm:$0xf]  ;;  %3834 = vst.msk [vmem:[#allocation6 + $0x8] sm:$0xf] %vm3831_vm7, %v3825_v3 }
 0x521   : > { %v3842_v15 = vld [vmem:[#allocation5 + $0x8] sm:$0xf]  ;;  %3908 = vrot.lane.b32.xlu0 %v3890_v54, %s9259_s29  ;;  %3818 = vst.msk [vmem:[#allocation5 + $0xc] sm:$0xf] %vm3814_vm6, %v3809_v57  ;;  %v3985_v54 = vld [vmem:[#allocation5 + $0x4] sm:$0xf] }
 0x522   : > { %3906 = vrot.lane.b32.xlu1 %v3889_v32, %s9259_s29  ;;  %v3938_v9 = vld [vmem:[#allocation5 + $0x8] sm:$0xf] }
 0x523   : > { %3860 = vrot.lane.b32.xlu2 %v3842_v15, %s9248_s16  ;;  %v4034_v14 = vld [vmem:[#allocation5 + $0x8] sm:$0xf] }
 0x524   : > { %v4130_v38 = vld [vmem:[#allocation5 + $0x8] sm:$0xf] }
 0x525   : > { %v3796_v51 = vpop.f32.mrf.mxu1  ;;  %v4082_v6 = vld [vmem:[#allocation5 + $0x8] sm:$0xf] }
 0x526   : > { %v3810_v62 = vpack.c.bf16 %v3796_v51, %v3796_v51  ;;  %v3986_v3 = vld [vmem:[#allocation5 + $0x8] sm:$0xf] }
 0x528   : > { %v3826_v12 = vld [vmem:[#allocation5 + $0xc] sm:$0xf]  ;;  %3819 = vst.msk [vmem:[#allocation5 + $0x10] sm:$0xf] %vm3814_vm6, %v3810_v62 }
 0x529   : > { %v3939_v20 = vld [vmem:[#allocation5 + $0xc] sm:$0xf]  ;;  %3835 = vst.msk [vmem:[#allocation6 + $0xc] sm:$0xf] %vm3831_vm7, %v3826_v12 }
 0x52a   : > { %3956 = vrot.lane.b32.xlu1 %v3938_v9, %s6718_s13  ;;  %v3843_v17 = vld [vmem:[#allocation5 + $0xc] sm:$0xf] }
 0x52b   : > { %3958 = vrot.lane.b32.xlu2 %v3939_v20, %s6718_s13  ;;  %3862 = vrot.lane.b32.xlu0 %v3843_v17, %s9248_s16  ;;  %v4035_v40 = vld [vmem:[#allocation5 + $0xc] sm:$0xf]  ;;  %v3984_v20 = vld [vmem:[#allocation5] sm:$0xf] }
 0x52c   : > { %v3891_v61 = vld [vmem:[#allocation5 + $0xc] sm:$0xf] }
 0x52d   : > { %v3798_v42 = vpop.f32.mrf.mxu1  ;;  %v4131_v7 = vld [vmem:[#allocation5 + $0xc] sm:$0xf] }
 0x52e   : > { %v3811_v35 = vpack.c.bf16 %v3798_v42, %v3798_v42  ;;  %v3987_v33 = vld [vmem:[#allocation5 + $0xc] sm:$0xf] }
 0x52f   : > { %v3827_v29 = vld [vmem:[#allocation5 + $0x10] sm:$0xf]  ;;  %v4083_v9 = vld [vmem:[#allocation5 + $0xc] sm:$0xf] }
 0x530   : > { %v3844_v43 = vld [vmem:[#allocation5 + $0x10] sm:$0xf]  ;;  %3836 = vst.msk [vmem:[#allocation6 + $0x10] sm:$0xf] %vm3831_vm7, %v3827_v29 }
 0x531   : > { %3820 = vst.msk [vmem:[#allocation5 + $0x14] sm:$0xf] %vm3814_vm6, %v3811_v35  ;;  %v3940_v44 = vld [vmem:[#allocation5 + $0x10] sm:$0xf] }
 0x532   : > { %4052 = vrot.lane.b32.xlu1 %v4034_v14, %s6719_s14  ;;  %v3892_v36 = vld [vmem:[#allocation5 + $0x10] sm:$0xf] }
 0x533   : > { %4054 = vrot.lane.b32.xlu2 %v4035_v40, %s6719_s14  ;;  %3864 = vrot.lane.b32.xlu0 %v3844_v43, %s9248_s16  ;;  %v4036_v0 = vld [vmem:[#allocation5 + $0x10] sm:$0xf]  ;;  %v4080_v43 = vld [vmem:[#allocation5] sm:$0xf] }
 0x534   : > { %v4132_v31 = vld [vmem:[#allocation5 + $0x10] sm:$0xf] }
 0x535   : > { %v3801_v25 = vpop.f32.mrf.mxu1  ;;  %v3988_v16 = vld [vmem:[#allocation5 + $0x10] sm:$0xf] }
 0x536   : > { %v3812_v34 = vpack.c.bf16 %v3801_v25, %v3801_v25  ;;  %v4084_v28 = vld [vmem:[#allocation5 + $0x10] sm:$0xf] }
 0x538   : > { %v3828_v1 = vld [vmem:[#allocation5 + $0x14] sm:$0xf]  ;;  %3821 = vst.msk [vmem:[#allocation5 + $0x18] sm:$0xf] %vm3814_vm6, %v3812_v34 }
 0x539   : > { %3837 = vst.msk [vmem:[#allocation6 + $0x14] sm:$0xf] %vm3831_vm7, %v3828_v1  ;;  %v3941_v37 = vld [vmem:[#allocation5 + $0x14] sm:$0xf]  ;;  %v4081_v1 = vld [vmem:[#allocation5 + $0x4] sm:$0xf] }
 0x53a   : > { %3910 = vrot.lane.b32.xlu1 %v3891_v61, %s9259_s29  ;;  %v3845_v48 = vld [vmem:[#allocation5 + $0x14] sm:$0xf] }
 0x53b   : > { %3960 = vrot.lane.b32.xlu2 %v3940_v44, %s6718_s13  ;;  %3912 = vrot.lane.b32.xlu0 %v3892_v36, %s9259_s29  ;;  %v4037_v19 = vld [vmem:[#allocation5 + $0x14] sm:$0xf]  ;;  %v4180_v44 = vld [vmem:[#allocation5 + $0x10] sm:$0xf] }
 0x53c   : > { %v4133_v58 = vld [vmem:[#allocation5 + $0x14] sm:$0xf] }
 0x53d   : > { %v3803_v24 = vpop.f32.mrf.mxu1  ;;  %v3893_v55 = vld [vmem:[#allocation5 + $0x14] sm:$0xf] }
 0x53e   : > { %v3813_v45 = vpack.c.bf16 %v3803_v24, %v3803_v24  ;;  %v4085_v22 = vld [vmem:[#allocation5 + $0x14] sm:$0xf] }
 0x53f   : > { %v3829_v60 = vld [vmem:[#allocation5 + $0x18] sm:$0xf]  ;;  %v3989_v52 = vld [vmem:[#allocation5 + $0x14] sm:$0xf] }
 0x540   : > { %3838 = vst.msk [vmem:[#allocation6 + $0x18] sm:$0xf] %vm3831_vm7, %v3829_v60  ;;  %v3942_v56 = vld [vmem:[#allocation5 + $0x18] sm:$0xf]  ;;  %v4181_v61 = vld [vmem:[#allocation5 + $0x14] sm:$0xf] }
 0x541   : > { %3822 = vst.msk [vmem:[#allocation5 + $0x1c] sm:$0xf] %vm3814_vm6, %v3813_v45  ;;  %v3894_v4 = vld [vmem:[#allocation5 + $0x18] sm:$0xf]  ;;  %v4178_v60 = vld [vmem:[#allocation5 + $0x8] sm:$0xf] }
 0x542   : > { %4056 = vrot.lane.b32.xlu1 %v4036_v0, %s6719_s14  ;;  %v3846_v11 = vld [vmem:[#allocation5 + $0x18] sm:$0xf]  ;;  %v4176_v0 = vld [vmem:[#allocation5] sm:$0xf] }
 0x543   : > { %4152 = vrot.lane.b32.xlu2 %v4132_v31, %s6720_s22  ;;  %3962 = vrot.lane.b32.xlu0 %v3941_v37, %s6718_s13  ;;  %v4134_v46 = vld [vmem:[#allocation5 + $0x18] sm:$0xf] }
 0x544   : > { %v4038_v13 = vld [vmem:[#allocation5 + $0x18] sm:$0xf] }
 0x545   : > { %v3990_v8 = vld [vmem:[#allocation5 + $0x18] sm:$0xf] }
 0x546   : > { %v4086_v2 = vld [vmem:[#allocation5 + $0x18] sm:$0xf] }
 0x547   : > { %v4182_v29 = vld [vmem:[#allocation5 + $0x18] sm:$0xf] }
 0x548   : > { %v3830_v41 = vld [vmem:[#allocation5 + $0x1c] sm:$0xf] }
 0x549   : > { %3839 = vst.msk [vmem:[#allocation6 + $0x1c] sm:$0xf] %vm3831_vm7, %v3830_v41  ;;  %v3847_v27 = vld [vmem:[#allocation5 + $0x1c] sm:$0xf] }
 0x54a   : > { %3866 = vrot.lane.b32.xlu1 %v3845_v48, %s9248_s16  ;;  %v3943_v10 = vld [vmem:[#allocation5 + $0x1c] sm:$0xf] }
 0x54b   : > { %4058 = vrot.lane.b32.xlu2 %v4037_v19, %s6719_s14  ;;  %4154 = vrot.lane.b32.xlu0 %v4133_v58, %s6720_s22  ;;  %v3895_v59 = vld [vmem:[#allocation5 + $0x1c] sm:$0xf]  ;;  %v4321_v19 = vld [vmem:[%s9218_s8 + $0x8] sm:$0xff]  ;;  %v4177_v58 = vld [vmem:[#allocation5 + $0x4] sm:$0xf] }
 0x54c   : > { %v4135_v47 = vld [vmem:[#allocation5 + $0x1c] sm:$0xf] }
 0x54d   : > { %v4039_v15 = vld [vmem:[#allocation5 + $0x1c] sm:$0xf] }
 0x54e   : > { %v3991_v12 = vld [vmem:[#allocation5 + $0x1c] sm:$0xf] }
 0x54f   : > { %v4087_v14 = vld [vmem:[#allocation5 + $0x1c] sm:$0xf] }
 0x550   : > { %v4183_v31 = vld [vmem:[#allocation5 + $0x1c] sm:$0xf] }
 0x552   : > { %3914 = vrot.lane.b32.xlu1 %v3893_v55, %s9259_s29  ;;  %v4179_v55 = vld [vmem:[#allocation5 + $0xc] sm:$0xf] }
 0x553   : > { %3964 = vrot.lane.b32.xlu0 %v3942_v56, %s6718_s13  ;;  %3916 = vrot.lane.b32.xlu2 %v3894_v4, %s9259_s29 }
 0x55a   : > { %3868 = vrot.lane.b32.xlu1 %v3846_v11, %s9248_s16 }
 0x55b   : > { %4150 = vrot.lane.b32.xlu0 %v4131_v7, %s6720_s22  ;;  %4156 = vrot.lane.b32.xlu2 %v4134_v46, %s6720_s22  ;;  %v4322_v7 = vld [vmem:[%s9218_s8 + $0x10] sm:$0xff]  ;;  %v4324_v46 = vld [vmem:[%s9218_s8 + $0x20] sm:$0xff] }
 0x562   : > { %4060 = vrot.lane.b32.xlu1 %v4038_v13, %s6719_s14  ;;  %v4320_v13 = vld [vmem:[%s9218_s8] sm:$0xff] }
 0x563   : > { %4144 = vrot.lane.b32.xlu0 %v4128_v5, %s6720_s22  ;;  %3870 = vrot.lane.b32.xlu2 %v3847_v27, %s9248_s16  ;;  %s9260_s16 = smov 114  }
 0x56a   : > { %4048 = vrot.lane.b32.xlu1 %v4032_v39, %s6719_s14 }
 0x56b   : > { %4008 = vrot.lane.b32.xlu0 %v3988_v16, %s6721_s24  ;;  %4148 = vrot.lane.b32.xlu2 %v4130_v38, %s6720_s22  ;;  %v4325_v16 = vld [vmem:[%s9218_s8 + $0x28] sm:$0xff]  ;;  %v4327_v38 = vld [vmem:[%s9218_s8 + $0x38] sm:$0xff] }
 0x572   : > { %4146 = vrot.lane.b32.xlu1 %v4129_v26, %s6720_s22  ;;  %v4323_v26 = vld [vmem:[%s9218_s8 + $0x18] sm:$0xff] }
 0x573   : > { %4106 = vrot.lane.b32.xlu0 %v4085_v22, %s6722_s2  ;;  %4050 = vrot.lane.b32.xlu2 %v4033_v21, %s6719_s14 }
 0x575   : > { %v3859_v53 = vpop.permute.xlu2 %3858 }
 0x576   : > { %3881 = vst.msk [vmem:[#allocation6 + $0x24] sm:$0xf] %vm3831_vm7, %v3859_v53 }
 0x57a   : > { %3966 = vrot.lane.b32.xlu1 %v3943_v10, %s6718_s13  ;;  %v4326_v10 = vld [vmem:[%s9218_s8 + $0x30] sm:$0xff] }
 0x57b   : > { %4100 = vrot.lane.b32.xlu0 %v4082_v6, %s6722_s2  ;;  %4012 = vrot.lane.b32.xlu2 %v3990_v8, %s6721_s24 }
 0x57d   : > { %v3861_v50 = vpop.permute.xlu2 %3860 }
 0x57e   : > { %3882 = vst.msk [vmem:[#allocation6 + $0x28] sm:$0xf] %vm3831_vm7, %v3861_v50 }
 0x582   : > { %4108 = vrot.lane.b32.xlu1 %v4086_v2, %s6722_s2 }
 0x583   : > { %3918 = vrot.lane.b32.xlu0 %v3895_v59, %s9259_s29  ;;  %4104 = vrot.lane.b32.xlu2 %v4084_v28, %s6722_s2  ;;  %v3953_v30 = vpop.permute.xlu0 %3952  ;;  %s377_s29 = sand.u32 1, %s6693_s18  }
 0x584   : > { %v3857_v63 = vpop.permute.xlu1 %3856  ;;  %3976 = vst.msk [vmem:[#allocation6 + $0x60] sm:$0xf] %vm3831_vm7, %v3953_v30  ;;  %s378_s0 = scalar_lea.vmem [#allocation7], %s377_s29  ;;  %s5019_s13 = scalar_lea.sflag [#allocation8], %s377_s29 }
 0x585   : > { %3880 = vst.msk [vmem:[#allocation6 + $0x20] sm:$0xf] %vm3831_vm7, %v3857_v63  ;;  %v3959_v23 = vpop.permute.xlu2 %3958  ;;  %s5029_s12 = sshll.u32 %s378_s0, 4  ;;  %s5030_s12 = int_to_ptr.vmem [resolvable:$true] %s5029_s12 }
 0x586   : > { %3979 = vst.msk [vmem:[#allocation6 + $0x6c] sm:$0xf] %vm3831_vm7, %v3959_v23 }
 0x58a   : > { %4010 = vrot.lane.b32.xlu1 %v3989_v52, %s6721_s24 }
 0x58b   : > { %4158 = vrot.lane.b32.xlu0 %v4135_v47, %s6720_s22  ;;  %4006 = vrot.lane.b32.xlu2 %v3987_v33, %s6721_s24  ;;  %v3905_v49 = vpop.permute.xlu0 %3904  ;;  %v6524_v33 = vld [vmem:[#allocation6 + $0x18] sm:$0xff] }
 0x58c   : > { %3928 = vst.msk [vmem:[#allocation6 + $0x40] sm:$0xf] %vm3831_vm7, %v3905_v49  ;;  %v3955_v18 = vpop.permute.xlu1 %3954  ;;  %v6525_v52 = vld [vmem:[#allocation6 + $0x20] sm:$0xff] }
 0x58d   : > { %3977 = vst.msk [vmem:[#allocation6 + $0x64] sm:$0xf] %vm3831_vm7, %v3955_v18  ;;  %v4055_v57 = vpop.permute.xlu2 %4054 }
 0x58e   : > { %4075 = vst.msk [vmem:[#allocation6 + $0xac] sm:$0xf] %vm3831_vm7, %v4055_v57  ;;  %v6523_v57 = vld [vmem:[#allocation6 + $0x10] sm:$0xff] }
 0x592   : > { %4004 = vrot.lane.b32.xlu1 %v3986_v3, %s6721_s24 }
 0x593   : > { %4002 = vrot.lane.b32.xlu0 %v3985_v54, %s6721_s24  ;;  %4062 = vrot.lane.b32.xlu2 %v4039_v15, %s6719_s14  ;;  %v3909_v32 = vpop.permute.xlu0 %3908  ;;  %v6522_v54 = vld [vmem:[#allocation6 + $0x8] sm:$0xff]  ;;  %s6653_s14 = sshra.s32 %s5032_s1, 4  ;;  %s6654_s14 = int_to_ptr.hbm [resolvable:$true] %s6653_s14 }
 0x594   : > { %v3907_v51 = vpop.permute.xlu1 %3906  ;;  %3930 = vst.msk [vmem:[#allocation6 + $0x48] sm:$0xf] %vm3831_vm7, %v3909_v32  ;;  %s6655_s22 = scalar_lea.hbm %s6654_s14, 1  ;;  %p6660_p0 = scmp.lt.s32.totalorder %s6654_s14, %s9221_s11 }
 0x595   : > { %3929 = vst.msk [vmem:[#allocation6 + $0x44] sm:$0xf] %vm3831_vm7, %v3907_v51  ;;  %v3961_v62 = vpop.permute.xlu2 %3960  ;;  %v6045_v51 = vld [vmem:[%s9217_s7] sm:$0xf]  ;;  %p6656_p11 = scmp.ne.s32.totalorder %s6654_s14, %s6655_s22 }
 0x596   : > { %3980 = vst.msk [vmem:[#allocation6 + $0x70] sm:$0xf] %vm3831_vm7, %v3961_v62  ;;  %v6503_v62 = vld [vmem:[%s9217_s7 + $0x10] sm:$0xf0] }
 0x597   : > { %p6657_p12 = pnand %p6656_p11, %p6821_p5 }
 0x599   : > { %p6658_p13 = pneg %p6657_p12 }
 0x59a   : > { %4102 = vrot.lane.b32.xlu1 %v4083_v9, %s6722_s2  ;;  %v6521_v9 = vld [vmem:[#allocation6] sm:$0xff] }
 0x59b   : > { %4014 = vrot.lane.b32.xlu0 %v3991_v12, %s6721_s24  ;;  %4000 = vrot.lane.b32.xlu2 %v3984_v20, %s6721_s24  ;;  %v6046_v12 = vor.u32 %v6503_v62, %v6045_v51  ;;  %v6055_v51 = vld [vmem:[%s9217_s7 + $0x1c] sm:$0xf0] }
 0x59c   : > { %v3957_v17 = vpop.permute.xlu1 %3956 }
 0x59d   : > { %3978 = vst.msk [vmem:[#allocation6 + $0x68] sm:$0xf] %vm3831_vm7, %v3957_v17  ;;  %v3863_v42 = vpop.permute.xlu0 %3862  ;;  %v4153_v35 = vpop.permute.xlu2 %4152 }
 0x59e   : > { %3883 = vst.msk [vmem:[#allocation6 + $0x2c] sm:$0xf] %vm3831_vm7, %v3863_v42 }
 0x59f   : > { %4172 = vst.msk [vmem:[#allocation6 + $0xf0] sm:$0xf] %vm3831_vm7, %v4153_v35 }
 0x5a2   : > { %4204 = vrot.lane.b32.xlu1 %v4182_v29, %s9260_s16 }
 0x5a3   : > { %4096 = vrot.lane.b32.xlu0 %v4080_v43, %s6722_s2  ;;  %4110 = vrot.lane.b32.xlu2 %v4087_v14, %s6722_s2 }
 0x5a4   : > { %v4053_v40 = vpop.permute.xlu1 %4052 }
 0x5a5   : > { %4074 = vst.msk [vmem:[#allocation6 + $0xa8] sm:$0xf] %vm3831_vm7, %v4053_v40  ;;  %v3865_v25 = vpop.permute.xlu0 %3864  ;;  %v4059_v34 = vpop.permute.xlu2 %4058  ;;  %v6526_v30 = vld [vmem:[#allocation6 + $0x28] sm:$0xff] }
 0x5a6   : > { %3884 = vst.msk [vmem:[#allocation6 + $0x30] sm:$0xf] %vm3831_vm7, %v3865_v25  ;;  %v6534_v25 = vld [vmem:[#allocation6 + $0x68] sm:$0xff] }
 0x5a7   : > { %4077 = vst.msk [vmem:[#allocation6 + $0xb4] sm:$0xf] %vm3831_vm7, %v4059_v34 }
 0x5aa   : > { %4098 = vrot.lane.b32.xlu1 %v4081_v1, %s6722_s2  ;;  %s6659_s2 = scalar_lea.hbm %s9221_s11, 2 }
 0x5ab   : > { %4202 = vrot.lane.b32.xlu0 %v4181_v61, %s9260_s16  ;;  %4200 = vrot.lane.b32.xlu2 %v4180_v44, %s9260_s16  ;;  %v6065_v44 = vld [vmem:[%s9217_s7 + $0x28] sm:$0xf]  ;;  %p6661_p1 = scmp.lt.s32.totalorder %s6659_s2, %s6655_s22 }
 0x5ac   : > { %v3911_v36 = vpop.permute.xlu1 %3910  ;;  %v6542_v61 = vld [vmem:[#allocation6 + $0xa8] sm:$0xff] }
 0x5ad   : > { %3931 = vst.msk [vmem:[#allocation6 + $0x4c] sm:$0xf] %vm3831_vm7, %v3911_v36  ;;  %v3913_v24 = vpop.permute.xlu0 %3912  ;;  %v3917_v45 = vpop.permute.xlu2 %3916  ;;  %v6508_v36 = vld [vmem:[%s9217_s7 + $0x38] sm:$0xf0]  ;;  %p6662_p2 = por %p6661_p1, %p6660_p0 }
 0x5ae   : > { %3932 = vst.msk [vmem:[#allocation6 + $0x50] sm:$0xf] %vm3831_vm7, %v3913_v24  ;;  %v6533_v24 = vld [vmem:[#allocation6 + $0x60] sm:$0xff] }
 0x5af   : > { %3934 = vst.msk [vmem:[#allocation6 + $0x58] sm:$0xf] %vm3831_vm7, %v3917_v45  ;;  %v6066_v45 = vor.u32 %v6508_v36, %v6065_v44  ;;  %v6061_v44 = vld [vmem:[%s9217_s7 + $0x10] sm:$0xf]  ;;  %v6505_v36 = vld [vmem:[%s9217_s7 + $0x20] sm:$0xf0]  ;;  %p6663_p3 = pnand %p6662_p2, %p6658_p13 }
 0x5b2   : > { %4196 = vrot.lane.b32.xlu1 %v4178_v60, %s9260_s16 }
 0x5b3   : > { %4192 = vrot.lane.b32.xlu0 %v4176_v0, %s9260_s16  ;;  %4206 = vrot.lane.b32.xlu2 %v4183_v31, %s9260_s16 }
 0x5b4   : > { %v4057_v37 = vpop.permute.xlu1 %4056 }
 0x5b5   : > { %4076 = vst.msk [vmem:[#allocation6 + $0xb0] sm:$0xf] %vm3831_vm7, %v4057_v37  ;;  %v3963_v41 = vpop.permute.xlu0 %3962  ;;  %v4157_v48 = vpop.permute.xlu2 %4156 }
 0x5b6   : > { %3981 = vst.msk [vmem:[#allocation6 + $0x74] sm:$0xf] %vm3831_vm7, %v3963_v41 }
 0x5b7   : > { %4174 = vst.msk [vmem:[#allocation6 + $0xf8] sm:$0xf] %vm3831_vm7, %v4157_v48 }
 0x5ba   : > { %4194 = vrot.lane.b32.xlu1 %v4177_v58, %s9260_s16 }
 0x5bb   : > { %4335 = vperm.xlu0 %6636, %v4321_v19   ;;  %4198 = vrot.lane.b32.xlu2 %v4179_v55, %s9260_s16 }
 0x5bc   : > { %v3867_v56 = vpop.permute.xlu1 %3866  ;;  %v6543_v14 = vld [vmem:[#allocation6 + $0xb0] sm:$0xff] }
 0x5bd   : > { %v4155_v4 = vpop.permute.xlu0 %4154  ;;  %3885 = vst.msk [vmem:[#allocation6 + $0x34] sm:$0xf] %vm3831_vm7, %v3867_v56  ;;  %v3871_v11 = vpop.permute.xlu2 %3870  ;;  %v6535_v43 = vld [vmem:[#allocation6 + $0x70] sm:$0xff]  ;;  %v6530_v56 = vld [vmem:[#allocation6 + $0x48] sm:$0xff] }
 0x5be   : > { %4173 = vst.msk [vmem:[#allocation6 + $0xf4] sm:$0xf] %vm3831_vm7, %v4155_v4 }
 0x5bf   : > { %3887 = vst.msk [vmem:[#allocation6 + $0x3c] sm:$0xf] %vm3831_vm7, %v3871_v11 }
 0x5c2   : > { %4340 = vperm.xlu1 %6634, %v4322_v7  }
 0x5c3   : > { %4350 = vperm.xlu0 %6636, %v4324_v46   ;;  %4330 = vperm.xlu2 %6635, %v4320_v13   ;;  %v6085_v46 = vld [vmem:[%s9217_s7 + $0x50] sm:$0xf]  ;;  %v6513_v13 = vld [vmem:[%s9217_s7 + $0x60] sm:$0xf0] }
 0x5c4   : > { %v3915_v5 = vpop.permute.xlu1 %3914  ;;  %v6527_v59 = vld [vmem:[#allocation6 + $0x30] sm:$0xff] }
 0x5c5   : > { %3933 = vst.msk [vmem:[#allocation6 + $0x54] sm:$0xf] %vm3831_vm7, %v3915_v5  ;;  %v3965_v27 = vpop.permute.xlu0 %3964  ;;  %v4149_v39 = vpop.permute.xlu2 %4148  ;;  %v6551_v58 = vld [vmem:[#allocation6 + $0xf0] sm:$0xff]  ;;  %v6501_v5 = vld [vmem:[%s9217_s7 + $0x4] sm:$0xf] }
 0x5c6   : > { %3982 = vst.msk [vmem:[#allocation6 + $0x78] sm:$0xf] %vm3831_vm7, %v3965_v27  ;;  %v6047_v27 = vld [vmem:[%s9217_s7 + $0x14] sm:$0xf0] }
 0x5c7   : > { %4170 = vst.msk [vmem:[#allocation6 + $0xe8] sm:$0xf] %vm3831_vm7, %v4149_v39  ;;  %v6529_v39 = vld [vmem:[#allocation6 + $0x40] sm:$0xff] }
 0x5ca   : > { %4355 = vperm.xlu1 %6634, %v4325_v16  }
 0x5cb   : > { %4365 = vperm.xlu0 %6636, %v4327_v38   ;;  %4345 = vperm.xlu2 %6635, %v4323_v26   ;;  %v6086_v38 = vor.u32 %v6513_v13, %v6085_v46  ;;  %v6050_v26 = vor.u32 %v6501_v5, %v6047_v27  ;;  %v6121_v46 = vld [vmem:[%s9217_s7 + $0x88] sm:$0xf]  ;;  %v6520_v13 = vld [vmem:[%s9217_s7 + $0x98] sm:$0xf0]  ;;  %v6113_v5 = vld [vmem:[%s9217_s7 + $0x80] sm:$0xf] }
 0x5cc   : > { %v3869_v22 = vpop.permute.xlu1 %3868  ;;  %v6531_v19 = vld [vmem:[#allocation6 + $0x50] sm:$0xff] }
 0x5cd   : > { %v4151_v21 = vpop.permute.xlu0 %4150  ;;  %3886 = vst.msk [vmem:[#allocation6 + $0x38] sm:$0xf] %vm3831_vm7, %v3869_v22  ;;  %v4051_v53 = vpop.permute.xlu2 %4050  ;;  %v6519_v27 = vld [vmem:[%s9217_s7 + $0x90] sm:$0xf0] }
 0x5ce   : > { %4171 = vst.msk [vmem:[#allocation6 + $0xec] sm:$0xf] %vm3831_vm7, %v4151_v21 }
 0x5cf   : > { %4073 = vst.msk [vmem:[#allocation6 + $0xa4] sm:$0xf] %vm3831_vm7, %v4051_v53 }
 0x5d3   : > { %4360 = vperm.xlu2 %6635, %v4326_v10  }
 0x5d4   : > { %v4061_v6 = vpop.permute.xlu1 %4060  ;;  %v6528_v8 = vld [vmem:[#allocation6 + $0x38] sm:$0xff] }
 0x5d5   : > { %v4145_v50 = vpop.permute.xlu0 %4144  ;;  %4078 = vst.msk [vmem:[#allocation6 + $0xb8] sm:$0xf] %vm3831_vm7, %v4061_v6  ;;  %v4013_v2 = vpop.permute.xlu2 %4012  ;;  %4696 = vmatpush.bf16.msrb.mxu2 %v6528_v8  ;;  %v6550_v4 = vld [vmem:[#allocation6 + $0xe8] sm:$0xff] }
 0x5d6   : > { %4168 = vst.msk [vmem:[#allocation6 + $0xe0] sm:$0xf] %vm3831_vm7, %v4145_v50 }
 0x5d7   : > { %4030 = vst.msk [vmem:[#allocation6 + $0x98] sm:$0xf] %vm3831_vm7, %v4013_v2 }
 0x5d9   : > { %4697 = vmatpush.bf16.msrb.mxu2 %v6527_v59 }
 0x5dc   : > { %v4049_v28 = vpop.permute.xlu1 %4048 }
 0x5dd   : > { %v4009_v63 = vpop.permute.xlu0 %4008  ;;  %4072 = vst.msk [vmem:[#allocation6 + $0xa0] sm:$0xf] %vm3831_vm7, %v4049_v28  ;;  %v4105_v23 = vpop.permute.xlu2 %4104  ;;  %4698 = vmatpush.bf16.msrb.mxu2 %v6526_v30  ;;  %v6105_v28 = vld [vmem:[%s9217_s7 + $0x78] sm:$0xf] }
 0x5de   : > { %4028 = vst.msk [vmem:[#allocation6 + $0x90] sm:$0xf] %vm3831_vm7, %v4009_v63 }
 0x5df   : > { %4124 = vst.msk [vmem:[#allocation6 + $0xd0] sm:$0xf] %vm3831_vm7, %v4105_v23 }
 0x5e1   : > { %4699 = vmatpush.bf16.msrb.mxu2 %v6525_v52  ;;  %v6518_v52 = vld [vmem:[%s9217_s7 + $0x88] sm:$0xf0] }
 0x5e4   : > { %v4147_v47 = vpop.permute.xlu1 %4146  ;;  %v6541_v60 = vld [vmem:[#allocation6 + $0xa0] sm:$0xff] }
 0x5e5   : > { %v4107_v49 = vpop.permute.xlu0 %4106  ;;  %4169 = vst.msk [vmem:[#allocation6 + $0xe4] sm:$0xf] %vm3831_vm7, %v4147_v47  ;;  %v4007_v18 = vpop.permute.xlu2 %4006  ;;  %4700 = vmatpush.bf16.msrb.mxu2 %v6524_v33  ;;  %v6506_v47 = vld [vmem:[%s9217_s7 + $0x2c] sm:$0xf]  ;;  %v6067_v33 = vld [vmem:[%s9217_s7 + $0x3c] sm:$0xf0] }
 0x5e6   : > { %4125 = vst.msk [vmem:[#allocation6 + $0xd4] sm:$0xf] %vm3831_vm7, %v4107_v49  ;;  %v6053_v49 = vld [vmem:[%s9217_s7 + $0x8] sm:$0xf] }
 0x5e7   : > { %4027 = vst.msk [vmem:[#allocation6 + $0x8c] sm:$0xf] %vm3831_vm7, %v4007_v18  ;;  %v6504_v18 = vld [vmem:[%s9217_s7 + $0x18] sm:$0xf0] }
 0x5e9   : > { %4701 = vmatpush.bf16.msrb.mxu2 %v6523_v57 }
 0x5ec   : > { %v3967_v3 = vpop.permute.xlu1 %3966  ;;  %v6549_v16 = vld [vmem:[#allocation6 + $0xe0] sm:$0xff] }
 0x5ed   : > { %v4101_v15 = vpop.permute.xlu0 %4100  ;;  %3983 = vst.msk [vmem:[#allocation6 + $0x7c] sm:$0xf] %vm3831_vm7, %v3967_v3  ;;  %v4063_v32 = vpop.permute.xlu2 %4062  ;;  %4702 = vmatpush.bf16.msrb.mxu2 %v6522_v54  ;;  %v6547_v50 = vld [vmem:[#allocation6 + $0xd0] sm:$0xff]  ;;  %v6106_v3 = vor.u32 %v6518_v52, %v6105_v28  ;;  %v6070_v54 = vor.u32 %v6506_v47, %v6067_v33 }
 0x5ee   : > { %4122 = vst.msk [vmem:[#allocation6 + $0xc8] sm:$0xf] %vm3831_vm7, %v4101_v15  ;;  %v6054_v15 = vor.u32 %v6504_v18, %v6053_v49 }
 0x5ef   : > { %4079 = vst.msk [vmem:[#allocation6 + $0xbc] sm:$0xf] %vm3831_vm7, %v4063_v32  ;;  %v6502_v32 = vld [vmem:[%s9217_s7 + $0xc] sm:$0xf] }
 0x5f1   : > { %4703 = vmatpush.bf16.msrb.mxu2 %v6521_v9 }
 0x5f4   : > { %v4109_v20 = vpop.permute.xlu1 %4108  ;;  %v6536_v17 = vld [vmem:[#allocation6 + $0x78] sm:$0xff]  ;;  %4704 = vmatmul.bf16.vlgmr.msrb.gmra.mxu2 %v6046_v12 }
 0x5f5   : > { %4126 = vst.msk [vmem:[#allocation6 + $0xd8] sm:$0xf] %vm3831_vm7, %v4109_v20  ;;  %v3919_v42 = vpop.permute.xlu0 %3918  ;;  %v4001_v35 = vpop.permute.xlu2 %4000  ;;  %4725 = vmatpush.bf16.msra.mxu3 %v6536_v17  ;;  %v6058_v17 = vor.u32 %v6502_v32, %v6055_v51 }
 0x5f6   : > { %3935 = vst.msk [vmem:[#allocation6 + $0x5c] sm:$0xf] %vm3831_vm7, %v3919_v42  ;;  %v6544_v29 = vld [vmem:[#allocation6 + $0xb8] sm:$0xff] }
 0x5f7   : > { %4024 = vst.msk [vmem:[#allocation6 + $0x80] sm:$0xf] %vm3831_vm7, %v4001_v35  ;;  %4754 = vmatpush.bf16.msrb.mxu0 %v6544_v29  ;;  %v6511_v29 = vld [vmem:[%s9217_s7 + $0x54] sm:$0xf] }
 0x5f9   : > { %4726 = vmatpush.bf16.msra.mxu3 %v6535_v43  ;;  %v6087_v43 = vld [vmem:[%s9217_s7 + $0x64] sm:$0xf0] }
 0x5fb   : > { %4755 = vmatpush.bf16.msrb.mxu0 %v6543_v14  ;;  %v6073_v14 = vld [vmem:[%s9217_s7 + $0x30] sm:$0xf] }
 0x5fc   : > { %v4011_v40 = vpop.permute.xlu1 %4010 }
 0x5fd   : > { %4029 = vst.msk [vmem:[#allocation6 + $0x94] sm:$0xf] %vm3831_vm7, %v4011_v40  ;;  %v4159_v34 = vpop.permute.xlu0 %4158  ;;  %v4111_v1 = vpop.permute.xlu2 %4110  ;;  %4727 = vmatpush.bf16.msra.mxu3 %v6534_v25  ;;  %v6532_v31 = vld [vmem:[#allocation6 + $0x58] sm:$0xff]  ;;  %v6509_v40 = vld [vmem:[%s9217_s7 + $0x40] sm:$0xf0]  ;;  %v6090_v25 = vor.u32 %v6511_v29, %v6087_v43 }
 0x5fe   : > { %4175 = vst.msk [vmem:[#allocation6 + $0xfc] sm:$0xf] %vm3831_vm7, %v4159_v34  ;;  %v6507_v34 = vld [vmem:[%s9217_s7 + $0x34] sm:$0xf] }
 0x5ff   : > { %4127 = vst.msk [vmem:[#allocation6 + $0xdc] sm:$0xf] %vm3831_vm7, %v4111_v1  ;;  %4756 = vmatpush.bf16.msrb.mxu0 %v6542_v61  ;;  %v6074_v1 = vor.u32 %v6509_v40, %v6073_v14  ;;  %v6075_v61 = vld [vmem:[%s9217_s7 + $0x44] sm:$0xf0]  ;;  %v4849_v14 = vld [vmem:[%s9219_s9] sm:$0xff] }
 0x600   : > { %v4857_v40 = vld [vmem:[%s9219_s9 + $0x40] sm:$0xff] }
 0x601   : > { %4728 = vmatpush.bf16.msra.mxu3 %v6533_v24 }
 0x603   : > { %4757 = vmatpush.bf16.msrb.mxu0 %v6541_v60  ;;  %v6062_v60 = vor.u32 %v6505_v36, %v6061_v44 }
 0x604   : > { %v4005_v0 = vpop.permute.xlu1 %4004  ;;  %4709 = vmatmul.bf16.gmra.mxu2 %v6066_v45  ;;  %v6539_v8 = vld [vmem:[#allocation6 + $0x90] sm:$0xff]  ;;  %v6078_v45 = vor.u32 %v6507_v34, %v6075_v61 }
 0x605   : > { %4026 = vst.msk [vmem:[#allocation6 + $0x88] sm:$0xf] %vm3831_vm7, %v4005_v0  ;;  %v4003_v37 = vpop.permute.xlu0 %4002  ;;  %v4201_v41 = vpop.permute.xlu2 %4200  ;;  %v6552_v48 = vld [vmem:[#allocation6 + $0xf8] sm:$0xff]  ;;  %4729 = vmatpush.bf16.msra.mxu3 %v6532_v31  ;;  %v6107_v31 = vld [vmem:[%s9217_s7 + $0x8c] sm:$0xf0] }
 0x606   : > { %4025 = vst.msk [vmem:[#allocation6 + $0x84] sm:$0xf] %vm3831_vm7, %v4003_v37  ;;  %4783 = vmatpush.bf16.msra.mxu1 %v6552_v48  ;;  %v6548_v6 = vld [vmem:[#allocation6 + $0xd8] sm:$0xff] }
 0x607   : > { %4220 = vst.msk [vmem:[#allocation6 + $0x110] sm:$0xf] %vm3831_vm7, %v4201_v41  ;;  %v6516_v0 = vld [vmem:[%s9217_s7 + $0x7c] sm:$0xf]  ;;  %v6093_v37 = vld [vmem:[%s9217_s7 + $0x58] sm:$0xf] }
 0x608   : > { %v6514_v41 = vld [vmem:[%s9217_s7 + $0x68] sm:$0xf0]  ;;  %v6110_v48 = vor.u32 %v6516_v0, %v6107_v31 }
 0x609   : > { %4730 = vmatpush.bf16.msra.mxu3 %v6531_v19  ;;  %v6512_v19 = vld [vmem:[%s9217_s7 + $0x5c] sm:$0xf] }
 0x60a   : > { %4784 = vmatpush.bf16.msra.mxu1 %v6551_v58  ;;  %v6094_v58 = vor.u32 %v6514_v41, %v6093_v37 }
 0x60c   : > { %v4103_v55 = vpop.permute.xlu1 %4102  ;;  %v6538_v63 = vld [vmem:[#allocation6 + $0x88] sm:$0xff] }
 0x60d   : > { %4123 = vst.msk [vmem:[#allocation6 + $0xcc] sm:$0xf] %vm3831_vm7, %v4103_v55  ;;  %v4015_v11 = vpop.permute.xlu0 %4014  ;;  %v4207_v7 = vpop.permute.xlu2 %4206  ;;  %4731 = vmatpush.bf16.msra.mxu3 %v6530_v56  ;;  %v6537_v57 = vld [vmem:[#allocation6 + $0x80] sm:$0xff]  ;;  %v6095_v55 = vld [vmem:[%s9217_s7 + $0x6c] sm:$0xf0] }
 0x60e   : > { %4031 = vst.msk [vmem:[#allocation6 + $0x9c] sm:$0xf] %vm3831_vm7, %v4015_v11  ;;  %4785 = vmatpush.bf16.msra.mxu1 %v6550_v4  ;;  %v6081_v56 = vld [vmem:[%s9217_s7 + $0x38] sm:$0xf]  ;;  %v6510_v4 = vld [vmem:[%s9217_s7 + $0x48] sm:$0xf0]  ;;  %v6098_v11 = vor.u32 %v6512_v19, %v6095_v55 }
 0x60f   : > { %4223 = vst.msk [vmem:[#allocation6 + $0x11c] sm:$0xf] %vm3831_vm7, %v4207_v7  ;;  %v6082_v7 = vor.u32 %v6510_v4, %v6081_v56  ;;  %v4850_v55 = vld [vmem:[%s9219_s9 + $0x8] sm:$0xff] }
 0x611   : > { %4732 = vmatpush.bf16.msra.mxu3 %v6529_v39  ;;  %v6122_v39 = vor.u32 %v6520_v13, %v6121_v46 }
 0x612   : > { %4786 = vmatpush.bf16.msra.mxu1 %v6549_v16  ;;  %v6517_v16 = vld [vmem:[%s9217_s7 + $0x84] sm:$0xf] }
 0x614   : > { %v4205_v22 = vpop.permute.xlu1 %4204  ;;  %4714 = vmatmul.bf16.gmra.mxu2 %v6086_v38  ;;  %4733 = vmatmul.bf16.vlgmr.msra.gmra.mxu3 %v6050_v26  ;;  %v6546_v23 = vld [vmem:[#allocation6 + $0xc8] sm:$0xff]  ;;  %v6114_v38 = vor.u32 %v6519_v27, %v6113_v5  ;;  %v6115_v26 = vld [vmem:[%s9217_s7 + $0x94] sm:$0xf0] }
 0x615   : > { %4222 = vst.msk [vmem:[#allocation6 + $0x118] sm:$0xf] %vm3831_vm7, %v4205_v22  ;;  %v4097_v21 = vpop.permute.xlu0 %4096  ;;  %v4199_v53 = vpop.permute.xlu2 %4198  ;;  %v6540_v10 = vld [vmem:[#allocation6 + $0x98] sm:$0xff]  ;;  %v6101_v22 = vld [vmem:[%s9217_s7 + $0x60] sm:$0xf] }
 0x616   : > { %4120 = vst.msk [vmem:[#allocation6 + $0xc0] sm:$0xf] %vm3831_vm7, %v4097_v21  ;;  %4758 = vmatpush.bf16.msrb.mxu0 %v6540_v10  ;;  %4787 = vmatpush.bf16.msra.mxu1 %v6548_v6  ;;  %v6515_v21 = vld [vmem:[%s9217_s7 + $0x70] sm:$0xf0] }
 0x617   : > { %4219 = vst.msk [vmem:[#allocation6 + $0x10c] sm:$0xf] %vm3831_vm7, %v4199_v53  ;;  %v6118_v53 = vor.u32 %v6517_v16, %v6115_v26  ;;  %v6102_v10 = vor.u32 %v6515_v21, %v6101_v22  ;;  %v4858_v16 = vld [vmem:[%s9219_s9 + $0x48] sm:$0xff]  ;;  %v4851_v21 = vld [vmem:[%s9219_s9 + $0x10] sm:$0xff] }
 0x61a   : > { %4759 = vmatpush.bf16.msrb.mxu0 %v6539_v8  ;;  %4788 = vmatpush.bf16.msra.mxu1 %v6547_v50 }
 0x61c   : > { %v4099_v2 = vpop.permute.xlu1 %4098  ;;  %v6556_v59 = vld [vmem:[#allocation6 + $0x118] sm:$0xff] }
 0x61d   : > { %4121 = vst.msk [vmem:[#allocation6 + $0xc4] sm:$0xf] %vm3831_vm7, %v4099_v2  ;;  %v4203_v30 = vpop.permute.xlu0 %4202  ;;  %4816 = vmatpush.bf16.msra.mxu2 %v6556_v59  ;;  %6570 = vmatpush.bf16.msrb.mxu3 %v6556_v59 }
 0x61e   : > { %4221 = vst.msk [vmem:[#allocation6 + $0x114] sm:$0xf] %vm3831_vm7, %v4203_v30  ;;  %4760 = vmatpush.bf16.msrb.mxu0 %v6538_v63  ;;  %4789 = vmatpush.bf16.msra.mxu1 %v6546_v23 }
 0x622   : > { %4761 = vmatpush.bf16.msrb.mxu0 %v6537_v57 }
 0x624   : > { %v4197_v62 = vpop.permute.xlu1 %4196  ;;  %v6545_v9 = vld [vmem:[#allocation6 + $0xc0] sm:$0xff]  ;;  %4719 = vmatmul.bf16.gmra.mxu2 %v6106_v3  ;;  %4738 = vmatmul.bf16.gmra.mxu3 %v6070_v54  ;;  %v4331_v54 = vpop.permute.xlu2 %4330 }
 0x625   : > { %4218 = vst.msk [vmem:[#allocation6 + $0x108] sm:$0xf] %vm3831_vm7, %v4197_v62  ;;  %v4193_v12 = vpop.permute.xlu0 %4192  ;;  %v6555_v20 = vld [vmem:[#allocation6 + $0x110] sm:$0xff]  ;;  %4762 = vmatmul.bf16.vlgmr.msrb.gmra.mxu0 %v6054_v15  ;;  %4790 = vmatpush.bf16.msra.mxu1 %v6545_v9 }
 0x626   : > { %4216 = vst.msk [vmem:[#allocation6 + $0x100] sm:$0xf] %vm3831_vm7, %v4193_v12  ;;  %4817 = vmatpush.bf16.msra.mxu2 %v6555_v20  ;;  %6571 = vmatpush.bf16.msrb.mxu3 %v6555_v20 }
 0x628   : > { %4791 = vmatmul.bf16.vlgmr.msra.gmra.mxu1 %v6058_v17 }
 0x62c   : > { %v4195_v42 = vpop.permute.xlu1 %4194  ;;  %v6554_v35 = vld [vmem:[#allocation6 + $0x108] sm:$0xff] }
 0x62d   : > { %4217 = vst.msk [vmem:[#allocation6 + $0x104] sm:$0xf] %vm3831_vm7, %v4195_v42  ;;  %4818 = vmatpush.bf16.msra.mxu2 %v6554_v35  ;;  %6572 = vmatpush.bf16.msrb.mxu3 %v6554_v35  ;;  %v4336_v42 = vpop.permute.xlu0 %4335 }
 0x634   : > { %v6553_v24 = vld [vmem:[#allocation6 + $0x100] sm:$0xff]  ;;  %4743 = vmatmul.bf16.gmra.mxu3 %v6090_v25  ;;  %v4341_v37 = vpop.permute.xlu1 %4340 }
 0x635   : > { %4767 = vmatmul.bf16.gmra.mxu0 %v6074_v1  ;;  %4819 = vmatpush.bf16.msra.mxu2 %v6553_v24 }
 0x636   : > { %6573 = vmatpush.bf16.msrb.mxu3 %v6553_v24 }
 0x638   : > { %4796 = vmatmul.bf16.gmra.mxu1 %v6078_v45  ;;  %6267 = vmatmul.msk.bf16.vlgmr.msra.gmra.mxu2 %vm3527_vm3, %v6062_v60 }
 0x644   : > { %4748 = vmatmul.bf16.gmra.mxu3 %v6110_v48 }
 0x645   : > { %4772 = vmatmul.bf16.gmra.mxu0 %v6094_v58  ;;  %v4346_v58 = vpop.permute.xlu2 %4345 }
 0x648   : > { %4801 = vmatmul.bf16.gmra.mxu1 %v6098_v11  ;;  %6268 = vmatmul.msk.bf16.gmra.mxu2 %vm3527_vm3, %v6082_v7 }
 0x654   : > { %6270 = vmatmul.msk.bf16.vlgmr.msrb.gmra.mxu3 %vm3527_vm3, %v6122_v39 }
 0x655   : > { %4777 = vmatmul.bf16.gmra.mxu0 %v6114_v38 }
 0x658   : > { %4806 = vmatmul.bf16.gmra.mxu1 %v6118_v53  ;;  %6269 = vmatmul.msk.bf16.gmra.mxu2 %vm3527_vm3, %v6102_v10 }
 0x677   : > { %v4705_v6 = vpop.f32.mrf.mxu2 }
 0x678   : > { %v4706_v32 = vadd.f32 %v4705_v6, %v4331_v54 }
 0x67f   : > { %v4707_v8 = vpop.f32.mrf.mxu2 }
 0x680   : > { %v4708_v29 = vadd.f32 %v4707_v8, %v4336_v42 }
 0x687   : > { %v4710_v50 = vpop.f32.mrf.mxu2 }
 0x688   : > { %v4711_v48 = vadd.f32 %v4710_v50, %v4341_v37  ;;  %v4361_v50 = vpop.permute.xlu2 %4360 }
 0x68f   : > { %v4712_v2 = vpop.f32.mrf.mxu2 }
 0x690   : > { %v4713_v26 = vadd.f32 %v4712_v2, %v4346_v58  ;;  %v4853_v58 = vld [vmem:[%s9219_s9 + $0x20] sm:$0xff] }
 0x697   : > { %v9079_v59 = vpop.f32.mrf.mxu2  ;;  %v4734_v28 = vpop.f32.mrf.mxu3 }
 0x698   : > { %v4735_v62 = vadd.f32 %v4734_v28, %v4706_v32  ;;  %v4859_v32 = vld [vmem:[%s9219_s9 + $0x50] sm:$0xff] }
 0x69f   : > { %v9081_v30 = vpop.f32.mrf.mxu2  ;;  %v4736_v63 = vpop.f32.mrf.mxu3 }
 0x6a0   : > { %v4737_v34 = vadd.f32 %v4736_v63, %v4708_v29 }
 0x6a2   : > { %v4763_v23 = vpop.f32.mrf.mxu0 }
 0x6a3   : > { %v4764_v12 = vadd.f32 %v4763_v23, %v4735_v62 }
 0x6a5   : > { %v4792_v52 = vpop.f32.mrf.mxu1 }
 0x6a6   : > { %v4793_v20 = vadd.f32 %v4792_v52, %v4764_v12  ;;  %v4860_v12 = vld [vmem:[%s9219_s9 + $0x58] sm:$0xff] }
 0x6a7   : > { %v4739_v47 = vpop.f32.mrf.mxu3  ;;  %v4720_v33 = vpop.f32.mrf.mxu2 }
 0x6a8   : > { %v4740_v4 = vadd.f32 %v4739_v47, %v4711_v48  ;;  %v4721_v63 = vadd.f32 %v4720_v33, %v4361_v50  ;;  %v4351_v47 = vpop.permute.xlu0 %4350 }
 0x6aa   : > { %v4765_v49 = vpop.f32.mrf.mxu0 }
 0x6ab   : > { %v4766_v44 = vadd.f32 %v4765_v49, %v4737_v34 }
 0x6ad   : > { %v4794_v18 = vpop.f32.mrf.mxu1 }
 0x6ae   : > { %v4795_v45 = vadd.f32 %v4794_v18, %v4766_v44  ;;  %v4356_v44 = vpop.permute.xlu1 %4355 }
 0x6af   : > { %v4741_v57 = vpop.f32.mrf.mxu3  ;;  %v9083_v15 = vpop.f32.mrf.mxu2 }
 0x6b0   : > { %v4742_v10 = vadd.f32 %v4741_v57, %v4713_v26 }
 0x6b2   : > { %v4768_v3 = vpop.f32.mrf.mxu0 }
 0x6b3   : > { %v4769_v46 = vadd.f32 %v4768_v3, %v4740_v4 }
 0x6b5   : > { %v4797_v51 = vpop.f32.mrf.mxu1 }
 0x6b6   : > { %v4798_v5 = vadd.f32 %v4797_v51, %v4769_v46  ;;  %v4716_v51 = vadd.f32 %v9079_v59, %v4351_v47  ;;  %v4855_v59 = vld [vmem:[%s9219_s9 + $0x30] sm:$0xff] }
 0x6b7   : > { %v9085_v9 = vpop.f32.mrf.mxu3 }
 0x6ba   : > { %v4770_v17 = vpop.f32.mrf.mxu0 }
 0x6bb   : > { %v4821_v35 = vpop.f32.mrf.mxu2  ;;  %v4771_v23 = vadd.f32 %v4770_v17, %v4742_v10  ;;  %v4745_v17 = vadd.f32 %v9085_v9, %v4716_v51  ;;  %v4862_v10 = vld [vmem:[%s9219_s9 + $0x68] sm:$0xff] }
 0x6bc   : > { %v4822_v43 = vadd.f32 %v4821_v35, %v4793_v20 }
 0x6bd   : > { %v4799_v25 = vpop.f32.mrf.mxu1 }
 0x6be   : > { %v4841_v1 = vmax.f32 %v4822_v43, 0.0  ;;  %v4800_v49 = vadd.f32 %v4799_v25, %v4771_v23 }
 0x6bf   : > { %v9093_v61 = vpop.f32.mrf.mxu3 }
 0x6c0   : > { %v4865_v36 = vmul.f32 %v4849_v14, %v4841_v1  ;;  %v4873_v24 = vmul.f32 %v4857_v40, %v4841_v1  ;;  %v4946_v14 = vlaneseq }
 0x6c2   : > { %v4773_v60 = vpop.f32.mrf.mxu0  ;;  %v4906_v0 = vsel %vm4881_vm8, %v4873_v24, 0.0  ;;  %v4882_v31 = vsel %vm4881_vm8, %v4865_v36, 0.0  ;;  %v5003_v1 = vshrl.u32 %v4946_v14, 7 }
 0x6c3   : > { %v4823_v41 = vpop.f32.mrf.mxu2  ;;  %4907 = vadd.xlane.f32.xlu0 %v4906_v0  ;;  %4883 = vadd.xlane.f32.xlu1 %v4882_v31  ;;  %v4774_v40 = vadd.f32 %v4773_v60, %v4745_v17  ;;  %v4366_v0 = vpop.permute.xlu0 %4365  ;;  %v4718_v60 = vadd.f32 %v9081_v30, %v4356_v44  ;;  %v4852_v30 = vld [vmem:[%s9219_s9 + $0x18] sm:$0xff] }
 0x6c4   : > { %v4824_v19 = vadd.f32 %v4823_v41, %v4795_v45  ;;  %v4723_v37 = vadd.f32 %v9083_v15, %v4366_v0  ;;  %6637 = vset.pattern.permute.xlu2 %v5003_v1 }
 0x6c5   : > { %v4802_v56 = vpop.f32.mrf.mxu1 }
 0x6c6   : > { %v4842_v11 = vmax.f32 %v4824_v19, 0.0  ;;  %v4803_v36 = vadd.f32 %v4802_v56, %v4774_v40 }
 0x6c7   : > { %v4749_v7 = vpop.f32.mrf.mxu3 }
 0x6c8   : > { %v4866_v13 = vmul.f32 %v4850_v55, %v4842_v11  ;;  %v4874_v6 = vmul.f32 %v4858_v16, %v4842_v11  ;;  %v4750_v18 = vadd.f32 %v4749_v7, %v4721_v63  ;;  %v4747_v55 = vadd.f32 %v9093_v61, %v4718_v60 }
 0x6ca   : > { %v9100_v27 = vpop.f32.mrf.mxu0  ;;  %v4885_v39 = vsel %vm4881_vm8, %v4866_v13, 0.0  ;;  %v4909_v2 = vsel %vm4881_vm8, %v4874_v6, 0.0 }
 0x6cb   : > { %v4826_v38 = vpop.f32.mrf.mxu2  ;;  %4886 = vadd.xlane.f32.xlu2 %v4885_v39  ;;  %v4776_v15 = vadd.f32 %v9100_v27, %v4747_v55 }
 0x6cc   : > { %v4827_v22 = vadd.f32 %v4826_v38, %v4798_v5 }
 0x6cd   : > { %v4804_v53 = vpop.f32.mrf.mxu1 }
 0x6ce   : > { %v4843_v8 = vmax.f32 %v4827_v22, 0.0  ;;  %v4805_v5 = vadd.f32 %v4804_v53, %v4776_v15 }
 0x6cf   : > { %v4751_v28 = vpop.f32.mrf.mxu3 }
 0x6d0   : > { %v4867_v52 = vmul.f32 %v4851_v21, %v4843_v8  ;;  %v4875_v42 = vmul.f32 %v4859_v32, %v4843_v8  ;;  %v4752_v56 = vadd.f32 %v4751_v28, %v4723_v37  ;;  %v4854_v21 = vld [vmem:[%s9219_s9 + $0x28] sm:$0xff]  ;;  %v4861_v8 = vld [vmem:[%s9219_s9 + $0x60] sm:$0xff]  ;;  %v4864_v32 = vld [vmem:[%s9219_s9 + $0x78] sm:$0xff] }
 0x6d2   : > { %v4778_v3 = vpop.f32.mrf.mxu0  ;;  %v4888_v54 = vsel %vm4881_vm8, %v4867_v52, 0.0  ;;  %v4912_v45 = vsel %vm4881_vm8, %v4875_v42, 0.0 }
 0x6d3   : > { %v4828_v57 = vpop.f32.mrf.mxu2  ;;  %4910 = vadd.xlane.f32.xlu2 %v4909_v2  ;;  %4889 = vadd.xlane.f32.xlu1 %v4888_v54  ;;  %v4779_v33 = vadd.f32 %v4778_v3, %v4750_v18  ;;  %v4856_v18 = vld [vmem:[%s9219_s9 + $0x38] sm:$0xff] }
 0x6d4   : > { %v4829_v62 = vadd.f32 %v4828_v57, %v4800_v49  ;;  %v4863_v49 = vld [vmem:[%s9219_s9 + $0x70] sm:$0xff] }
 0x6d5   : > { %v4807_v20 = vpop.f32.mrf.mxu1 }
 0x6d6   : > { %v4844_v35 = vmax.f32 %v4829_v62, 0.0  ;;  %v4808_v29 = vadd.f32 %v4807_v20, %v4779_v33 }
 0x6d7   : > { %v4836_v43 = vpop.f32.mrf.mxu3 }
 0x6d8   : > { %v4876_v25 = vmul.f32 %v4860_v12, %v4844_v35  ;;  %v4837_v34 = vadd.f32 %v4836_v43, %v4808_v29  ;;  %v4868_v39 = vmul.f32 %v4852_v30, %v4844_v35  ;;  %v6638_v43 = vld [vmem:[%s9220_s10] ss:$0 sm:$0xff] }
 0x6da   : > { %v4847_v24 = vmax.f32 %v4837_v34, 0.0  ;;  %v4915_v9 = vsel %vm4881_vm8, %v4876_v25, 0.0  ;;  %v4780_v19 = vpop.f32.mrf.mxu0  ;;  %v4891_v53 = vsel %vm4881_vm8, %v4868_v39, 0.0 }
 0x6db   : > { %v4831_v31 = vpop.f32.mrf.mxu2  ;;  %4913 = vadd.xlane.f32.xlu2 %v4912_v45  ;;  %4916 = vadd.xlane.f32.xlu1 %v4915_v9  ;;  %v4781_v46 = vadd.f32 %v4780_v19, %v4752_v56 }
 0x6dc   : > { %v4871_v41 = vmul.f32 %v4855_v59, %v4847_v24  ;;  %v4832_v48 = vadd.f32 %v4831_v31, %v4803_v36  ;;  %v4879_v3 = vmul.f32 %v4863_v49, %v4847_v24  ;;  %v9166_v59 = vand.u32 127, %v4946_v14 }
 0x6dd   : > { %v4809_v7 = vpop.f32.mrf.mxu1 }
 0x6de   : > { %v4845_v4 = vmax.f32 %v4832_v48, 0.0  ;;  %v4900_v11 = vsel %vm4881_vm8, %v4871_v41, 0.0  ;;  %v4810_v16 = vadd.f32 %v4809_v7, %v4781_v46  ;;  %v4924_v33 = vsel %vm4881_vm8, %v4879_v3, 0.0 }
 0x6df   : > { %4901 = vadd.xlane.f32.xlu0 %v4900_v11  ;;  %v4838_v61 = vpop.f32.mrf.mxu3  ;;  %v4949_v44 = vadd.s32 4294967288, %v9166_v59  ;;  %v4953_v36 = vadd.s32 4294967280, %v9166_v59  ;;  %v4957_v31 = vadd.s32 4294967272, %v9166_v59  ;;  %v4965_v19 = vadd.s32 4294967256, %v9166_v59 }
 0x6e0   : > { %v4869_v13 = vmul.f32 %v4853_v58, %v4845_v4  ;;  %v4839_v27 = vadd.f32 %v4838_v61, %v4810_v16  ;;  %v4877_v63 = vmul.f32 %v4861_v8, %v4845_v4  ;;  %v4961_v58 = vadd.s32 4294967264, %v9166_v59 }
 0x6e1   : > { %v4969_v39 = vadd.s32 4294967248, %v9166_v59 }
 0x6e2   : > { %v4894_v38 = vsel %vm4881_vm8, %v4869_v13, 0.0  ;;  %v4848_v23 = vmax.f32 %v4839_v27, 0.0  ;;  %v4918_v54 = vsel %vm4881_vm8, %v4877_v63, 0.0 }
 0x6e3   : > { %v4833_v26 = vpop.f32.mrf.mxu2  ;;  %4895 = vadd.xlane.f32.xlu2 %v4894_v38 }
 0x6e4   : > { %v4834_v22 = vadd.f32 %v4833_v26, %v4805_v5  ;;  %v4872_v2 = vmul.f32 %v4856_v18, %v4848_v23  ;;  %v4880_v57 = vmul.f32 %v4864_v32, %v4848_v23  ;;  %v4973_v5 = vadd.s32 4294967240, %v9166_v59 }
 0x6e6   : > { %v4846_v6 = vmax.f32 %v4834_v22, 0.0  ;;  %v4903_v51 = vsel %vm4881_vm8, %v4872_v2, 0.0  ;;  %v4927_v62 = vsel %vm4881_vm8, %v4880_v57, 0.0 }
 0x6e7   : > { %4892 = vadd.xlane.f32.xlu0 %v4891_v53 }
 0x6e8   : > { %v4870_v50 = vmul.f32 %v4854_v21, %v4846_v6  ;;  %v4878_v28 = vmul.f32 %v4862_v10, %v4846_v6 }
 0x6ea   : > { %v4921_v52 = vsel %vm4881_vm8, %v4878_v28, 0.0  ;;  %v4897_v47 = vsel %vm4881_vm8, %v4870_v50, 0.0 }
 0x6eb   : > { %4922 = vadd.xlane.f32.xlu2 %v4921_v52  ;;  %4898 = vadd.xlane.f32.xlu1 %v4897_v47 }
 0x6ef   : > { %4919 = vadd.xlane.f32.xlu0 %v4918_v54 }
 0x6f3   : > { %4904 = vadd.xlane.f32.xlu2 %v4903_v51  ;;  %4925 = vadd.xlane.f32.xlu1 %v4924_v33 }
 0x6f7   : > { %4928 = vadd.xlane.f32.xlu0 %v4927_v62 }
 0x70b   : > { %5006 = vperm.xlu2 %6637, %v6638_v43  }
 0x736   : > { %v4884_v20 = vpop.xlane.xlu1 %4883  ;;  %v4908_v42 = vpop.xlane.xlu0 %4907 }
 0x737   : > { %v4977_v41 = vperm.slane %v4908_v42, %v9166_v59  ;;  %v4948_v14 = vperm.slane %v4884_v20, %v9166_v59 }
 0x73e   : > { %v4887_v12 = vpop.xlane.xlu2 %4886 }
 0x73f   : > { %v4950_v9 = vperm.slane %v4887_v12, %v4949_v44 }
 0x741   : > { %v4952_v56 = vsel %vm4951_vm9, %v4950_v9, %v4948_v14 }
 0x746   : > { %v4911_v17 = vpop.xlane.xlu2 %4910  ;;  %v4890_v35 = vpop.xlane.xlu1 %4889 }
 0x747   : > { %v4978_v0 = vperm.slane %v4911_v17, %v4949_v44  ;;  %v4954_v60 = vperm.slane %v4890_v35, %v4953_v36 }
 0x749   : > { %v4979_v4 = vsel %vm4951_vm9, %v4978_v0, %v4977_v41  ;;  %v4956_v30 = vsel %vm4955_vm10, %v4954_v60, %v4952_v56 }
 0x74e   : > { %v4914_v29 = vpop.xlane.xlu2 %4913  ;;  %v4917_v25 = vpop.xlane.xlu1 %4916 }
 0x74f   : > { %v4980_v37 = vperm.slane %v4914_v29, %v4953_v36  ;;  %v4982_v11 = vperm.slane %v4917_v25, %v4957_v31 }
 0x751   : > { %v4981_v7 = vsel %vm4955_vm10, %v4980_v37, %v4979_v4 }
 0x752   : > { %v4902_v40 = vpop.xlane.xlu0 %4901  ;;  %v4983_v26 = vsel %vm4959_vm11, %v4982_v11, %v4981_v7 }
 0x753   : > { %v4970_v8 = vperm.slane %v4902_v40, %v4969_v39 }
 0x756   : > { %v4896_v34 = vpop.xlane.xlu2 %4895 }
 0x757   : > { %v4962_v16 = vperm.slane %v4896_v34, %v4961_v58 }
 0x75a   : > { %v4893_v1 = vpop.xlane.xlu0 %4892 }
 0x75b   : > { %v4958_v48 = vperm.slane %v4893_v1, %v4957_v31 }
 0x75d   : > { %v4960_v46 = vsel %vm4959_vm11, %v4958_v48, %v4956_v30 }
 0x75e   : > { %v4923_v24 = vpop.xlane.xlu2 %4922  ;;  %v4899_v45 = vpop.xlane.xlu1 %4898  ;;  %v4964_v22 = vsel %vm4963_vm12, %v4962_v16, %v4960_v46 }
 0x75f   : > { %v4966_v13 = vperm.slane %v4899_v45, %v4965_v19  ;;  %v4986_v27 = vperm.slane %v4923_v24, %v4965_v19 }
 0x761   : > { %v4968_v6 = vsel %vm4967_vm13, %v4966_v13, %v4964_v22 }
 0x762   : > { %v4920_v55 = vpop.xlane.xlu0 %4919  ;;  %v4972_v52 = vsel %vm4971_vm14, %v4970_v8, %v4968_v6 }
 0x763   : > { %v4984_v15 = vperm.slane %v4920_v55, %v4961_v58 }
 0x765   : > { %v4985_v21 = vsel %vm4963_vm12, %v4984_v15, %v4983_v26 }
 0x766   : > { %v4905_v38 = vpop.xlane.xlu2 %4904  ;;  %v4926_v61 = vpop.xlane.xlu1 %4925  ;;  %v4987_v28 = vsel %vm4967_vm13, %v4986_v27, %v4985_v21 }
 0x767   : > { %v4988_v10 = vperm.slane %v4926_v61, %v4969_v39  ;;  %v4974_v53 = vperm.slane %v4905_v38, %v4973_v5 }
 0x769   : > { %v4989_v23 = vsel %vm4971_vm14, %v4988_v10, %v4987_v28  ;;  %v4976_v47 = vsel %vm4975_vm15, %v4974_v53, %v4972_v52 }
 0x76a   : > { %v4929_v50 = vpop.xlane.xlu0 %4928 }
 0x76b   : > { %v4990_v63 = vperm.slane %v4929_v50, %v4973_v5 }
 0x76d   : > { %v4991_v49 = vsel %vm4975_vm15, %v4990_v63, %v4989_v23 }
 0x76e   : > { %v4993_v18 = vsel %vm4992_vm0, %v4991_v49, %v4976_v47  ;;  %v5007_v2 = vpop.permute.xlu2 %5006 }
 0x76f   : > { %v4996_v3 = vsel %vm4995_vm1, %v4993_v18, 0.0 }
 0x770   : > { %4997 = vadd.xlane.f32.xlu1 %v4996_v3 }
 0x7e3   : > { %v4998_v54 = vpop.xlane.xlu1 %4997 }
 0x7e4   : > { %v5009_v32 = vadd.f32 %v5007_v2, %v4998_v54 }
 0x7e6   : > { %5012 = vperm.xlu0 %6636, %v5009_v32  }
 0x858   : > { %v5013_v57 = vpop.permute.xlu0 %5012 }
 0x859   : > { %v5014_v51 = vperm.slane %v5013_v57, %v9166_v59 }
 0x85b   : > { %5017 = vst.msk [vmem:[%s378_s0] sm:$0x1] %vm5016_vm2, %v5014_v51 }
 0x85c   : > { %6666 = shalt.err (!%p6663_p3)
}
 0x85d   : > { %6575 = dma.vmem_to_hbm [thread:$0]  (%p6821_p5), %s5030_s12, 16, %s5032_s1, %s5019_s13  }
 0x85e PF: > { %p6581_p4 = scmp.ge.s32.totalorder %s6701_s20, 2  ;;  %s5043_s29 = sand.u32 1, %s6689_s17  }
 0x85f   : > { %s5044_s30 = scalar_lea.sflag [#allocation8], %s5043_s29 }
 0x860   : > { %p6578_p7 = pnand %p6581_p4, %p6825_p6 }
 0x862   : > { %p6579_p8 = pneg %p6578_p7 }
 0x864   : > { %6684 = dma.done.wait (%p6579_p8), %s5044_s30, 16  }
 0x865   : > { %6686 = vsyncadd (%p6579_p8), %s5044_s30, 4294967280  ;;  %p21_p9 = scmp.ge.s32.totalorder %s6808_s23, 4   ;;  %s9261_s17 = smov %s6693_s18 }
 0x866   : > { %s9262_s18 = smov %s6697_s19  ;;  %s9263_s19 = smov %s6819_s26 }
 0x867   : > { %s9264_s20 = smov %s6808_s23  ;;  %23 = sbr.rel (!%p21_p9) target bundleno = 7 (0x7), region = 99 }
 0x86c   :  { %5049 = vsyncpa [#allocation8], 1 }
 0x86d   :  { %5051 = vsyncpa [#allocation8 + $0x1], 1 }

</bundles_post_ra>
